<compile_context>
chip_gen: v7x
topology: tpu7x:2x2x1
jax: 0.10.0
libtpu: 0.0.40
codegen_flags: <defaults>
</compile_context>

<pallas_src>
import functools

import jax
import jax.numpy as jnp
from jax.experimental import pallas as pl
from jax.experimental.pallas import tpu as pltpu

LANE = 128
SUBLANE = 8


def _round_up(x, m):
    return (x + m - 1) // m * m


# ----------------------------- Pallas kernel -------------------------------

def _basic_block_kernel(x_ref, w1_ref, sh1_ref, w2_ref, sh2_ref, cmask_ref,
                        o_ref, o1_scr, *, H, Wp):
    """Fused BasicBlock for one image, flat (rows, Cp) layout.

    x_ref    : ((H+4)*Wp, Cp) f32   padded input (flat layout described above)
    w?_ref   : (9, Cp, Cp)    bf16  conv weights with BN scale folded in
    sh?_ref  : (1, Cp)        f32   folded BN shift
    cmask_ref: (H*Wp, 1)      f32   1.0 at valid output columns (w < W), else 0
    o_ref    : (H*Wp, Cp)     f32   output slab (lane dense, aligned full store)
    o1_scr   : ((H+4)*Wp, Cp) bf16  conv1 activation resident in VMEM
    """
    M = H * Wp
    Cp = o_ref.shape[-1]

    # Zero only the guard row-blocks (tiny, aligned stores).  The interior
    # H*Wp rows are fully overwritten by the conv1 writeback below.
    zeros_guard = jnp.zeros((2 * Wp, Cp), o1_scr.dtype)
    o1_scr[pl.ds(0, 2 * Wp), :] = zeros_guard
    o1_scr[pl.ds((H + 2) * Wp, 2 * Wp), :] = zeros_guard

    sh1 = sh1_ref[...]
    sh2 = sh2_ref[...]
    cmask = cmask_ref[...]

    # ---- conv1 (3x3, pad=1): 9 contiguous-slab bf16 matmuls, f32 accum ----
    acc = None
    for kh in range(3):
        for kw in range(3):
            start = (kh + 1) * Wp + (kw - 1)            # static offset
            blk = x_ref[pl.ds(start, M), :].astype(jnp.bfloat16)
            d = jnp.dot(blk, w1_ref[kh * 3 + kw],
                        preferred_element_type=jnp.float32)
            acc = d if acc is None else acc + d
    # bn1 (scale folded into w1) + relu; zero the invalid halo columns so they
    # serve as conv2's left/right halo.
    out1 = jnp.maximum(acc + sh1, 0.0) * cmask
    # conv1 activation stays in VMEM: aligned full-width store at offset 2*Wp.
    o1_scr[pl.ds(2 * Wp, M), :] = out1.astype(o1_scr.dtype)

    # ---- conv2 + bn2 + residual add + relu ----
    acc2 = None
    for kh in range(3):
        for kw in range(3):
            start = (kh + 1) * Wp + (kw - 1)
            d = jnp.dot(o1_scr[pl.ds(start, M), :], w2_ref[kh * 3 + kw],
                        preferred_element_type=jnp.float32)
            acc2 = d if acc2 is None else acc2 + d
    residual = x_ref[pl.ds(2 * Wp, M), :]                # f32, aligned slice
    o_ref[...] = jnp.maximum(acc2 + sh2 + residual, 0.0).astype(o_ref.dtype)


def _fused_basic_block(x_flat, w1p, sh1p, w2p, sh2p, cmask, H, Wp):
    """x_flat: (N, (H+4)*Wp, Cp) f32.  Returns (N, H*Wp, Cp) f32."""
    N, rows, Cp = x_flat.shape
    M = H * Wp
    kernel = functools.partial(_basic_block_kernel, H=H, Wp=Wp)
    return pl.pallas_call(
        kernel,
        out_shape=jax.ShapeDtypeStruct((N, M, Cp), jnp.float32),
        grid_spec=pltpu.PrefetchScalarGridSpec(
            num_scalar_prefetch=0,
            grid=(N,),
            in_specs=[
                pl.BlockSpec((None, rows, Cp), lambda n: (n, 0, 0)),
                pl.BlockSpec((9, Cp, Cp), lambda n: (0, 0, 0)),
                pl.BlockSpec((1, Cp), lambda n: (0, 0)),
                pl.BlockSpec((9, Cp, Cp), lambda n: (0, 0, 0)),
                pl.BlockSpec((1, Cp), lambda n: (0, 0)),
                pl.BlockSpec((M, 1), lambda n: (0, 0)),
            ],
            out_specs=pl.BlockSpec((None, M, Cp), lambda n: (n, 0, 0)),
            scratch_shapes=[pltpu.VMEM((rows, Cp), jnp.bfloat16)],
        ),
        compiler_params=pltpu.CompilerParams(
            dimension_semantics=("parallel",),
            vmem_limit_bytes=48 * 1024 * 1024,   # below v7x's 64 MiB physical
        ),
    )(x_flat, w1p, sh1p, w2p, sh2p, cmask)


# ------------------------------ JAX wrapper ---------------------------------

def _fold_bn(gamma, beta, mean, var, eps=1e-5):
    scale = gamma / jnp.sqrt(var + eps)
    shift = beta - mean * scale
    return scale, shift


@functools.partial(jax.jit, static_argnames=("stride",))
def basic_block_forward(x_nchw, params, stride=1, eps=1e-5):
    """BasicBlock.forward (stride=1, downsample=None) via one fused Pallas kernel."""
    if stride != 1:
        raise NotImplementedError("only stride=1 / downsample=None is supported")
    (w1, g1, b1, m1, v1, w2, g2, b2, m2, v2) = params
    if w1.shape[2] != w1.shape[3]:
        raise NotImplementedError("inplanes must equal planes (no downsample)")

    x = jnp.transpose(x_nchw, (0, 2, 3, 1)).astype(jnp.float32)   # NCHW -> NHWC
    N, H, W, C = x.shape
    Cp = _round_up(C, LANE)              # lane-dense channel width
    Wp = _round_up(W + 2, SUBLANE)       # sublane-aligned padded row width

    s1, sh1 = _fold_bn(g1, b1, m1, v1, eps)
    s2, sh2 = _fold_bn(g2, b2, m2, v2, eps)

    def prep_w(w, scale):
        wf = w * scale[None, None, None, :]                       # fold BN scale
        wf = jnp.pad(wf, ((0, 0), (0, 0),
                          (0, Cp - w.shape[2]), (0, Cp - w.shape[3])))
        return wf.reshape(9, Cp, Cp).astype(jnp.bfloat16)

    def prep_shift(sh):
        return jnp.pad(sh, (0, Cp - sh.shape[0])).reshape(1, Cp).astype(
            jnp.float32)

    w1p, w2p = prep_w(w1, s1), prep_w(w2, s2)
    sh1p, sh2p = prep_shift(sh1), prep_shift(sh2)

    # Pad to (N, H+4, Wp, Cp): 2 zero guard rows top/bottom, zero columns
    # [W, Wp) (right halo + wrap-around left halo), zero channel pad to Cp.
    xp = jnp.pad(x, ((0, 0), (2, 2), (0, Wp - W), (0, Cp - C)))
    x_flat = xp.reshape(N, (H + 4) * Wp, Cp)

    # Valid-output-column mask in flat layout (1.0 where w < W).
    cmask = (jnp.arange(Wp) < W).astype(jnp.float32)
    cmask = jnp.tile(cmask, H)[:, None]                            # (H*Wp, 1)

    out = _fused_basic_block(x_flat, w1p, sh1p, w2p, sh2p, cmask, H, Wp)
    out = out.reshape(N, H, Wp, Cp)[:, :, :W, :C]
    return jnp.transpose(out, (0, 3, 1, 2))                        # NHWC -> NCHW


# ----------------------------- pure-JAX reference ---------------------------

def reference_basic_block(x_nchw, params, eps=1e-5, match_kernel=False):
    """BasicBlock reference. match_kernel=True mirrors the kernel's numerics
    (bf16 matmul operands with BN scale folded into weights, f32 accumulation)."""
    (w1, g1, b1, m1, v1, w2, g2, b2, m2, v2) = params
    x = jnp.transpose(x_nchw, (0, 2, 3, 1))

    def conv(v, w):
        if match_kernel:
            v = v.astype(jnp.bfloat16)
            w = w.astype(jnp.bfloat16)
        return jax.lax.conv_general_dilated(
            v, w, window_strides=(1, 1), padding=((1, 1), (1, 1)),
            dimension_numbers=("NHWC", "HWIO", "NHWC"),
            preferred_element_type=jnp.float32)

    s1, sh1 = _fold_bn(g1, b1, m1, v1, eps)
    s2, sh2 = _fold_bn(g2, b2, m2, v2, eps)
    if match_kernel:
        out = jax.nn.relu(conv(x, w1 * s1) + sh1)
        out = conv(out, w2 * s2) + sh2
    else:
        out = jax.nn.relu(conv(x, w1) * s1 + sh1)
        out = conv(out, w2) * s2 + sh2
    out = jax.nn.relu(out + x)
    return jnp.transpose(out, (0, 3, 1, 2))


# --------------------------------- main --------------------------------------

if __name__ == "__main__":
    inplanes = planes = 4
    N, H, W = 2, 16, 16

    key = jax.random.PRNGKey(0)
    keys = jax.random.split(key, 11)
    k_x, k_w1, k_w2 = keys[0], keys[1], keys[2]

    # Conv weights in HWIO layout (3, 3, Cin, Cout) == PyTorch (Cout,Cin,3,3)
    # transposed to (kh, kw, ci, co).
    w1 = 0.1 * jax.random.normal(k_w1, (3, 3, inplanes, planes), jnp.float32)
    w2 = 0.1 * jax.random.normal(k_w2, (3, 3, planes, planes), jnp.float32)

    # BatchNorm2d params / running stats (non-trivial to exercise the folding).
    g1 = 1.0 + 0.1 * jax.random.normal(keys[3], (planes,), jnp.float32)
    b1 = 0.1 * jax.random.normal(keys[4], (planes,), jnp.float32)
    m1 = 0.1 * jax.random.normal(keys[5], (planes,), jnp.float32)
    v1 = 1.0 + 0.1 * jax.random.uniform(keys[6], (planes,), jnp.float32)
    g2 = 1.0 + 0.1 * jax.random.normal(keys[7], (planes,), jnp.float32)
    b2 = 0.1 * jax.random.normal(keys[8], (planes,), jnp.float32)
    m2 = 0.1 * jax.random.normal(keys[9], (planes,), jnp.float32)
    v2 = 1.0 + 0.1 * jax.random.uniform(keys[10], (planes,), jnp.float32)

    params = (w1, g1, b1, m1, v1, w2, g2, b2, m2, v2)

    x = jax.random.normal(k_x, (N, inplanes, H, W), jnp.float32)   # NCHW input

    out = jax.block_until_ready(basic_block_forward(x, params, stride=1))
    assert out.shape == (N, planes, H, W)

    # Tight check vs a reference that mirrors the kernel's bf16 numerics.
    ref_match = reference_basic_block(x, params, match_kernel=True)
    assert jnp.allclose(out, ref_match, atol=2e-3, rtol=2e-3), \
        "mismatch vs bf16-matched reference"

    # Looser check vs the pure-f32 PyTorch-semantics reference.
    ref_f32 = reference_basic_block(x, params, match_kernel=False)
    assert jnp.allclose(out, ref_f32, atol=5e-2, rtol=5e-2), \
        "mismatch vs f32 reference"

    print("KERNEL_OK")
</pallas_src>

<mosaic_0001>
module attributes {stable_mosaic.version = 11 : i64} {
  func.func @_basic_block_kernel(%arg0: i32, %arg1: memref<1x480x128xf32, #tpu.memory_space<vmem>>, %arg2: memref<9x128x128xbf16, #tpu.memory_space<vmem>>, %arg3: memref<1x128xf32, #tpu.memory_space<vmem>>, %arg4: memref<9x128x128xbf16, #tpu.memory_space<vmem>>, %arg5: memref<1x128xf32, #tpu.memory_space<vmem>>, %arg6: memref<384x1xf32, #tpu.memory_space<vmem>>, %arg7: memref<1x384x128xf32, #tpu.memory_space<vmem>>, %arg8: memref<480x128xbf16, #tpu.memory_space<vmem>>) attributes {dimension_semantics = [#tpu.dimension_semantics<parallel>], iteration_bounds = array<i64: 2>, scalar_prefetch = 0 : i64, scratch_operands = 1 : i64, tpu.core_type = #tpu.core_type<tc>, window_params = [{transform_indices = @transform_0, window_bounds = array<i64: 1, 480, 128>}, {pipeline_mode = #tpu.pipeline_mode<synchronous>, transform_indices = @transform_1, window_bounds = array<i64: 9, 128, 128>}, {pipeline_mode = #tpu.pipeline_mode<synchronous>, transform_indices = @transform_2, window_bounds = array<i64: 1, 128>}, {pipeline_mode = #tpu.pipeline_mode<synchronous>, transform_indices = @transform_3, window_bounds = array<i64: 9, 128, 128>}, {pipeline_mode = #tpu.pipeline_mode<synchronous>, transform_indices = @transform_4, window_bounds = array<i64: 1, 128>}, {pipeline_mode = #tpu.pipeline_mode<synchronous>, transform_indices = @transform_5, window_bounds = array<i64: 384, 1>}, {transform_indices = @transform_6, window_bounds = array<i64: 1, 384, 128>}]} {
    %cst = arith.constant 0.000000e+00 : bf16
    %0 = vector.broadcast %cst : bf16 to vector<48x128xbf16>
    %c0 = arith.constant 0 : index
    %c0_0 = arith.constant 0 : index
    %1 = vector.load %arg8[%c0, %c0_0] : memref<480x128xbf16, #tpu.memory_space<vmem>>, vector<48x128xbf16>
    tpu.vector_store %arg8[%c0, %c0_0], %0 {strides = array<i32>} : memref<480x128xbf16, #tpu.memory_space<vmem>>, vector<48x128xbf16>,
    %c432 = arith.constant 432 : index
    %c0_1 = arith.constant 0 : index
    %2 = vector.load %arg8[%c432, %c0_1] : memref<480x128xbf16, #tpu.memory_space<vmem>>, vector<48x128xbf16>
    tpu.vector_store %arg8[%c432, %c0_1], %0 {strides = array<i32>} : memref<480x128xbf16, #tpu.memory_space<vmem>>, vector<48x128xbf16>,
    %c0_2 = arith.constant 0 : index
    %c0_3 = arith.constant 0 : index
    %3 = vector.load %arg3[%c0_2, %c0_3] : memref<1x128xf32, #tpu.memory_space<vmem>>, vector<1x128xf32>
    %c0_4 = arith.constant 0 : index
    %c0_5 = arith.constant 0 : index
    %4 = vector.load %arg5[%c0_4, %c0_5] : memref<1x128xf32, #tpu.memory_space<vmem>>, vector<1x128xf32>
    %c0_6 = arith.constant 0 : index
    %c0_7 = arith.constant 0 : index
    %5 = vector.load %arg6[%c0_6, %c0_7] : memref<384x1xf32, #tpu.memory_space<vmem>>, vector<384x1xf32>
    %c0_8 = arith.constant 0 : index
    %c23 = arith.constant 23 : index
    %c0_9 = arith.constant 0 : index
    %6 = vector.load %arg1[%c0_8, %c23, %c0_9] : memref<1x480x128xf32, #tpu.memory_space<vmem>>, vector<1x384x128xf32>
    %7 = vector.shape_cast %6 : vector<1x384x128xf32> to vector<384x128xf32>
    %8 = arith.truncf %7 : vector<384x128xf32> to vector<384x128xbf16>
    %c0_10 = arith.constant 0 : index
    %c0_11 = arith.constant 0 : index
    %c0_12 = arith.constant 0 : index
    %9 = vector.load %arg2[%c0_10, %c0_11, %c0_12] : memref<9x128x128xbf16, #tpu.memory_space<vmem>>, vector<1x128x128xbf16>
    %10 = vector.shape_cast %9 : vector<1x128x128xbf16> to vector<128x128xbf16>
    %cst_13 = arith.constant dense<0.000000e+00> : vector<384x128xf32>
    %11 = tpu.matmul %8, %10, %cst_13 {dimension_numbers = #tpu.dot_dimension_numbers<[1], [0], [0], [1], [0, 0, 1, 1], [], []>} : vector<384x128xbf16>, vector<128x128xbf16>, vector<384x128xf32> -> vector<384x128xf32>
    %c0_14 = arith.constant 0 : index
    %c24 = arith.constant 24 : index
    %c0_15 = arith.constant 0 : index
    %12 = vector.load %arg1[%c0_14, %c24, %c0_15] : memref<1x480x128xf32, #tpu.memory_space<vmem>>, vector<1x384x128xf32>
    %13 = vector.shape_cast %12 : vector<1x384x128xf32> to vector<384x128xf32>
    %14 = arith.truncf %13 : vector<384x128xf32> to vector<384x128xbf16>
    %c1 = arith.constant 1 : index
    %c0_16 = arith.constant 0 : index
    %c0_17 = arith.constant 0 : index
    %15 = vector.load %arg2[%c1, %c0_16, %c0_17] : memref<9x128x128xbf16, #tpu.memory_space<vmem>>, vector<1x128x128xbf16>
    %16 = vector.shape_cast %15 : vector<1x128x128xbf16> to vector<128x128xbf16>
    %cst_18 = arith.constant dense<0.000000e+00> : vector<384x128xf32>
    %17 = tpu.matmul %14, %16, %cst_18 {dimension_numbers = #tpu.dot_dimension_numbers<[1], [0], [0], [1], [0, 0, 1, 1], [], []>} : vector<384x128xbf16>, vector<128x128xbf16>, vector<384x128xf32> -> vector<384x128xf32>
    %18 = arith.addf %11, %17 : vector<384x128xf32>
    %c0_19 = arith.constant 0 : index
    %c25 = arith.constant 25 : index
    %c0_20 = arith.constant 0 : index
    %19 = vector.load %arg1[%c0_19, %c25, %c0_20] : memref<1x480x128xf32, #tpu.memory_space<vmem>>, vector<1x384x128xf32>
    %20 = vector.shape_cast %19 : vector<1x384x128xf32> to vector<384x128xf32>
    %21 = arith.truncf %20 : vector<384x128xf32> to vector<384x128xbf16>
    %c2 = arith.constant 2 : index
    %c0_21 = arith.constant 0 : index
    %c0_22 = arith.constant 0 : index
    %22 = vector.load %arg2[%c2, %c0_21, %c0_22] : memref<9x128x128xbf16, #tpu.memory_space<vmem>>, vector<1x128x128xbf16>
    %23 = vector.shape_cast %22 : vector<1x128x128xbf16> to vector<128x128xbf16>
    %cst_23 = arith.constant dense<0.000000e+00> : vector<384x128xf32>
    %24 = tpu.matmul %21, %23, %cst_23 {dimension_numbers = #tpu.dot_dimension_numbers<[1], [0], [0], [1], [0, 0, 1, 1], [], []>} : vector<384x128xbf16>, vector<128x128xbf16>, vector<384x128xf32> -> vector<384x128xf32>
    %25 = arith.addf %18, %24 : vector<384x128xf32>
    %c0_24 = arith.constant 0 : index
    %c47 = arith.constant 47 : index
    %c0_25 = arith.constant 0 : index
    %26 = vector.load %arg1[%c0_24, %c47, %c0_25] : memref<1x480x128xf32, #tpu.memory_space<vmem>>, vector<1x384x128xf32>
    %27 = vector.shape_cast %26 : vector<1x384x128xf32> to vector<384x128xf32>
    %28 = arith.truncf %27 : vector<384x128xf32> to vector<384x128xbf16>
    %c3 = arith.constant 3 : index
    %c0_26 = arith.constant 0 : index
    %c0_27 = arith.constant 0 : index
    %29 = vector.load %arg2[%c3, %c0_26, %c0_27] : memref<9x128x128xbf16, #tpu.memory_space<vmem>>, vector<1x128x128xbf16>
    %30 = vector.shape_cast %29 : vector<1x128x128xbf16> to vector<128x128xbf16>
    %cst_28 = arith.constant dense<0.000000e+00> : vector<384x128xf32>
    %31 = tpu.matmul %28, %30, %cst_28 {dimension_numbers = #tpu.dot_dimension_numbers<[1], [0], [0], [1], [0, 0, 1, 1], [], []>} : vector<384x128xbf16>, vector<128x128xbf16>, vector<384x128xf32> -> vector<384x128xf32>
    %32 = arith.addf %25, %31 : vector<384x128xf32>
    %c0_29 = arith.constant 0 : index
    %c48 = arith.constant 48 : index
    %c0_30 = arith.constant 0 : index
    %33 = vector.load %arg1[%c0_29, %c48, %c0_30] : memref<1x480x128xf32, #tpu.memory_space<vmem>>, vector<1x384x128xf32>
    %34 = vector.shape_cast %33 : vector<1x384x128xf32> to vector<384x128xf32>
    %35 = arith.truncf %34 : vector<384x128xf32> to vector<384x128xbf16>
    %c4 = arith.constant 4 : index
    %c0_31 = arith.constant 0 : index
    %c0_32 = arith.constant 0 : index
    %36 = vector.load %arg2[%c4, %c0_31, %c0_32] : memref<9x128x128xbf16, #tpu.memory_space<vmem>>, vector<1x128x128xbf16>
    %37 = vector.shape_cast %36 : vector<1x128x128xbf16> to vector<128x128xbf16>
    %cst_33 = arith.constant dense<0.000000e+00> : vector<384x128xf32>
    %38 = tpu.matmul %35, %37, %cst_33 {dimension_numbers = #tpu.dot_dimension_numbers<[1], [0], [0], [1], [0, 0, 1, 1], [], []>} : vector<384x128xbf16>, vector<128x128xbf16>, vector<384x128xf32> -> vector<384x128xf32>
    %39 = arith.addf %32, %38 : vector<384x128xf32>
    %c0_34 = arith.constant 0 : index
    %c49 = arith.constant 49 : index
    %c0_35 = arith.constant 0 : index
    %40 = vector.load %arg1[%c0_34, %c49, %c0_35] : memref<1x480x128xf32, #tpu.memory_space<vmem>>, vector<1x384x128xf32>
    %41 = vector.shape_cast %40 : vector<1x384x128xf32> to vector<384x128xf32>
    %42 = arith.truncf %41 : vector<384x128xf32> to vector<384x128xbf16>
    %c5 = arith.constant 5 : index
    %c0_36 = arith.constant 0 : index
    %c0_37 = arith.constant 0 : index
    %43 = vector.load %arg2[%c5, %c0_36, %c0_37] : memref<9x128x128xbf16, #tpu.memory_space<vmem>>, vector<1x128x128xbf16>
    %44 = vector.shape_cast %43 : vector<1x128x128xbf16> to vector<128x128xbf16>
    %cst_38 = arith.constant dense<0.000000e+00> : vector<384x128xf32>
    %45 = tpu.matmul %42, %44, %cst_38 {dimension_numbers = #tpu.dot_dimension_numbers<[1], [0], [0], [1], [0, 0, 1, 1], [], []>} : vector<384x128xbf16>, vector<128x128xbf16>, vector<384x128xf32> -> vector<384x128xf32>
    %46 = arith.addf %39, %45 : vector<384x128xf32>
    %c0_39 = arith.constant 0 : index
    %c71 = arith.constant 71 : index
    %c0_40 = arith.constant 0 : index
    %47 = vector.load %arg1[%c0_39, %c71, %c0_40] : memref<1x480x128xf32, #tpu.memory_space<vmem>>, vector<1x384x128xf32>
    %48 = vector.shape_cast %47 : vector<1x384x128xf32> to vector<384x128xf32>
    %49 = arith.truncf %48 : vector<384x128xf32> to vector<384x128xbf16>
    %c6 = arith.constant 6 : index
    %c0_41 = arith.constant 0 : index
    %c0_42 = arith.constant 0 : index
    %50 = vector.load %arg2[%c6, %c0_41, %c0_42] : memref<9x128x128xbf16, #tpu.memory_space<vmem>>, vector<1x128x128xbf16>
    %51 = vector.shape_cast %50 : vector<1x128x128xbf16> to vector<128x128xbf16>
    %cst_43 = arith.constant dense<0.000000e+00> : vector<384x128xf32>
    %52 = tpu.matmul %49, %51, %cst_43 {dimension_numbers = #tpu.dot_dimension_numbers<[1], [0], [0], [1], [0, 0, 1, 1], [], []>} : vector<384x128xbf16>, vector<128x128xbf16>, vector<384x128xf32> -> vector<384x128xf32>
    %53 = arith.addf %46, %52 : vector<384x128xf32>
    %c0_44 = arith.constant 0 : index
    %c72 = arith.constant 72 : index
    %c0_45 = arith.constant 0 : index
    %54 = vector.load %arg1[%c0_44, %c72, %c0_45] : memref<1x480x128xf32, #tpu.memory_space<vmem>>, vector<1x384x128xf32>
    %55 = vector.shape_cast %54 : vector<1x384x128xf32> to vector<384x128xf32>
    %56 = arith.truncf %55 : vector<384x128xf32> to vector<384x128xbf16>
    %c7 = arith.constant 7 : index
    %c0_46 = arith.constant 0 : index
    %c0_47 = arith.constant 0 : index
    %57 = vector.load %arg2[%c7, %c0_46, %c0_47] : memref<9x128x128xbf16, #tpu.memory_space<vmem>>, vector<1x128x128xbf16>
    %58 = vector.shape_cast %57 : vector<1x128x128xbf16> to vector<128x128xbf16>
    %cst_48 = arith.constant dense<0.000000e+00> : vector<384x128xf32>
    %59 = tpu.matmul %56, %58, %cst_48 {dimension_numbers = #tpu.dot_dimension_numbers<[1], [0], [0], [1], [0, 0, 1, 1], [], []>} : vector<384x128xbf16>, vector<128x128xbf16>, vector<384x128xf32> -> vector<384x128xf32>
    %60 = arith.addf %53, %59 : vector<384x128xf32>
    %c0_49 = arith.constant 0 : index
    %c73 = arith.constant 73 : index
    %c0_50 = arith.constant 0 : index
    %61 = vector.load %arg1[%c0_49, %c73, %c0_50] : memref<1x480x128xf32, #tpu.memory_space<vmem>>, vector<1x384x128xf32>
    %62 = vector.shape_cast %61 : vector<1x384x128xf32> to vector<384x128xf32>
    %63 = arith.truncf %62 : vector<384x128xf32> to vector<384x128xbf16>
    %c8 = arith.constant 8 : index
    %c0_51 = arith.constant 0 : index
    %c0_52 = arith.constant 0 : index
    %64 = vector.load %arg2[%c8, %c0_51, %c0_52] : memref<9x128x128xbf16, #tpu.memory_space<vmem>>, vector<1x128x128xbf16>
    %65 = vector.shape_cast %64 : vector<1x128x128xbf16> to vector<128x128xbf16>
    %cst_53 = arith.constant dense<0.000000e+00> : vector<384x128xf32>
    %66 = tpu.matmul %63, %65, %cst_53 {dimension_numbers = #tpu.dot_dimension_numbers<[1], [0], [0], [1], [0, 0, 1, 1], [], []>} : vector<384x128xbf16>, vector<128x128xbf16>, vector<384x128xf32> -> vector<384x128xf32>
    %67 = arith.addf %60, %66 : vector<384x128xf32>
    %68 = vector.broadcast %3 : vector<1x128xf32> to vector<384x128xf32>
    %69 = arith.addf %67, %68 : vector<384x128xf32>
    %cst_54 = arith.constant 0.000000e+00 : f32
    %70 = vector.broadcast %cst_54 : f32 to vector<384x128xf32>
    %71 = arith.maximumf %69, %70 : vector<384x128xf32>
    %72 = vector.broadcast %5 : vector<384x1xf32> to vector<384x128xf32>
    %73 = arith.mulf %71, %72 : vector<384x128xf32>
    %74 = arith.truncf %73 : vector<384x128xf32> to vector<384x128xbf16>
    %c48_55 = arith.constant 48 : index
    %c0_56 = arith.constant 0 : index
    %75 = vector.load %arg8[%c48_55, %c0_56] : memref<480x128xbf16, #tpu.memory_space<vmem>>, vector<384x128xbf16>
    tpu.vector_store %arg8[%c48_55, %c0_56], %74 {strides = array<i32>} : memref<480x128xbf16, #tpu.memory_space<vmem>>, vector<384x128xbf16>,
    %c23_57 = arith.constant 23 : index
    %c0_58 = arith.constant 0 : index
    %76 = vector.load %arg8[%c23_57, %c0_58] : memref<480x128xbf16, #tpu.memory_space<vmem>>, vector<384x128xbf16>
    %c0_59 = arith.constant 0 : index
    %c0_60 = arith.constant 0 : index
    %c0_61 = arith.constant 0 : index
    %77 = vector.load %arg4[%c0_59, %c0_60, %c0_61] : memref<9x128x128xbf16, #tpu.memory_space<vmem>>, vector<1x128x128xbf16>
    %78 = vector.shape_cast %77 : vector<1x128x128xbf16> to vector<128x128xbf16>
    %cst_62 = arith.constant dense<0.000000e+00> : vector<384x128xf32>
    %79 = tpu.matmul %76, %78, %cst_62 {dimension_numbers = #tpu.dot_dimension_numbers<[1], [0], [0], [1], [0, 0, 1, 1], [], []>} : vector<384x128xbf16>, vector<128x128xbf16>, vector<384x128xf32> -> vector<384x128xf32>
    %c24_63 = arith.constant 24 : index
    %c0_64 = arith.constant 0 : index
    %80 = vector.load %arg8[%c24_63, %c0_64] : memref<480x128xbf16, #tpu.memory_space<vmem>>, vector<384x128xbf16>
    %c1_65 = arith.constant 1 : index
    %c0_66 = arith.constant 0 : index
    %c0_67 = arith.constant 0 : index
    %81 = vector.load %arg4[%c1_65, %c0_66, %c0_67] : memref<9x128x128xbf16, #tpu.memory_space<vmem>>, vector<1x128x128xbf16>
    %82 = vector.shape_cast %81 : vector<1x128x128xbf16> to vector<128x128xbf16>
    %cst_68 = arith.constant dense<0.000000e+00> : vector<384x128xf32>
    %83 = tpu.matmul %80, %82, %cst_68 {dimension_numbers = #tpu.dot_dimension_numbers<[1], [0], [0], [1], [0, 0, 1, 1], [], []>} : vector<384x128xbf16>, vector<128x128xbf16>, vector<384x128xf32> -> vector<384x128xf32>
    %84 = arith.addf %79, %83 : vector<384x128xf32>
    %c25_69 = arith.constant 25 : index
    %c0_70 = arith.constant 0 : index
    %85 = vector.load %arg8[%c25_69, %c0_70] : memref<480x128xbf16, #tpu.memory_space<vmem>>, vector<384x128xbf16>
    %c2_71 = arith.constant 2 : index
    %c0_72 = arith.constant 0 : index
    %c0_73 = arith.constant 0 : index
    %86 = vector.load %arg4[%c2_71, %c0_72, %c0_73] : memref<9x128x128xbf16, #tpu.memory_space<vmem>>, vector<1x128x128xbf16>
    %87 = vector.shape_cast %86 : vector<1x128x128xbf16> to vector<128x128xbf16>
    %cst_74 = arith.constant dense<0.000000e+00> : vector<384x128xf32>
    %88 = tpu.matmul %85, %87, %cst_74 {dimension_numbers = #tpu.dot_dimension_numbers<[1], [0], [0], [1], [0, 0, 1, 1], [], []>} : vector<384x128xbf16>, vector<128x128xbf16>, vector<384x128xf32> -> vector<384x128xf32>
    %89 = arith.addf %84, %88 : vector<384x128xf32>
    %c47_75 = arith.constant 47 : index
    %c0_76 = arith.constant 0 : index
    %90 = vector.load %arg8[%c47_75, %c0_76] : memref<480x128xbf16, #tpu.memory_space<vmem>>, vector<384x128xbf16>
    %c3_77 = arith.constant 3 : index
    %c0_78 = arith.constant 0 : index
    %c0_79 = arith.constant 0 : index
    %91 = vector.load %arg4[%c3_77, %c0_78, %c0_79] : memref<9x128x128xbf16, #tpu.memory_space<vmem>>, vector<1x128x128xbf16>
    %92 = vector.shape_cast %91 : vector<1x128x128xbf16> to vector<128x128xbf16>
    %cst_80 = arith.constant dense<0.000000e+00> : vector<384x128xf32>
    %93 = tpu.matmul %90, %92, %cst_80 {dimension_numbers = #tpu.dot_dimension_numbers<[1], [0], [0], [1], [0, 0, 1, 1], [], []>} : vector<384x128xbf16>, vector<128x128xbf16>, vector<384x128xf32> -> vector<384x128xf32>
    %94 = arith.addf %89, %93 : vector<384x128xf32>
    %c48_81 = arith.constant 48 : index
    %c0_82 = arith.constant 0 : index
    %95 = vector.load %arg8[%c48_81, %c0_82] : memref<480x128xbf16, #tpu.memory_space<vmem>>, vector<384x128xbf16>
    %c4_83 = arith.constant 4 : index
    %c0_84 = arith.constant 0 : index
    %c0_85 = arith.constant 0 : index
    %96 = vector.load %arg4[%c4_83, %c0_84, %c0_85] : memref<9x128x128xbf16, #tpu.memory_space<vmem>>, vector<1x128x128xbf16>
    %97 = vector.shape_cast %96 : vector<1x128x128xbf16> to vector<128x128xbf16>
    %cst_86 = arith.constant dense<0.000000e+00> : vector<384x128xf32>
    %98 = tpu.matmul %95, %97, %cst_86 {dimension_numbers = #tpu.dot_dimension_numbers<[1], [0], [0], [1], [0, 0, 1, 1], [], []>} : vector<384x128xbf16>, vector<128x128xbf16>, vector<384x128xf32> -> vector<384x128xf32>
    %99 = arith.addf %94, %98 : vector<384x128xf32>
    %c49_87 = arith.constant 49 : index
    %c0_88 = arith.constant 0 : index
    %100 = vector.load %arg8[%c49_87, %c0_88] : memref<480x128xbf16, #tpu.memory_space<vmem>>, vector<384x128xbf16>
    %c5_89 = arith.constant 5 : index
    %c0_90 = arith.constant 0 : index
    %c0_91 = arith.constant 0 : index
    %101 = vector.load %arg4[%c5_89, %c0_90, %c0_91] : memref<9x128x128xbf16, #tpu.memory_space<vmem>>, vector<1x128x128xbf16>
    %102 = vector.shape_cast %101 : vector<1x128x128xbf16> to vector<128x128xbf16>
    %cst_92 = arith.constant dense<0.000000e+00> : vector<384x128xf32>
    %103 = tpu.matmul %100, %102, %cst_92 {dimension_numbers = #tpu.dot_dimension_numbers<[1], [0], [0], [1], [0, 0, 1, 1], [], []>} : vector<384x128xbf16>, vector<128x128xbf16>, vector<384x128xf32> -> vector<384x128xf32>
    %104 = arith.addf %99, %103 : vector<384x128xf32>
    %c71_93 = arith.constant 71 : index
    %c0_94 = arith.constant 0 : index
    %105 = vector.load %arg8[%c71_93, %c0_94] : memref<480x128xbf16, #tpu.memory_space<vmem>>, vector<384x128xbf16>
    %c6_95 = arith.constant 6 : index
    %c0_96 = arith.constant 0 : index
    %c0_97 = arith.constant 0 : index
    %106 = vector.load %arg4[%c6_95, %c0_96, %c0_97] : memref<9x128x128xbf16, #tpu.memory_space<vmem>>, vector<1x128x128xbf16>
    %107 = vector.shape_cast %106 : vector<1x128x128xbf16> to vector<128x128xbf16>
    %cst_98 = arith.constant dense<0.000000e+00> : vector<384x128xf32>
    %108 = tpu.matmul %105, %107, %cst_98 {dimension_numbers = #tpu.dot_dimension_numbers<[1], [0], [0], [1], [0, 0, 1, 1], [], []>} : vector<384x128xbf16>, vector<128x128xbf16>, vector<384x128xf32> -> vector<384x128xf32>
    %109 = arith.addf %104, %108 : vector<384x128xf32>
    %c72_99 = arith.constant 72 : index
    %c0_100 = arith.constant 0 : index
    %110 = vector.load %arg8[%c72_99, %c0_100] : memref<480x128xbf16, #tpu.memory_space<vmem>>, vector<384x128xbf16>
    %c7_101 = arith.constant 7 : index
    %c0_102 = arith.constant 0 : index
    %c0_103 = arith.constant 0 : index
    %111 = vector.load %arg4[%c7_101, %c0_102, %c0_103] : memref<9x128x128xbf16, #tpu.memory_space<vmem>>, vector<1x128x128xbf16>
    %112 = vector.shape_cast %111 : vector<1x128x128xbf16> to vector<128x128xbf16>
    %cst_104 = arith.constant dense<0.000000e+00> : vector<384x128xf32>
    %113 = tpu.matmul %110, %112, %cst_104 {dimension_numbers = #tpu.dot_dimension_numbers<[1], [0], [0], [1], [0, 0, 1, 1], [], []>} : vector<384x128xbf16>, vector<128x128xbf16>, vector<384x128xf32> -> vector<384x128xf32>
    %114 = arith.addf %109, %113 : vector<384x128xf32>
    %c73_105 = arith.constant 73 : index
    %c0_106 = arith.constant 0 : index
    %115 = vector.load %arg8[%c73_105, %c0_106] : memref<480x128xbf16, #tpu.memory_space<vmem>>, vector<384x128xbf16>
    %c8_107 = arith.constant 8 : index
    %c0_108 = arith.constant 0 : index
    %c0_109 = arith.constant 0 : index
    %116 = vector.load %arg4[%c8_107, %c0_108, %c0_109] : memref<9x128x128xbf16, #tpu.memory_space<vmem>>, vector<1x128x128xbf16>
    %117 = vector.shape_cast %116 : vector<1x128x128xbf16> to vector<128x128xbf16>
    %cst_110 = arith.constant dense<0.000000e+00> : vector<384x128xf32>
    %118 = tpu.matmul %115, %117, %cst_110 {dimension_numbers = #tpu.dot_dimension_numbers<[1], [0], [0], [1], [0, 0, 1, 1], [], []>} : vector<384x128xbf16>, vector<128x128xbf16>, vector<384x128xf32> -> vector<384x128xf32>
    %119 = arith.addf %114, %118 : vector<384x128xf32>
    %c0_111 = arith.constant 0 : index
    %c48_112 = arith.constant 48 : index
    %c0_113 = arith.constant 0 : index
    %120 = vector.load %arg1[%c0_111, %c48_112, %c0_113] : memref<1x480x128xf32, #tpu.memory_space<vmem>>, vector<1x384x128xf32>
    %121 = vector.shape_cast %120 : vector<1x384x128xf32> to vector<384x128xf32>
    %122 = vector.broadcast %4 : vector<1x128xf32> to vector<384x128xf32>
    %123 = arith.addf %119, %122 : vector<384x128xf32>
    %124 = arith.addf %123, %121 : vector<384x128xf32>
    %cst_114 = arith.constant 0.000000e+00 : f32
    %125 = vector.broadcast %cst_114 : f32 to vector<384x128xf32>
    %126 = arith.maximumf %124, %125 : vector<384x128xf32>
    %c0_115 = arith.constant 0 : index
    %c0_116 = arith.constant 0 : index
    %c0_117 = arith.constant 0 : index
    %127 = vector.load %arg7[%c0_115, %c0_116, %c0_117] : memref<1x384x128xf32, #tpu.memory_space<vmem>>, vector<1x384x128xf32>
    %128 = vector.shape_cast %127 : vector<1x384x128xf32> to vector<384x128xf32>
    %129 = vector.shape_cast %126 : vector<384x128xf32> to vector<1x384x128xf32>
    tpu.vector_store %arg7[%c0_115, %c0_116, %c0_117], %129 {strides = array<i32>} : memref<1x384x128xf32, #tpu.memory_space<vmem>>, vector<1x384x128xf32>,
    return
  }
  func.func @transform_0(%arg0: i32) -> (i32, i32, i32) {
    %c0_i32 = arith.constant 0 : i32
    %c0_i32_0 = arith.constant 0 : i32
    %c0_i32_1 = arith.constant 0 : i32
    return %arg0, %c0_i32, %c0_i32_0 : i32, i32, i32
  }
  func.func @transform_1(%arg0: i32) -> (i32, i32, i32) {
    %c0_i32 = arith.constant 0 : i32
    %c0_i32_0 = arith.constant 0 : i32
    %c0_i32_1 = arith.constant 0 : i32
    %c0_i32_2 = arith.constant 0 : i32
    return %c0_i32, %c0_i32_0, %c0_i32_1 : i32, i32, i32
  }
  func.func @transform_2(%arg0: i32) -> (i32, i32) {
    %c0_i32 = arith.constant 0 : i32
    %c0_i32_0 = arith.constant 0 : i32
    %c0_i32_1 = arith.constant 0 : i32
    return %c0_i32, %c0_i32_0 : i32, i32
  }
  func.func @transform_3(%arg0: i32) -> (i32, i32, i32) {
    %c0_i32 = arith.constant 0 : i32
    %c0_i32_0 = arith.constant 0 : i32
    %c0_i32_1 = arith.constant 0 : i32
    %c0_i32_2 = arith.constant 0 : i32
    return %c0_i32, %c0_i32_0, %c0_i32_1 : i32, i32, i32
  }
  func.func @transform_4(%arg0: i32) -> (i32, i32) {
    %c0_i32 = arith.constant 0 : i32
    %c0_i32_0 = arith.constant 0 : i32
    %c0_i32_1 = arith.constant 0 : i32
    return %c0_i32, %c0_i32_0 : i32, i32
  }
  func.func @transform_5(%arg0: i32) -> (i32, i32) {
    %c0_i32 = arith.constant 0 : i32
    %c0_i32_0 = arith.constant 0 : i32
    %c0_i32_1 = arith.constant 0 : i32
    return %c0_i32, %c0_i32_0 : i32, i32
  }
  func.func @transform_6(%arg0: i32) -> (i32, i32, i32) {
    %c0_i32 = arith.constant 0 : i32
    %c0_i32_0 = arith.constant 0 : i32
    %c0_i32_1 = arith.constant 0 : i32
    return %arg0, %c0_i32, %c0_i32_0 : i32, i32, i32
  }
}

</mosaic_0001>

<bundles_post_ra>
// kernel: tile.8
= control target key start
LH: loop header
LB: loop body
LE: loop exit
PB: predicated region body
PF: predicated region fallthrough
CT: control target
= control target key end

     0   :  { %s28_s0 = inlined_call_operand.vmem [shape: f32[24], index: 0, kind: input, shape index: {}]   ;;  %s29_s1 = inlined_call_operand.vmem [shape: f32[16,24], index: 1, kind: output, shape index: {}]  }
   0x1   :  { %v4_v0 = vld [vmem:[%s28_s0] ss:$0 sm:$0xff] }
   0x2   :  { %5 = vst [vmem:[%s29_s1] sm:$0xff] %v4_v0  ;;  %8 = vst [vmem:[%s29_s1 + $0x8] sm:$0xff] %v4_v0 }

// kernel: tile.0
= control target key start
LH: loop header
LB: loop body
LE: loop exit
PB: predicated region body
PF: predicated region fallthrough
CT: control target
= control target key end

     0   :  { %s821_s8 = smov 126   ;;  %s822_s9 = smov 127   ;;  %vm3_vm0 = vcmask 7168   ;;  %s1630_s0 = inlined_call_operand.vmem [shape: f32[16,24], index: 0, kind: input, shape index: {}]   ;;  %s1631_s1 = inlined_call_operand.vmem [shape: f32[384,1], index: 1, kind: output, shape index: {}]  }
   0x1   :  { %v38_v0 = vld.sshfl [vmem:[%s1630_s0] sm:$0xff pattern:$0x56741230]   ;;  %v604_v1 = vld.sshfl [vmem:[%s1630_s0 + $0x8] sm:$0xff pattern:$0x56741230]  }
   0x2   :  { %39 = vrot.lane.b32.xlu1 %v38_v0, %s821_s8  ;;  %14 = vrot.lane.b32.xlu0 %v38_v0, %s822_s9  ;;  %s823_s12 = smov 125   ;;  %s824_s13 = smov 124   ;;  %v658_v2 = vld.sshfl [vmem:[%s1630_s0 + $0x8] sm:$0xff pattern:$0x67452301]   ;;  %v2_v6 = vld [vmem:[%s1630_s0] sm:$0xff]  }
   0x3   :  { %s825_s14 = smov 123   ;;  %s826_s15 = smov 122   ;;  %v188_v3 = vld.sshfl [vmem:[%s1630_s0] sm:$0xff pattern:$0x67452301]   ;;  %v588_v7 = vld [vmem:[%s1630_s0 + $0x8] sm:$0xff]  }
   0x4   :  { %s827_s16 = smov 121   ;;  %s828_s21 = smov 120   ;;  %v730_v4 = vld.sshfl [vmem:[%s1630_s0 + $0x8] sm:$0xff pattern:$0x74563012]  }
   0x5   :  { %s829_s22 = smov 119   ;;  %s830_s23 = smov 118   ;;  %v388_v5 = vld.sshfl [vmem:[%s1630_s0] sm:$0xff pattern:$0x74563012]  }
   0x6   :  { %52 = vrot.lane.b32.xlu1 %v604_v1, %s821_s8  ;;  %27 = vrot.lane.b32.xlu0 %v604_v1, %s822_s9  ;;  %s831_s24 = smov 117   ;;  %s832_s25 = smov 116   ;;  %4 = vst.msk [vmem:[%s1631_s1] ss:$24 sm:$0xf] %vm3_vm0, %v2_v6  }
   0x7   :  { %s833_s26 = smov 115   ;;  %s834_s27 = smov 114   ;;  %5 = vst.msk [vmem:[%s1631_s1] ss:$24 sm:$0xf0] %vm3_vm0, %v2_v6  }
   0x8   :  { %s835_s28 = smov 113   ;;  %s836_s4 = smov 112   ;;  %589 = vst.msk [vmem:[%s1631_s1 + $0xc0] ss:$24 sm:$0xf] %vm3_vm0, %v588_v7  }
   0x9   :  { %s837_s5 = smov 111   ;;  %s838_s6 = smov 110   ;;  %590 = vst.msk [vmem:[%s1631_s1 + $0xc0] ss:$24 sm:$0xf0] %vm3_vm0, %v588_v7  }
   0xa   :  { %77 = vrot.lane.b32.xlu1 %v604_v1, %s823_s12  ;;  %64 = vrot.lane.b32.xlu0 %v38_v0, %s823_s12  ;;  %s839_s7 = smov 109   ;;  %s840_s19 = smov 108  }
   0xb   :  { %s841_s20 = smov 107  }
   0xe   :  { %102 = vrot.lane.b32.xlu1 %v604_v1, %s824_s13  ;;  %89 = vrot.lane.b32.xlu0 %v38_v0, %s824_s13 }
  0x12   :  { %127 = vrot.lane.b32.xlu1 %v604_v1, %s825_s14  ;;  %114 = vrot.lane.b32.xlu0 %v38_v0, %s825_s14 }
  0x16   :  { %152 = vrot.lane.b32.xlu1 %v604_v1, %s826_s15  ;;  %139 = vrot.lane.b32.xlu0 %v38_v0, %s826_s15 }
  0x1a   :  { %177 = vrot.lane.b32.xlu1 %v604_v1, %s827_s16  ;;  %164 = vrot.lane.b32.xlu0 %v38_v0, %s827_s16 }
  0x1e   :  { %202 = vrot.lane.b32.xlu1 %v658_v2, %s828_s21  ;;  %189 = vrot.lane.b32.xlu0 %v188_v3, %s828_s21  ;;  %s842_s21 = smov 106  }
  0x22   :  { %227 = vrot.lane.b32.xlu1 %v658_v2, %s829_s22  ;;  %214 = vrot.lane.b32.xlu0 %v188_v3, %s829_s22  ;;  %s843_s22 = smov 105  }
  0x26   :  { %252 = vrot.lane.b32.xlu1 %v658_v2, %s830_s23  ;;  %239 = vrot.lane.b32.xlu0 %v188_v3, %s830_s23 }
  0x2a   :  { %277 = vrot.lane.b32.xlu1 %v658_v2, %s831_s24  ;;  %264 = vrot.lane.b32.xlu0 %v188_v3, %s831_s24 }
  0x2e   :  { %302 = vrot.lane.b32.xlu1 %v658_v2, %s832_s25  ;;  %289 = vrot.lane.b32.xlu0 %v188_v3, %s832_s25 }
  0x32   :  { %327 = vrot.lane.b32.xlu1 %v658_v2, %s833_s26  ;;  %314 = vrot.lane.b32.xlu0 %v188_v3, %s833_s26 }
  0x36   :  { %352 = vrot.lane.b32.xlu1 %v658_v2, %s834_s27  ;;  %339 = vrot.lane.b32.xlu0 %v188_v3, %s834_s27 }
  0x3a   :  { %377 = vrot.lane.b32.xlu1 %v658_v2, %s835_s28  ;;  %364 = vrot.lane.b32.xlu0 %v188_v3, %s835_s28 }
  0x3e   :  { %402 = vrot.lane.b32.xlu1 %v730_v4, %s836_s4  ;;  %389 = vrot.lane.b32.xlu0 %v388_v5, %s836_s4 }
  0x42   :  { %427 = vrot.lane.b32.xlu1 %v730_v4, %s837_s5  ;;  %414 = vrot.lane.b32.xlu0 %v388_v5, %s837_s5 }
  0x46   :  { %452 = vrot.lane.b32.xlu1 %v730_v4, %s838_s6  ;;  %439 = vrot.lane.b32.xlu0 %v388_v5, %s838_s6 }
  0x4a   :  { %477 = vrot.lane.b32.xlu1 %v730_v4, %s839_s7  ;;  %464 = vrot.lane.b32.xlu0 %v388_v5, %s839_s7 }
  0x4e   :  { %502 = vrot.lane.b32.xlu1 %v730_v4, %s840_s19  ;;  %489 = vrot.lane.b32.xlu0 %v388_v5, %s840_s19 }
  0x52   :  { %527 = vrot.lane.b32.xlu1 %v730_v4, %s841_s20  ;;  %514 = vrot.lane.b32.xlu0 %v388_v5, %s841_s20 }
  0x56   :  { %552 = vrot.lane.b32.xlu1 %v730_v4, %s842_s21  ;;  %539 = vrot.lane.b32.xlu0 %v388_v5, %s842_s21 }
  0x5a   :  { %577 = vrot.lane.b32.xlu1 %v730_v4, %s843_s22  ;;  %564 = vrot.lane.b32.xlu0 %v388_v5, %s843_s22 }
  0x74   :  { %v40_v8 = vpop.permute.xlu1 %39   ;;  %v15_v9 = vpop.permute.xlu0 %14  }
  0x75   :  { %600 = vst.msk [vmem:[%s1631_s1 + $0x2] ss:$72 sm:$0x3] %vm3_vm0, %v40_v8   ;;  %601 = vst.msk [vmem:[%s1631_s1 + $0x62] ss:$-24 sm:$0xc] %vm3_vm0, %v40_v8  }
  0x76   :  { %602 = vst.msk [vmem:[%s1631_s1 - $0xbe] ss:$72 sm:$0x30] %vm3_vm0, %v40_v8   ;;  %603 = vst.msk [vmem:[%s1631_s1 + $0x122] ss:$-24 sm:$0xc0] %vm3_vm0, %v40_v8  }
  0x77   :  { %591 = vst.msk [vmem:[%s1631_s1 + $0x1] ss:$72 sm:$0x3] %vm3_vm0, %v15_v9   ;;  %592 = vst.msk [vmem:[%s1631_s1 + $0x61] ss:$-24 sm:$0xc] %vm3_vm0, %v15_v9  }
  0x78   :  { %593 = vst.msk [vmem:[%s1631_s1 - $0xbf] ss:$72 sm:$0x30] %vm3_vm0, %v15_v9   ;;  %594 = vst.msk [vmem:[%s1631_s1 + $0x121] ss:$-24 sm:$0xc0] %vm3_vm0, %v15_v9   ;;  %v53_v10 = vpop.permute.xlu1 %52   ;;  %v28_v11 = vpop.permute.xlu0 %27  }
  0x79   :  { %605 = vst.msk [vmem:[%s1631_s1 + $0xc2] ss:$72 sm:$0x3] %vm3_vm0, %v53_v10   ;;  %606 = vst.msk [vmem:[%s1631_s1 + $0x122] ss:$-24 sm:$0xc] %vm3_vm0, %v53_v10  }
  0x7a   :  { %607 = vst.msk [vmem:[%s1631_s1 + $0x2] ss:$72 sm:$0x30] %vm3_vm0, %v53_v10   ;;  %608 = vst.msk [vmem:[%s1631_s1 + $0x1e2] ss:$-24 sm:$0xc0] %vm3_vm0, %v53_v10  }
  0x7b   :  { %596 = vst.msk [vmem:[%s1631_s1 + $0xc1] ss:$72 sm:$0x3] %vm3_vm0, %v28_v11   ;;  %597 = vst.msk [vmem:[%s1631_s1 + $0x121] ss:$-24 sm:$0xc] %vm3_vm0, %v28_v11  }
  0x7c   :  { %598 = vst.msk [vmem:[%s1631_s1 + $0x1] ss:$72 sm:$0x30] %vm3_vm0, %v28_v11   ;;  %599 = vst.msk [vmem:[%s1631_s1 + $0x1e1] ss:$-24 sm:$0xc0] %vm3_vm0, %v28_v11   ;;  %v78_v12 = vpop.permute.xlu1 %77   ;;  %v65_v13 = vpop.permute.xlu0 %64  }
  0x7d   :  { %614 = vst.msk [vmem:[%s1631_s1 + $0xc3] ss:$72 sm:$0x3] %vm3_vm0, %v78_v12   ;;  %615 = vst.msk [vmem:[%s1631_s1 + $0x123] ss:$-24 sm:$0xc] %vm3_vm0, %v78_v12  }
  0x7e   :  { %616 = vst.msk [vmem:[%s1631_s1 + $0x3] ss:$72 sm:$0x30] %vm3_vm0, %v78_v12   ;;  %617 = vst.msk [vmem:[%s1631_s1 + $0x1e3] ss:$-24 sm:$0xc0] %vm3_vm0, %v78_v12  }
  0x7f   :  { %609 = vst.msk [vmem:[%s1631_s1 + $0x3] ss:$72 sm:$0x3] %vm3_vm0, %v65_v13   ;;  %610 = vst.msk [vmem:[%s1631_s1 + $0x63] ss:$-24 sm:$0xc] %vm3_vm0, %v65_v13  }
  0x80   :  { %611 = vst.msk [vmem:[%s1631_s1 - $0xbd] ss:$72 sm:$0x30] %vm3_vm0, %v65_v13   ;;  %612 = vst.msk [vmem:[%s1631_s1 + $0x123] ss:$-24 sm:$0xc0] %vm3_vm0, %v65_v13   ;;  %v103_v14 = vpop.permute.xlu1 %102   ;;  %v90_v15 = vpop.permute.xlu0 %89  }
  0x81   :  { %623 = vst.msk [vmem:[%s1631_s1 + $0xc4] ss:$72 sm:$0x3] %vm3_vm0, %v103_v14   ;;  %624 = vst.msk [vmem:[%s1631_s1 + $0x124] ss:$-24 sm:$0xc] %vm3_vm0, %v103_v14  }
  0x82   :  { %625 = vst.msk [vmem:[%s1631_s1 + $0x4] ss:$72 sm:$0x30] %vm3_vm0, %v103_v14   ;;  %626 = vst.msk [vmem:[%s1631_s1 + $0x1e4] ss:$-24 sm:$0xc0] %vm3_vm0, %v103_v14  }
  0x83   :  { %618 = vst.msk [vmem:[%s1631_s1 + $0x4] ss:$72 sm:$0x3] %vm3_vm0, %v90_v15   ;;  %619 = vst.msk [vmem:[%s1631_s1 + $0x64] ss:$-24 sm:$0xc] %vm3_vm0, %v90_v15  }
  0x84   :  { %620 = vst.msk [vmem:[%s1631_s1 - $0xbc] ss:$72 sm:$0x30] %vm3_vm0, %v90_v15   ;;  %621 = vst.msk [vmem:[%s1631_s1 + $0x124] ss:$-24 sm:$0xc0] %vm3_vm0, %v90_v15   ;;  %v128_v16 = vpop.permute.xlu1 %127   ;;  %v115_v17 = vpop.permute.xlu0 %114  }
  0x85   :  { %632 = vst.msk [vmem:[%s1631_s1 + $0xc5] ss:$72 sm:$0x3] %vm3_vm0, %v128_v16   ;;  %633 = vst.msk [vmem:[%s1631_s1 + $0x125] ss:$-24 sm:$0xc] %vm3_vm0, %v128_v16  }
  0x86   :  { %634 = vst.msk [vmem:[%s1631_s1 + $0x5] ss:$72 sm:$0x30] %vm3_vm0, %v128_v16   ;;  %635 = vst.msk [vmem:[%s1631_s1 + $0x1e5] ss:$-24 sm:$0xc0] %vm3_vm0, %v128_v16  }
  0x87   :  { %627 = vst.msk [vmem:[%s1631_s1 + $0x5] ss:$72 sm:$0x3] %vm3_vm0, %v115_v17   ;;  %628 = vst.msk [vmem:[%s1631_s1 + $0x65] ss:$-24 sm:$0xc] %vm3_vm0, %v115_v17  }
  0x88   :  { %629 = vst.msk [vmem:[%s1631_s1 - $0xbb] ss:$72 sm:$0x30] %vm3_vm0, %v115_v17   ;;  %630 = vst.msk [vmem:[%s1631_s1 + $0x125] ss:$-24 sm:$0xc0] %vm3_vm0, %v115_v17   ;;  %v153_v18 = vpop.permute.xlu1 %152   ;;  %v140_v19 = vpop.permute.xlu0 %139  }
  0x89   :  { %641 = vst.msk [vmem:[%s1631_s1 + $0xc6] ss:$72 sm:$0x3] %vm3_vm0, %v153_v18   ;;  %642 = vst.msk [vmem:[%s1631_s1 + $0x126] ss:$-24 sm:$0xc] %vm3_vm0, %v153_v18  }
  0x8a   :  { %643 = vst.msk [vmem:[%s1631_s1 + $0x6] ss:$72 sm:$0x30] %vm3_vm0, %v153_v18   ;;  %644 = vst.msk [vmem:[%s1631_s1 + $0x1e6] ss:$-24 sm:$0xc0] %vm3_vm0, %v153_v18  }
  0x8b   :  { %636 = vst.msk [vmem:[%s1631_s1 + $0x6] ss:$72 sm:$0x3] %vm3_vm0, %v140_v19   ;;  %637 = vst.msk [vmem:[%s1631_s1 + $0x66] ss:$-24 sm:$0xc] %vm3_vm0, %v140_v19  }
  0x8c   :  { %638 = vst.msk [vmem:[%s1631_s1 - $0xba] ss:$72 sm:$0x30] %vm3_vm0, %v140_v19   ;;  %639 = vst.msk [vmem:[%s1631_s1 + $0x126] ss:$-24 sm:$0xc0] %vm3_vm0, %v140_v19   ;;  %v178_v20 = vpop.permute.xlu1 %177   ;;  %v165_v21 = vpop.permute.xlu0 %164  }
  0x8d   :  { %650 = vst.msk [vmem:[%s1631_s1 + $0xc7] ss:$72 sm:$0x3] %vm3_vm0, %v178_v20   ;;  %651 = vst.msk [vmem:[%s1631_s1 + $0x127] ss:$-24 sm:$0xc] %vm3_vm0, %v178_v20  }
  0x8e   :  { %652 = vst.msk [vmem:[%s1631_s1 + $0x7] ss:$72 sm:$0x30] %vm3_vm0, %v178_v20   ;;  %653 = vst.msk [vmem:[%s1631_s1 + $0x1e7] ss:$-24 sm:$0xc0] %vm3_vm0, %v178_v20  }
  0x8f   :  { %645 = vst.msk [vmem:[%s1631_s1 + $0x7] ss:$72 sm:$0x3] %vm3_vm0, %v165_v21   ;;  %646 = vst.msk [vmem:[%s1631_s1 + $0x67] ss:$-24 sm:$0xc] %vm3_vm0, %v165_v21  }
  0x90   :  { %647 = vst.msk [vmem:[%s1631_s1 - $0xb9] ss:$72 sm:$0x30] %vm3_vm0, %v165_v21   ;;  %648 = vst.msk [vmem:[%s1631_s1 + $0x127] ss:$-24 sm:$0xc0] %vm3_vm0, %v165_v21   ;;  %v203_v22 = vpop.permute.xlu1 %202   ;;  %v190_v23 = vpop.permute.xlu0 %189  }
  0x91   :  { %659 = vst.msk [vmem:[%s1631_s1 + $0xe0] ss:$-24 sm:$0x3] %vm3_vm0, %v203_v22   ;;  %660 = vst.msk [vmem:[%s1631_s1 + $0x140] ss:$-24 sm:$0xc] %vm3_vm0, %v203_v22  }
  0x92   :  { %661 = vst.msk [vmem:[%s1631_s1 + $0x1a0] ss:$-24 sm:$0x30] %vm3_vm0, %v203_v22   ;;  %662 = vst.msk [vmem:[%s1631_s1 + $0x200] ss:$-24 sm:$0xc0] %vm3_vm0, %v203_v22  }
  0x93   :  { %654 = vst.msk [vmem:[%s1631_s1 + $0x20] ss:$-24 sm:$0x3] %vm3_vm0, %v190_v23   ;;  %655 = vst.msk [vmem:[%s1631_s1 + $0x80] ss:$-24 sm:$0xc] %vm3_vm0, %v190_v23  }
  0x94   :  { %656 = vst.msk [vmem:[%s1631_s1 + $0xe0] ss:$-24 sm:$0x30] %vm3_vm0, %v190_v23   ;;  %657 = vst.msk [vmem:[%s1631_s1 + $0x140] ss:$-24 sm:$0xc0] %vm3_vm0, %v190_v23   ;;  %v228_v24 = vpop.permute.xlu1 %227   ;;  %v215_v25 = vpop.permute.xlu0 %214  }
  0x95   :  { %668 = vst.msk [vmem:[%s1631_s1 + $0xe1] ss:$-24 sm:$0x3] %vm3_vm0, %v228_v24   ;;  %669 = vst.msk [vmem:[%s1631_s1 + $0x141] ss:$-24 sm:$0xc] %vm3_vm0, %v228_v24  }
  0x96   :  { %670 = vst.msk [vmem:[%s1631_s1 + $0x1a1] ss:$-24 sm:$0x30] %vm3_vm0, %v228_v24   ;;  %671 = vst.msk [vmem:[%s1631_s1 + $0x201] ss:$-24 sm:$0xc0] %vm3_vm0, %v228_v24  }
  0x97   :  { %663 = vst.msk [vmem:[%s1631_s1 + $0x21] ss:$-24 sm:$0x3] %vm3_vm0, %v215_v25   ;;  %664 = vst.msk [vmem:[%s1631_s1 + $0x81] ss:$-24 sm:$0xc] %vm3_vm0, %v215_v25  }
  0x98   :  { %665 = vst.msk [vmem:[%s1631_s1 + $0xe1] ss:$-24 sm:$0x30] %vm3_vm0, %v215_v25   ;;  %666 = vst.msk [vmem:[%s1631_s1 + $0x141] ss:$-24 sm:$0xc0] %vm3_vm0, %v215_v25   ;;  %v253_v26 = vpop.permute.xlu1 %252   ;;  %v240_v27 = vpop.permute.xlu0 %239  }
  0x99   :  { %677 = vst.msk [vmem:[%s1631_s1 + $0xe2] ss:$-24 sm:$0x3] %vm3_vm0, %v253_v26   ;;  %678 = vst.msk [vmem:[%s1631_s1 + $0x142] ss:$-24 sm:$0xc] %vm3_vm0, %v253_v26  }
  0x9a   :  { %679 = vst.msk [vmem:[%s1631_s1 + $0x1a2] ss:$-24 sm:$0x30] %vm3_vm0, %v253_v26   ;;  %680 = vst.msk [vmem:[%s1631_s1 + $0x202] ss:$-24 sm:$0xc0] %vm3_vm0, %v253_v26  }
  0x9b   :  { %672 = vst.msk [vmem:[%s1631_s1 + $0x22] ss:$-24 sm:$0x3] %vm3_vm0, %v240_v27   ;;  %673 = vst.msk [vmem:[%s1631_s1 + $0x82] ss:$-24 sm:$0xc] %vm3_vm0, %v240_v27  }
  0x9c   :  { %674 = vst.msk [vmem:[%s1631_s1 + $0xe2] ss:$-24 sm:$0x30] %vm3_vm0, %v240_v27   ;;  %675 = vst.msk [vmem:[%s1631_s1 + $0x142] ss:$-24 sm:$0xc0] %vm3_vm0, %v240_v27   ;;  %v278_v28 = vpop.permute.xlu1 %277   ;;  %v265_v29 = vpop.permute.xlu0 %264  }
  0x9d   :  { %686 = vst.msk [vmem:[%s1631_s1 + $0xe3] ss:$-24 sm:$0x3] %vm3_vm0, %v278_v28   ;;  %687 = vst.msk [vmem:[%s1631_s1 + $0x143] ss:$-24 sm:$0xc] %vm3_vm0, %v278_v28  }
  0x9e   :  { %688 = vst.msk [vmem:[%s1631_s1 + $0x1a3] ss:$-24 sm:$0x30] %vm3_vm0, %v278_v28   ;;  %689 = vst.msk [vmem:[%s1631_s1 + $0x203] ss:$-24 sm:$0xc0] %vm3_vm0, %v278_v28  }
  0x9f   :  { %681 = vst.msk [vmem:[%s1631_s1 + $0x23] ss:$-24 sm:$0x3] %vm3_vm0, %v265_v29   ;;  %682 = vst.msk [vmem:[%s1631_s1 + $0x83] ss:$-24 sm:$0xc] %vm3_vm0, %v265_v29  }
  0xa0   :  { %683 = vst.msk [vmem:[%s1631_s1 + $0xe3] ss:$-24 sm:$0x30] %vm3_vm0, %v265_v29   ;;  %684 = vst.msk [vmem:[%s1631_s1 + $0x143] ss:$-24 sm:$0xc0] %vm3_vm0, %v265_v29   ;;  %v303_v30 = vpop.permute.xlu1 %302   ;;  %v290_v31 = vpop.permute.xlu0 %289  }
  0xa1   :  { %695 = vst.msk [vmem:[%s1631_s1 + $0xe4] ss:$-24 sm:$0x3] %vm3_vm0, %v303_v30   ;;  %696 = vst.msk [vmem:[%s1631_s1 + $0x144] ss:$-24 sm:$0xc] %vm3_vm0, %v303_v30  }
  0xa2   :  { %697 = vst.msk [vmem:[%s1631_s1 + $0x1a4] ss:$-24 sm:$0x30] %vm3_vm0, %v303_v30   ;;  %698 = vst.msk [vmem:[%s1631_s1 + $0x204] ss:$-24 sm:$0xc0] %vm3_vm0, %v303_v30  }
  0xa3   :  { %690 = vst.msk [vmem:[%s1631_s1 + $0x24] ss:$-24 sm:$0x3] %vm3_vm0, %v290_v31   ;;  %691 = vst.msk [vmem:[%s1631_s1 + $0x84] ss:$-24 sm:$0xc] %vm3_vm0, %v290_v31  }
  0xa4   :  { %692 = vst.msk [vmem:[%s1631_s1 + $0xe4] ss:$-24 sm:$0x30] %vm3_vm0, %v290_v31   ;;  %693 = vst.msk [vmem:[%s1631_s1 + $0x144] ss:$-24 sm:$0xc0] %vm3_vm0, %v290_v31   ;;  %v328_v32 = vpop.permute.xlu1 %327   ;;  %v315_v33 = vpop.permute.xlu0 %314  }
  0xa5   :  { %704 = vst.msk [vmem:[%s1631_s1 + $0xe5] ss:$-24 sm:$0x3] %vm3_vm0, %v328_v32   ;;  %705 = vst.msk [vmem:[%s1631_s1 + $0x145] ss:$-24 sm:$0xc] %vm3_vm0, %v328_v32  }
  0xa6   :  { %706 = vst.msk [vmem:[%s1631_s1 + $0x1a5] ss:$-24 sm:$0x30] %vm3_vm0, %v328_v32   ;;  %707 = vst.msk [vmem:[%s1631_s1 + $0x205] ss:$-24 sm:$0xc0] %vm3_vm0, %v328_v32  }
  0xa7   :  { %699 = vst.msk [vmem:[%s1631_s1 + $0x25] ss:$-24 sm:$0x3] %vm3_vm0, %v315_v33   ;;  %700 = vst.msk [vmem:[%s1631_s1 + $0x85] ss:$-24 sm:$0xc] %vm3_vm0, %v315_v33  }
  0xa8   :  { %701 = vst.msk [vmem:[%s1631_s1 + $0xe5] ss:$-24 sm:$0x30] %vm3_vm0, %v315_v33   ;;  %702 = vst.msk [vmem:[%s1631_s1 + $0x145] ss:$-24 sm:$0xc0] %vm3_vm0, %v315_v33   ;;  %v353_v34 = vpop.permute.xlu1 %352   ;;  %v340_v35 = vpop.permute.xlu0 %339  }
  0xa9   :  { %713 = vst.msk [vmem:[%s1631_s1 + $0xe6] ss:$-24 sm:$0x3] %vm3_vm0, %v353_v34   ;;  %714 = vst.msk [vmem:[%s1631_s1 + $0x146] ss:$-24 sm:$0xc] %vm3_vm0, %v353_v34  }
  0xaa   :  { %715 = vst.msk [vmem:[%s1631_s1 + $0x1a6] ss:$-24 sm:$0x30] %vm3_vm0, %v353_v34   ;;  %716 = vst.msk [vmem:[%s1631_s1 + $0x206] ss:$-24 sm:$0xc0] %vm3_vm0, %v353_v34  }
  0xab   :  { %708 = vst.msk [vmem:[%s1631_s1 + $0x26] ss:$-24 sm:$0x3] %vm3_vm0, %v340_v35   ;;  %709 = vst.msk [vmem:[%s1631_s1 + $0x86] ss:$-24 sm:$0xc] %vm3_vm0, %v340_v35  }
  0xac   :  { %710 = vst.msk [vmem:[%s1631_s1 + $0xe6] ss:$-24 sm:$0x30] %vm3_vm0, %v340_v35   ;;  %711 = vst.msk [vmem:[%s1631_s1 + $0x146] ss:$-24 sm:$0xc0] %vm3_vm0, %v340_v35   ;;  %v378_v36 = vpop.permute.xlu1 %377   ;;  %v365_v37 = vpop.permute.xlu0 %364  }
  0xad   :  { %722 = vst.msk [vmem:[%s1631_s1 + $0xe7] ss:$-24 sm:$0x3] %vm3_vm0, %v378_v36   ;;  %723 = vst.msk [vmem:[%s1631_s1 + $0x147] ss:$-24 sm:$0xc] %vm3_vm0, %v378_v36  }
  0xae   :  { %724 = vst.msk [vmem:[%s1631_s1 + $0x1a7] ss:$-24 sm:$0x30] %vm3_vm0, %v378_v36   ;;  %725 = vst.msk [vmem:[%s1631_s1 + $0x207] ss:$-24 sm:$0xc0] %vm3_vm0, %v378_v36  }
  0xaf   :  { %717 = vst.msk [vmem:[%s1631_s1 + $0x27] ss:$-24 sm:$0x3] %vm3_vm0, %v365_v37   ;;  %718 = vst.msk [vmem:[%s1631_s1 + $0x87] ss:$-24 sm:$0xc] %vm3_vm0, %v365_v37  }
  0xb0   :  { %719 = vst.msk [vmem:[%s1631_s1 + $0xe7] ss:$-24 sm:$0x30] %vm3_vm0, %v365_v37   ;;  %720 = vst.msk [vmem:[%s1631_s1 + $0x147] ss:$-24 sm:$0xc0] %vm3_vm0, %v365_v37   ;;  %v403_v38 = vpop.permute.xlu1 %402   ;;  %v390_v39 = vpop.permute.xlu0 %389  }
  0xb1   :  { %731 = vst.msk [vmem:[%s1631_s1 + $0x100] ss:$-24 sm:$0x7] %vm3_vm0, %v403_v38   ;;  %732 = vst.msk [vmem:[%s1631_s1 + $0x40] ss:$72 sm:$0x18] %vm3_vm0, %v403_v38  }
  0xb2   :  { %733 = vst.msk [vmem:[%s1631_s1 + $0x1c0] ss:$-24 sm:$0x60] %vm3_vm0, %v403_v38   ;;  %734 = vst.msk [vmem:[%s1631_s1 + $0x171] sm:$0x80] %vm3_vm0, %v403_v38  }
  0xb3   :  { %726 = vst.msk [vmem:[%s1631_s1 + $0x40] ss:$-24 sm:$0x7] %vm3_vm0, %v390_v39   ;;  %727 = vst.msk [vmem:[%s1631_s1 - $0x80] ss:$72 sm:$0x18] %vm3_vm0, %v390_v39  }
  0xb4   :  { %728 = vst.msk [vmem:[%s1631_s1 + $0x100] ss:$-24 sm:$0x60] %vm3_vm0, %v390_v39   ;;  %729 = vst.msk [vmem:[%s1631_s1 + $0xb1] sm:$0x80] %vm3_vm0, %v390_v39   ;;  %v428_v40 = vpop.permute.xlu1 %427   ;;  %v415_v41 = vpop.permute.xlu0 %414  }
  0xb5   :  { %740 = vst.msk [vmem:[%s1631_s1 + $0x101] ss:$-24 sm:$0x7] %vm3_vm0, %v428_v40   ;;  %741 = vst.msk [vmem:[%s1631_s1 + $0x41] ss:$72 sm:$0x18] %vm3_vm0, %v428_v40  }
  0xb6   :  { %742 = vst.msk [vmem:[%s1631_s1 + $0x1c1] ss:$-24 sm:$0x60] %vm3_vm0, %v428_v40   ;;  %743 = vst.msk [vmem:[%s1631_s1 + $0x172] sm:$0x80] %vm3_vm0, %v428_v40  }
  0xb7   :  { %735 = vst.msk [vmem:[%s1631_s1 + $0x41] ss:$-24 sm:$0x7] %vm3_vm0, %v415_v41   ;;  %736 = vst.msk [vmem:[%s1631_s1 - $0x7f] ss:$72 sm:$0x18] %vm3_vm0, %v415_v41  }
  0xb8   :  { %737 = vst.msk [vmem:[%s1631_s1 + $0x101] ss:$-24 sm:$0x60] %vm3_vm0, %v415_v41   ;;  %738 = vst.msk [vmem:[%s1631_s1 + $0xb2] sm:$0x80] %vm3_vm0, %v415_v41   ;;  %v453_v42 = vpop.permute.xlu1 %452   ;;  %v440_v43 = vpop.permute.xlu0 %439  }
  0xb9   :  { %749 = vst.msk [vmem:[%s1631_s1 + $0x102] ss:$-24 sm:$0x7] %vm3_vm0, %v453_v42   ;;  %750 = vst.msk [vmem:[%s1631_s1 + $0x42] ss:$72 sm:$0x18] %vm3_vm0, %v453_v42  }
  0xba   :  { %751 = vst.msk [vmem:[%s1631_s1 + $0x1c2] ss:$-24 sm:$0x60] %vm3_vm0, %v453_v42   ;;  %752 = vst.msk [vmem:[%s1631_s1 + $0x173] sm:$0x80] %vm3_vm0, %v453_v42  }
  0xbb   :  { %744 = vst.msk [vmem:[%s1631_s1 + $0x42] ss:$-24 sm:$0x7] %vm3_vm0, %v440_v43   ;;  %745 = vst.msk [vmem:[%s1631_s1 - $0x7e] ss:$72 sm:$0x18] %vm3_vm0, %v440_v43  }
  0xbc   :  { %746 = vst.msk [vmem:[%s1631_s1 + $0x102] ss:$-24 sm:$0x60] %vm3_vm0, %v440_v43   ;;  %747 = vst.msk [vmem:[%s1631_s1 + $0xb3] sm:$0x80] %vm3_vm0, %v440_v43   ;;  %v478_v44 = vpop.permute.xlu1 %477   ;;  %v465_v45 = vpop.permute.xlu0 %464  }
  0xbd   :  { %758 = vst.msk [vmem:[%s1631_s1 + $0x103] ss:$-24 sm:$0x7] %vm3_vm0, %v478_v44   ;;  %759 = vst.msk [vmem:[%s1631_s1 + $0x43] ss:$72 sm:$0x18] %vm3_vm0, %v478_v44  }
  0xbe   :  { %760 = vst.msk [vmem:[%s1631_s1 + $0x1c3] ss:$-24 sm:$0x60] %vm3_vm0, %v478_v44   ;;  %761 = vst.msk [vmem:[%s1631_s1 + $0x174] sm:$0x80] %vm3_vm0, %v478_v44  }
  0xbf   :  { %753 = vst.msk [vmem:[%s1631_s1 + $0x43] ss:$-24 sm:$0x7] %vm3_vm0, %v465_v45   ;;  %754 = vst.msk [vmem:[%s1631_s1 - $0x7d] ss:$72 sm:$0x18] %vm3_vm0, %v465_v45  }
  0xc0   :  { %755 = vst.msk [vmem:[%s1631_s1 + $0x103] ss:$-24 sm:$0x60] %vm3_vm0, %v465_v45   ;;  %756 = vst.msk [vmem:[%s1631_s1 + $0xb4] sm:$0x80] %vm3_vm0, %v465_v45   ;;  %v503_v46 = vpop.permute.xlu1 %502   ;;  %v490_v47 = vpop.permute.xlu0 %489  }
  0xc1   :  { %767 = vst.msk [vmem:[%s1631_s1 + $0x104] ss:$-24 sm:$0x7] %vm3_vm0, %v503_v46   ;;  %768 = vst.msk [vmem:[%s1631_s1 + $0x44] ss:$72 sm:$0x18] %vm3_vm0, %v503_v46  }
  0xc2   :  { %769 = vst.msk [vmem:[%s1631_s1 + $0x1c4] ss:$-24 sm:$0x60] %vm3_vm0, %v503_v46   ;;  %770 = vst.msk [vmem:[%s1631_s1 + $0x175] sm:$0x80] %vm3_vm0, %v503_v46  }
  0xc3   :  { %762 = vst.msk [vmem:[%s1631_s1 + $0x44] ss:$-24 sm:$0x7] %vm3_vm0, %v490_v47   ;;  %763 = vst.msk [vmem:[%s1631_s1 - $0x7c] ss:$72 sm:$0x18] %vm3_vm0, %v490_v47  }
  0xc4   :  { %764 = vst.msk [vmem:[%s1631_s1 + $0x104] ss:$-24 sm:$0x60] %vm3_vm0, %v490_v47   ;;  %765 = vst.msk [vmem:[%s1631_s1 + $0xb5] sm:$0x80] %vm3_vm0, %v490_v47   ;;  %v528_v48 = vpop.permute.xlu1 %527   ;;  %v515_v49 = vpop.permute.xlu0 %514  }
  0xc5   :  { %776 = vst.msk [vmem:[%s1631_s1 + $0x105] ss:$-24 sm:$0x7] %vm3_vm0, %v528_v48   ;;  %777 = vst.msk [vmem:[%s1631_s1 + $0x45] ss:$72 sm:$0x18] %vm3_vm0, %v528_v48  }
  0xc6   :  { %778 = vst.msk [vmem:[%s1631_s1 + $0x1c5] ss:$-24 sm:$0x60] %vm3_vm0, %v528_v48   ;;  %779 = vst.msk [vmem:[%s1631_s1 + $0x176] sm:$0x80] %vm3_vm0, %v528_v48  }
  0xc7   :  { %771 = vst.msk [vmem:[%s1631_s1 + $0x45] ss:$-24 sm:$0x7] %vm3_vm0, %v515_v49   ;;  %772 = vst.msk [vmem:[%s1631_s1 - $0x7b] ss:$72 sm:$0x18] %vm3_vm0, %v515_v49  }
  0xc8   :  { %773 = vst.msk [vmem:[%s1631_s1 + $0x105] ss:$-24 sm:$0x60] %vm3_vm0, %v515_v49   ;;  %774 = vst.msk [vmem:[%s1631_s1 + $0xb6] sm:$0x80] %vm3_vm0, %v515_v49   ;;  %v553_v50 = vpop.permute.xlu1 %552   ;;  %v540_v51 = vpop.permute.xlu0 %539  }
  0xc9   :  { %785 = vst.msk [vmem:[%s1631_s1 + $0x106] ss:$-24 sm:$0x7] %vm3_vm0, %v553_v50   ;;  %786 = vst.msk [vmem:[%s1631_s1 + $0x46] ss:$72 sm:$0x18] %vm3_vm0, %v553_v50  }
  0xca   :  { %787 = vst.msk [vmem:[%s1631_s1 + $0x1c6] ss:$-24 sm:$0x60] %vm3_vm0, %v553_v50   ;;  %788 = vst.msk [vmem:[%s1631_s1 + $0x177] sm:$0x80] %vm3_vm0, %v553_v50  }
  0xcb   :  { %780 = vst.msk [vmem:[%s1631_s1 + $0x46] ss:$-24 sm:$0x7] %vm3_vm0, %v540_v51   ;;  %781 = vst.msk [vmem:[%s1631_s1 - $0x7a] ss:$72 sm:$0x18] %vm3_vm0, %v540_v51  }
  0xcc   :  { %782 = vst.msk [vmem:[%s1631_s1 + $0x106] ss:$-24 sm:$0x60] %vm3_vm0, %v540_v51   ;;  %783 = vst.msk [vmem:[%s1631_s1 + $0xb7] sm:$0x80] %vm3_vm0, %v540_v51   ;;  %v578_v52 = vpop.permute.xlu1 %577   ;;  %v565_v53 = vpop.permute.xlu0 %564  }
  0xcd   :  { %794 = vst.msk [vmem:[%s1631_s1 + $0x107] ss:$-24 sm:$0x7] %vm3_vm0, %v578_v52   ;;  %795 = vst.msk [vmem:[%s1631_s1 + $0x47] ss:$72 sm:$0x18] %vm3_vm0, %v578_v52  }
  0xce   :  { %796 = vst.msk [vmem:[%s1631_s1 + $0x1c7] ss:$-24 sm:$0x60] %vm3_vm0, %v578_v52   ;;  %797 = vst.msk [vmem:[%s1631_s1 + $0x178] sm:$0x80] %vm3_vm0, %v578_v52  }
  0xcf   :  { %789 = vst.msk [vmem:[%s1631_s1 + $0x47] ss:$-24 sm:$0x7] %vm3_vm0, %v565_v53   ;;  %790 = vst.msk [vmem:[%s1631_s1 - $0x79] ss:$72 sm:$0x18] %vm3_vm0, %v565_v53  }
  0xd0   :  { %791 = vst.msk [vmem:[%s1631_s1 + $0x107] ss:$-24 sm:$0x60] %vm3_vm0, %v565_v53   ;;  %792 = vst.msk [vmem:[%s1631_s1 + $0xb8] sm:$0x80] %vm3_vm0, %v565_v53  }

// kernel: basic_block_forward.1
= control target key start
LH: loop header
LB: loop body
LE: loop exit
PB: predicated region body
PF: predicated region fallthrough
CT: control target
= control target key end

     0   :  { %s12204_s21 = smov 0   ;;  %s15155_s0 = inlined_call_operand.vmem [shape: f32[2,480,128], index: 0, kind: input, shape index: {}]   ;;  %s15156_s1 = inlined_call_operand.vmem [shape: bf16[9,128,128], index: 1, kind: input, shape index: {}]   ;;  %s15157_s2 = inlined_call_operand.vmem [shape: f32[1,128], index: 2, kind: input, shape index: {}]   ;;  %s15158_s3 = inlined_call_operand.vmem [shape: bf16[9,128,128], index: 3, kind: input, shape index: {}]   ;;  %s15159_s4 = inlined_call_operand.vmem [shape: f32[1,128], index: 4, kind: input, shape index: {}]   ;;  %s15160_s5 = inlined_call_operand.vmem [shape: f32[384,1], index: 5, kind: input, shape index: {}]   ;;  %s15161_s6 = inlined_call_operand.vmem [shape: f32[2,384,128], index: 6, kind: output, shape index: {}]  }
   0x1 LB: > { %s9093_s22 = sadd.s32 4294967295, %s12166_s21   ;;  %p9097_p0 = scmp.ge.s32.totalorder %s12166_s21, 1  ;;  %s12166_s21 = sphi %s12204_s21, %s16_s21  }
   0x2   : > { %p212_p1 = scmp.lt.s32.totalorder %s12166_s21, 3 }
   0x4   : > { %p213_p2 = pnand %p9097_p0, %p212_p1 }
   0x6   : > { %216 = sbr.rel (%p213_p2) target bundleno = 2133 (0x855), region = 44 }
   0xd   : > { %v12013_v0 = vld [vmem:[%s15156_s1 + $0x40] sm:$0xff]   ;;  %p242_p3 = scmp.lt.s32.totalorder %s9093_s22, 1  ;;  %v12014_v1 = vld [vmem:[%s15156_s1 + $0x48] sm:$0xff]   ;;  %v12015_v2 = vld [vmem:[%s15156_s1 + $0x50] sm:$0xff]   ;;  %vm4424_vm0 = vcmask 1043456  }
   0xe   : > { %10080 = vmatprep.subr.bf16.mxu0 %v12013_v0  ;;  %v12016_v3 = vld [vmem:[%s15156_s1 + $0x58] sm:$0xff]   ;;  %v12017_v7 = vld [vmem:[%s15156_s1 + $0x60] sm:$0xff]   ;;  %v12018_v8 = vld [vmem:[%s15156_s1 + $0x68] sm:$0xff]   ;;  %vm4771_vm1 = vsmask.f32 4352 }
   0xf   : > { %s15522_s22 = smov (!%p242_p3, %s9093_s22), 1  ;;  %10081 = vmatpush3.bf16.msra.mxu0 %v12013_v0  ;;  %v12019_v9 = vld [vmem:[%s15156_s1 + $0x70] sm:$0xff]   ;;  %v12020_v10 = vld [vmem:[%s15156_s1 + $0x78] sm:$0xff]   ;;  %v12021_v13 = vld [vmem:[%s15156_s1] sm:$0xff]   ;;  %vm5311_vm2 = vsmask.f32 3328 }
  0x10   : > { %10082 = vmatprep.subr.bf16.mxu0 %v12014_v1  ;;  %s12000_s29 = smul.u32 480, %s15522_s22  ;;  %v12022_v18 = vld [vmem:[%s15156_s1 + $0x8] sm:$0xff]   ;;  %v12023_v23 = vld [vmem:[%s15156_s1 + $0x10] sm:$0xff]   ;;  %v12024_v26 = vld [vmem:[%s15156_s1 + $0x18] sm:$0xff]   ;;  %vm6730_vm3 = vsmask.f32 7424 }
  0x11   : > { %v12025_v31 = vld [vmem:[%s15156_s1 + $0x20] sm:$0xff]   ;;  %v12026_v33 = vld [vmem:[%s15156_s1 + $0x28] sm:$0xff]   ;;  %v12027_v39 = vld [vmem:[%s15156_s1 + $0x30] sm:$0xff]   ;;  %vm5808_vm4 = vsmask.f32 256  ;;  %s12001_s13 = smul.u32 384, %s15522_s22 }
  0x12   : > { %s12227_s8 = scalar_lea.vmem %s15155_s0, %s12000_s29  ;;  %v12028_v41 = vld [vmem:[%s15156_s1 + $0x38] sm:$0xff]   ;;  %v12293_v47 = vld [vmem:[%s15156_s1 + $0x80] sm:$0xff]  }
  0x13   : > { %10083 = vmatpush3.bf16.msra.mxu0 %v12014_v1  ;;  %v397_v4 = vld [vmem:[%s12227_s8 + $0x18] sm:$0xff]  ;;  %v398_v5 = vld [vmem:[%s12227_s8 + $0x20] sm:$0xff]  ;;  %v399_v11 = vld [vmem:[%s12227_s8 + $0x28] sm:$0xff]  ;;  %s15013_s22 = scalar_lea.vmem %s15161_s6, %s12001_s13 }
  0x14   : > { %10084 = vmatprep.subr.bf16.mxu0 %v12015_v2  ;;  %v445_v6 = vpack.c.bf16 %v398_v5, %v397_v4  ;;  %v400_v12 = vld [vmem:[%s12227_s8 + $0x30] sm:$0xff]  ;;  %v401_v14 = vld [vmem:[%s12227_s8 + $0x38] sm:$0xff]  ;;  %v402_v15 = vld [vmem:[%s12227_s8 + $0x40] sm:$0xff] }
  0x15   : > { %v446_v16 = vpack.c.bf16 %v400_v12, %v399_v11  ;;  %v447_v17 = vpack.c.bf16 %v402_v15, %v401_v14  ;;  %v403_v19 = vld [vmem:[%s12227_s8 + $0x48] sm:$0xff]  ;;  %v404_v20 = vld [vmem:[%s12227_s8 + $0x50] sm:$0xff]  ;;  %v405_v21 = vld [vmem:[%s12227_s8 + $0x58] sm:$0xff] }
  0x16   : > { %10096 = vmatprep.mubr.bf16.mxu0 %v445_v6  ;;  %v406_v22 = vld [vmem:[%s12227_s8 + $0x60] sm:$0xff]  ;;  %v448_v24 = vpack.c.bf16 %v404_v20, %v403_v19  ;;  %v407_v27 = vld [vmem:[%s12227_s8 + $0x68] sm:$0xff]  ;;  %v408_v28 = vld [vmem:[%s12227_s8 + $0x70] sm:$0xff] }
  0x17   : > { %10085 = vmatpush3.bf16.msra.mxu0 %v12015_v2  ;;  %v449_v25 = vpack.c.bf16 %v406_v22, %v405_v21  ;;  %v409_v29 = vld [vmem:[%s12227_s8 + $0x78] sm:$0xff]  ;;  %v410_v30 = vld [vmem:[%s12227_s8 + $0x80] sm:$0xff]  ;;  %v450_v32 = vpack.c.bf16 %v408_v28, %v407_v27  ;;  %v411_v35 = vld [vmem:[%s12227_s8 + $0x88] sm:$0xff] }
  0x18   : > { %10086 = vmatprep.subr.bf16.mxu0 %v12016_v3  ;;  %v451_v34 = vpack.c.bf16 %v410_v30, %v409_v29  ;;  %v412_v36 = vld [vmem:[%s12227_s8 + $0x90] sm:$0xff]  ;;  %v413_v37 = vld [vmem:[%s12227_s8 + $0x98] sm:$0xff]  ;;  %v414_v38 = vld [vmem:[%s12227_s8 + $0xa0] sm:$0xff] }
  0x19   : > { %v452_v40 = vpack.c.bf16 %v412_v36, %v411_v35  ;;  %v453_v42 = vpack.c.bf16 %v414_v38, %v413_v37  ;;  %v415_v43 = vld [vmem:[%s12227_s8 + $0xa8] sm:$0xff]  ;;  %v416_v44 = vld [vmem:[%s12227_s8 + $0xb0] sm:$0xff]  ;;  %v417_v45 = vld [vmem:[%s12227_s8 + $0xb8] sm:$0xff] }
  0x1a   : > { %v418_v46 = vld [vmem:[%s12227_s8 + $0xc0] sm:$0xff]  ;;  %v454_v48 = vpack.c.bf16 %v416_v44, %v415_v43  ;;  %v419_v50 = vld [vmem:[%s12227_s8 + $0xc8] sm:$0xff]  ;;  %v420_v51 = vld [vmem:[%s12227_s8 + $0xd0] sm:$0xff] }
  0x1b   : > { %10087 = vmatpush3.bf16.msra.mxu0 %v12016_v3  ;;  %v455_v49 = vpack.c.bf16 %v418_v46, %v417_v45  ;;  %v421_v52 = vld [vmem:[%s12227_s8 + $0xd8] sm:$0xff]  ;;  %v422_v53 = vld [vmem:[%s12227_s8 + $0xe0] sm:$0xff]  ;;  %v456_v54 = vpack.c.bf16 %v420_v51, %v419_v50  ;;  %v423_v56 = vld [vmem:[%s12227_s8 + $0xe8] sm:$0xff] }
  0x1c   : > { %10088 = vmatprep.subr.bf16.mxu0 %v12017_v7  ;;  %v457_v55 = vpack.c.bf16 %v422_v53, %v421_v52  ;;  %v424_v57 = vld [vmem:[%s12227_s8 + $0xf0] sm:$0xff]  ;;  %v425_v58 = vld [vmem:[%s12227_s8 + $0xf8] sm:$0xff]  ;;  %v426_v59 = vld [vmem:[%s12227_s8 + $0x100] sm:$0xff] }
  0x1d   : > { %v458_v60 = vpack.c.bf16 %v424_v57, %v423_v56  ;;  %v459_v61 = vpack.c.bf16 %v426_v59, %v425_v58  ;;  %v427_v62 = vld [vmem:[%s12227_s8 + $0x108] sm:$0xff]  ;;  %v428_v63 = vld [vmem:[%s12227_s8 + $0x110] sm:$0xff]  ;;  %v429_v0 = vld [vmem:[%s12227_s8 + $0x118] sm:$0xff] }
  0x1e   : > { %v430_v1 = vld [vmem:[%s12227_s8 + $0x120] sm:$0xff]  ;;  %v460_v2 = vpack.c.bf16 %v428_v63, %v427_v62  ;;  %v431_v4 = vld [vmem:[%s12227_s8 + $0x128] sm:$0xff]  ;;  %v432_v5 = vld [vmem:[%s12227_s8 + $0x130] sm:$0xff] }
  0x1f   : > { %10089 = vmatpush3.bf16.msra.mxu0 %v12017_v7  ;;  %v461_v3 = vpack.c.bf16 %v430_v1, %v429_v0  ;;  %v433_v6 = vld [vmem:[%s12227_s8 + $0x138] sm:$0xff]  ;;  %v434_v7 = vld [vmem:[%s12227_s8 + $0x140] sm:$0xff]  ;;  %v436_v11 = vld [vmem:[%s12227_s8 + $0x150] sm:$0xff] }
  0x20   : > { %10090 = vmatprep.subr.bf16.mxu0 %v12018_v8  ;;  %v437_v12 = vld [vmem:[%s12227_s8 + $0x158] sm:$0xff]  ;;  %v442_v19 = vld [vmem:[%s12227_s8 + $0x180] sm:$0xff]  ;;  %v443_v22 = vld [vmem:[%s12227_s8 + $0x188] sm:$0xff] }
  0x21   : > { %v311_v28 = vld [vmem:[%s12227_s8 + $0x27] sm:$0xff]  ;;  %v12326_v29 = vld [vmem:[%s12227_s8 + $0x2f] sm:$0xff]  ;;  %v12329_v30 = vld [vmem:[%s12227_s8 + $0x37] sm:$0xff] }
  0x22   : > { %v12341_v35 = vld [vmem:[%s12227_s8 + $0x47] sm:$0xff]  ;;  %v12344_v36 = vld [vmem:[%s12227_s8 + $0x4f] sm:$0xff]  ;;  %v12347_v37 = vld [vmem:[%s12227_s8 + $0x57] sm:$0xff] }
  0x23   : > { %10091 = vmatpush3.bf16.msra.mxu0 %v12018_v8  ;;  %v462_v8 = vpack.c.bf16 %v432_v5, %v431_v4  ;;  %v12351_v38 = vld [vmem:[%s12227_s8 + $0x5f] sm:$0xff]  ;;  %v12364_v43 = vld [vmem:[%s12227_s8 + $0x67] sm:$0xff]  ;;  %v12367_v44 = vld [vmem:[%s12227_s8 + $0x6f] sm:$0xff] }
  0x24   : > { %10092 = vmatprep.subr.bf16.mxu0 %v12019_v9  ;;  %v12370_v45 = vld [vmem:[%s12227_s8 + $0x77] sm:$0xff]  ;;  %v12373_v46 = vld [vmem:[%s12227_s8 + $0x7f] sm:$0xff]  ;;  %v12386_v51 = vld [vmem:[%s12227_s8 + $0x87] sm:$0xff] }
  0x25   : > { %v363_v50 = vpack.c.bf16 %v12373_v46, %v12370_v45  ;;  %v12389_v52 = vld [vmem:[%s12227_s8 + $0x8f] sm:$0xff]  ;;  %v12392_v53 = vld [vmem:[%s12227_s8 + $0x97] sm:$0xff]  ;;  %v12408_v59 = vld [vmem:[%s12227_s8 + $0xa7] sm:$0xff] }
  0x26   : > { %v364_v56 = vpack.c.bf16 %v12389_v52, %v12386_v51  ;;  %v12036_v58 = vld [vmem:[%s15156_s1 + $0xb8] sm:$0xff]   ;;  %v12422_v63 = vld [vmem:[%s15156_s1 + $0xc0] sm:$0xff]  }
  0x27   : > { %10093 = vmatpush3.bf16.msra.mxu0 %v12019_v9  ;;  %v463_v9 = vpack.c.bf16 %v434_v7, %v433_v6  ;;  %v12417_v62 = vld [vmem:[%s12227_s8 + $0xbf] sm:$0xff]  ;;  %v12436_v4 = vld [vmem:[%s12227_s8 + $0xd7] sm:$0xff] }
  0x28   : > { %10094 = vmatprep.subr.bf16.mxu0 %v12020_v10  ;;  %v12439_v5 = vld [vmem:[%s12227_s8 + $0xdf] sm:$0xff] }
  0x29   : > { %v369_v7 = vpack.c.bf16 %v12439_v5, %v12436_v4 }
  0x2b   : > { %10095 = vmatpush3.bf16.msra.mxu0 %v12020_v10  ;;  %v435_v10 = vld [vmem:[%s12227_s8 + $0x148] sm:$0xff] }
  0x2c   : > { %10144 = vmatprep.subr.bf16.mxu0 %v12021_v13  ;;  %v464_v14 = vpack.c.bf16 %v436_v11, %v435_v10  ;;  %v12452_v10 = vld [vmem:[%s12227_s8 + $0xf7] sm:$0xff]  ;;  %v12455_v11 = vld [vmem:[%s12227_s8 + $0xff] sm:$0xff] }
  0x2e   : > { %10097 = vmatmul.mubr.bf16.vlgmr.msra.gmra.mrb[0].mxu0 %v446_v16  ;;  %v439_v16 = vld [vmem:[%s12227_s8 + $0x168] sm:$0xff] }
  0x2f   : > { %10145 = vmatpush3.bf16.msra.mxu0 %v12021_v13  ;;  %10100 = vmatprep.mubr.bf16.mxu0 %v447_v17  ;;  %v438_v13 = vld [vmem:[%s12227_s8 + $0x160] sm:$0xff]  ;;  %v440_v17 = vld [vmem:[%s12227_s8 + $0x170] sm:$0xff] }
  0x30   : > { %10146 = vmatprep.subr.bf16.mxu0 %v12022_v18  ;;  %v465_v15 = vpack.c.bf16 %v438_v13, %v437_v12  ;;  %v466_v20 = vpack.c.bf16 %v440_v17, %v439_v16  ;;  %v371_v13 = vpack.c.bf16 %v12455_v11, %v12452_v10  ;;  %v12468_v16 = vld [vmem:[%s12227_s8 + $0x117] sm:$0xff]  ;;  %v12471_v17 = vld [vmem:[%s12227_s8 + $0x11f] sm:$0xff] }
  0x33   : > { %10147 = vmatpush3.bf16.msra.mxu0 %v12022_v18  ;;  %v441_v18 = vld [vmem:[%s12227_s8 + $0x178] sm:$0xff] }
  0x34   : > { %10148 = vmatprep.subr.bf16.mxu0 %v12023_v23  ;;  %v467_v21 = vpack.c.bf16 %v442_v19, %v441_v18  ;;  %v373_v19 = vpack.c.bf16 %v12471_v17, %v12468_v16 }
  0x36   : > { %10101 = vmatmul.mubr.bf16.gmra.mrb[4].mxu0 %v448_v24  ;;  %v309_v24 = vld [vmem:[%s12227_s8 + $0x17] sm:$0xff] }
  0x37   : > { %10104 = vmatprep.mubr.bf16.mxu0 %v449_v25  ;;  %10149 = vmatpush3.bf16.msra.mxu0 %v12023_v23  ;;  %v444_v23 = vld [vmem:[%s12227_s8 + $0x190] sm:$0xff]  ;;  %v310_v25 = vld [vmem:[%s12227_s8 + $0x1f] sm:$0xff] }
  0x38   : > { %10150 = vmatprep.subr.bf16.mxu0 %v12024_v26  ;;  %v357_v27 = vpack.c.bf16 %v310_v25, %v309_v24 }
  0x3b   : > { %10151 = vmatpush3.bf16.msra.mxu0 %v12024_v26  ;;  %v468_v26 = vpack.c.bf16 %v444_v23, %v443_v22  ;;  %v12484_v22 = vld [vmem:[%s12227_s8 + $0x137] sm:$0xff]  ;;  %v12487_v23 = vld [vmem:[%s12227_s8 + $0x13f] sm:$0xff] }
  0x3c   : > { %10152 = vmatprep.subr.bf16.mxu0 %v12025_v31  ;;  %v375_v25 = vpack.c.bf16 %v12487_v23, %v12484_v22 }
  0x3e   : > { %10105 = vmatmul.mubr.bf16.gmra.mrb[8].mxu0 %v450_v32  ;;  %v358_v32 = vpack.c.bf16 %v12326_v29, %v311_v28  ;;  %v12500_v28 = vld [vmem:[%s12227_s8 + $0x157] sm:$0xff] }
  0x3f   : > { %10108 = vmatprep.mubr.bf16.mxu0 %v451_v34  ;;  %10153 = vmatpush3.bf16.msra.mxu0 %v12025_v31  ;;  %v12332_v31 = vld [vmem:[%s12227_s8 + $0x3f] sm:$0xff] }
  0x40   : > { %10154 = vmatprep.subr.bf16.mxu0 %v12026_v33  ;;  %v359_v34 = vpack.c.bf16 %v12332_v31, %v12329_v30 }
  0x43   : > { %10155 = vmatpush3.bf16.msra.mxu0 %v12026_v33  ;;  %v12030_v33 = vld [vmem:[%s15156_s1 + $0x88] sm:$0xff]  }
  0x44   : > { %10156 = vmatprep.subr.bf16.mxu0 %v12027_v39 }
  0x46   : > { %10109 = vmatmul.mubr.bf16.gmra.mrb[12].mxu0 %v452_v40  ;;  %v360_v40 = vpack.c.bf16 %v12344_v36, %v12341_v35 }
  0x47   : > { %10112 = vmatprep.mubr.bf16.mxu0 %v453_v42  ;;  %10157 = vmatpush3.bf16.msra.mxu0 %v12027_v39  ;;  %v12031_v39 = vld [vmem:[%s15156_s1 + $0x90] sm:$0xff]   ;;  %v361_v42 = vpack.c.bf16 %v12351_v38, %v12347_v37 }
  0x48   : > { %10158 = vmatprep.subr.bf16.mxu0 %v12028_v41 }
  0x4b   : > { %10159 = vmatpush3.bf16.msra.mxu0 %v12028_v41  ;;  %v12032_v41 = vld [vmem:[%s15156_s1 + $0x98] sm:$0xff]  }
  0x4c   : > { %10208 = vmatprep.subr.bf16.mxu0 %v12293_v47 }
  0x4e   : > { %10113 = vmatmul.mubr.bf16.gmra.mrb[16].mxu0 %v454_v48  ;;  %v362_v48 = vpack.c.bf16 %v12367_v44, %v12364_v43 }
  0x4f   : > { %10116 = vmatprep.mubr.bf16.mxu0 %v455_v49  ;;  %v12034_v49 = vld [vmem:[%s15156_s1 + $0xa8] sm:$0xff]  }
  0x56   : > { %10117 = vmatmul.mubr.bf16.gmra.mrb[20].mxu0 %v456_v54  ;;  %v12395_v54 = vld [vmem:[%s12227_s8 + $0x9f] sm:$0xff] }
  0x57   : > { %10120 = vmatprep.mubr.bf16.mxu0 %v457_v55  ;;  %v12035_v55 = vld [vmem:[%s15156_s1 + $0xb0] sm:$0xff]   ;;  %v365_v57 = vpack.c.bf16 %v12395_v54, %v12392_v53 }
  0x5e   : > { %10121 = vmatmul.mubr.bf16.gmra.mrb[24].mxu0 %v458_v60  ;;  %v12411_v60 = vld [vmem:[%s12227_s8 + $0xaf] sm:$0xff] }
  0x5f   : > { %10124 = vmatprep.mubr.bf16.mxu0 %v459_v61  ;;  %v12414_v61 = vld [vmem:[%s12227_s8 + $0xb7] sm:$0xff]  ;;  %v366_v0 = vpack.c.bf16 %v12411_v60, %v12408_v59 }
  0x60   : > { %v367_v1 = vpack.c.bf16 %v12417_v62, %v12414_v61 }
  0x66   : > { %10125 = vmatmul.mubr.bf16.gmra.mrb[28].mxu0 %v460_v2  ;;  %v12430_v2 = vld [vmem:[%s12227_s8 + $0xc7] sm:$0xff] }
  0x67   : > { %10128 = vmatprep.mubr.bf16.mxu0 %v461_v3  ;;  %v12433_v3 = vld [vmem:[%s12227_s8 + $0xcf] sm:$0xff] }
  0x68   : > { %v368_v6 = vpack.c.bf16 %v12433_v3, %v12430_v2 }
  0x6e   : > { %10129 = vmatmul.mubr.bf16.gmra.mrb[32].mxu0 %v462_v8  ;;  %v12446_v8 = vld [vmem:[%s12227_s8 + $0xe7] sm:$0xff] }
  0x6f   : > { %10132 = vmatprep.mubr.bf16.mxu0 %v463_v9  ;;  %v12449_v9 = vld [vmem:[%s12227_s8 + $0xef] sm:$0xff] }
  0x70   : > { %v370_v12 = vpack.c.bf16 %v12449_v9, %v12446_v8 }
  0x76   : > { %10133 = vmatmul.mubr.bf16.gmra.mrb[36].mxu0 %v464_v14  ;;  %v12462_v14 = vld [vmem:[%s12227_s8 + $0x107] sm:$0xff] }
  0x77   : > { %10136 = vmatprep.mubr.bf16.mxu0 %v465_v15  ;;  %v12465_v15 = vld [vmem:[%s12227_s8 + $0x10f] sm:$0xff] }
  0x78   : > { %v372_v18 = vpack.c.bf16 %v12465_v15, %v12462_v14 }
  0x7e   : > { %10137 = vmatmul.mubr.bf16.gmra.mrb[40].mxu0 %v466_v20  ;;  %v12478_v20 = vld [vmem:[%s12227_s8 + $0x127] sm:$0xff] }
  0x7f   : > { %10140 = vmatprep.mubr.bf16.mxu0 %v467_v21  ;;  %v12481_v21 = vld [vmem:[%s12227_s8 + $0x12f] sm:$0xff] }
  0x80   : > { %v374_v24 = vpack.c.bf16 %v12481_v21, %v12478_v20 }
  0x86   : > { %10141 = vmatmul.mubr.bf16.gmra.mrb[44].mxu0 %v468_v26  ;;  %v12494_v26 = vld [vmem:[%s12227_s8 + $0x147] sm:$0xff] }
  0x87   : > { %10160 = vmatprep.mubr.bf16.mxu0 %v357_v27  ;;  %v12497_v27 = vld [vmem:[%s12227_s8 + $0x14f] sm:$0xff] }
  0x8e   : > { %10161 = vmatmul.mubr.bf16.vlgmr.msra.gmra.mrb[0].mxu0 %v358_v32  ;;  %v12503_v32 = vld [vmem:[%s12227_s8 + $0x15f] sm:$0xff] }
  0x8f   : > { %10209 = vmatpush3.bf16.msra.mxu0 %v12293_v47  ;;  %10164 = vmatprep.mubr.bf16.mxu0 %v359_v34  ;;  %v12033_v47 = vld [vmem:[%s15156_s1 + $0xa0] sm:$0xff]   ;;  %v377_v34 = vpack.c.bf16 %v12503_v32, %v12500_v28 }
  0x90   : > { %10210 = vmatprep.subr.bf16.mxu0 %v12030_v33 }
  0x93   : > { %10211 = vmatpush3.bf16.msra.mxu0 %v12030_v33  ;;  %v376_v33 = vpack.c.bf16 %v12497_v27, %v12494_v26 }
  0x94   : > { %10212 = vmatprep.subr.bf16.mxu0 %v12031_v39 }
  0x96   : > { %10165 = vmatmul.mubr.bf16.gmra.mrb[4].mxu0 %v360_v40  ;;  %v12513_v40 = vld [vmem:[%s12227_s8 + $0x16f] sm:$0xff] }
  0x97   : > { %10168 = vmatprep.mubr.bf16.mxu0 %v361_v42  ;;  %10213 = vmatpush3.bf16.msra.mxu0 %v12031_v39  ;;  %v12510_v39 = vld [vmem:[%s12227_s8 + $0x167] sm:$0xff]  ;;  %v12519_v42 = vld [vmem:[%s12227_s8 + $0x17f] sm:$0xff] }
  0x98   : > { %10214 = vmatprep.subr.bf16.mxu0 %v12032_v41 }
  0x9b   : > { %10215 = vmatpush3.bf16.msra.mxu0 %v12032_v41  ;;  %v12516_v41 = vld [vmem:[%s12227_s8 + $0x177] sm:$0xff] }
  0x9c   : > { %10216 = vmatprep.subr.bf16.mxu0 %v12033_v47 }
  0x9e   : > { %10169 = vmatmul.mubr.bf16.gmra.mrb[8].mxu0 %v362_v48  ;;  %v379_v48 = vpack.c.bf16 %v12519_v42, %v12516_v41 }
  0x9f   : > { %10172 = vmatprep.mubr.bf16.mxu0 %v363_v50  ;;  %10217 = vmatpush3.bf16.msra.mxu0 %v12033_v47  ;;  %v378_v47 = vpack.c.bf16 %v12513_v40, %v12510_v39  ;;  %v12529_v50 = vld [vmem:[%s12227_s8 + $0x18f] sm:$0xff] }
  0xa0   : > { %10218 = vmatprep.subr.bf16.mxu0 %v12034_v49 }
  0xa3   : > { %10219 = vmatpush3.bf16.msra.mxu0 %v12034_v49  ;;  %v12526_v49 = vld [vmem:[%s12227_s8 + $0x187] sm:$0xff] }
  0xa4   : > { %10220 = vmatprep.subr.bf16.mxu0 %v12035_v55 }
  0xa6   : > { %10173 = vmatmul.mubr.bf16.gmra.mrb[12].mxu0 %v364_v56  ;;  %v1033_v56 = vld [vmem:[%s12227_s8 + $0x21] sm:$0xff] }
  0xa7   : > { %10176 = vmatprep.mubr.bf16.mxu0 %v365_v57  ;;  %10221 = vmatpush3.bf16.msra.mxu0 %v12035_v55  ;;  %v1032_v55 = vld [vmem:[%s12227_s8 + $0x19] sm:$0xff]  ;;  %v380_v57 = vpack.c.bf16 %v12529_v50, %v12526_v49 }
  0xa8   : > { %10222 = vmatprep.subr.bf16.mxu0 %v12036_v58 }
  0xab   : > { %10223 = vmatpush3.bf16.msra.mxu0 %v12036_v58  ;;  %v1080_v58 = vpack.c.bf16 %v1033_v56, %v1032_v55  ;;  %v12575_v55 = vld [vmem:[%s12227_s8 + $0x69] sm:$0xff]  ;;  %v12578_v56 = vld [vmem:[%s12227_s8 + $0x71] sm:$0xff] }
  0xac   : > { %10272 = vmatprep.subr.bf16.mxu0 %v12422_v63  ;;  %15300 = vst [vmem:[#allocation4_spill] sm:$0xff] %v12575_v55  ;;  %15301 = vst [vmem:[#allocation5_spill] sm:$0xff] %v12578_v56 }
  0xae   : > { %10177 = vmatmul.mubr.bf16.gmra.mrb[16].mxu0 %v366_v0  ;;  %v1034_v0 = vld [vmem:[%s12227_s8 + $0x29] sm:$0xff] }
  0xaf   : > { %10180 = vmatprep.mubr.bf16.mxu0 %v367_v1  ;;  %v12537_v1 = vld [vmem:[%s12227_s8 + $0x31] sm:$0xff] }
  0xb6   : > { %10181 = vmatmul.mubr.bf16.gmra.mrb[20].mxu0 %v368_v6  ;;  %v12540_v6 = vld [vmem:[%s12227_s8 + $0x39] sm:$0xff] }
  0xb7   : > { %10184 = vmatprep.mubr.bf16.mxu0 %v369_v7  ;;  %v12543_v7 = vld [vmem:[%s12227_s8 + $0x41] sm:$0xff] }
  0xbe   : > { %10185 = vmatmul.mubr.bf16.gmra.mrb[24].mxu0 %v370_v12  ;;  %v1081_v12 = vpack.c.bf16 %v12537_v1, %v1034_v0  ;;  %v12041_v0 = vld [vmem:[%s15156_s1 + $0xe0] sm:$0xff]  }
  0xbf   : > { %10188 = vmatprep.mubr.bf16.mxu0 %v371_v13  ;;  %v1082_v13 = vpack.c.bf16 %v12543_v7, %v12540_v6 }
  0xc6   : > { %10189 = vmatmul.mubr.bf16.gmra.mrb[28].mxu0 %v372_v18  ;;  %v12038_v18 = vld [vmem:[%s15156_s1 + $0xc8] sm:$0xff]  }
  0xc7   : > { %10192 = vmatprep.mubr.bf16.mxu0 %v373_v19  ;;  %v12553_v19 = vld [vmem:[%s12227_s8 + $0x49] sm:$0xff] }
  0xce   : > { %10193 = vmatmul.mubr.bf16.gmra.mrb[32].mxu0 %v374_v24  ;;  %v12556_v24 = vld [vmem:[%s12227_s8 + $0x51] sm:$0xff] }
  0xcf   : > { %10196 = vmatprep.mubr.bf16.mxu0 %v375_v25  ;;  %v12559_v25 = vld [vmem:[%s12227_s8 + $0x59] sm:$0xff] }
  0xd6   : > { %10197 = vmatmul.mubr.bf16.gmra.mrb[36].mxu0 %v376_v33  ;;  %v12562_v33 = vld [vmem:[%s12227_s8 + $0x61] sm:$0xff] }
  0xd7   : > { %10200 = vmatprep.mubr.bf16.mxu0 %v377_v34  ;;  %15299 = vst [vmem:[#allocation3_spill] sm:$0xff] %v12562_v33  ;;  %v12039_v34 = vld [vmem:[%s15156_s1 + $0xd0] sm:$0xff]  }
  0xde   : > { %10201 = vmatmul.mubr.bf16.gmra.mrb[40].mxu0 %v378_v47  ;;  %v1084_v47 = vpack.c.bf16 %v12562_v33, %v12559_v25 }
  0xdf   : > { %10204 = vmatprep.mubr.bf16.mxu0 %v379_v48  ;;  %v12040_v48 = vld [vmem:[%s15156_s1 + $0xd8] sm:$0xff]  }
  0xe6   : > { %10205 = vmatmul.mubr.bf16.gmra.mrb[44].mxu0 %v380_v57  ;;  %v12581_v57 = vld [vmem:[%s12227_s8 + $0x79] sm:$0xff] }
  0xe7   : > { %10224 = vmatprep.mubr.bf16.mxu0 %v1080_v58  ;;  %15302 = vst [vmem:[#allocation6_spill] sm:$0xff] %v12581_v57  ;;  %v12584_v58 = vld [vmem:[%s12227_s8 + $0x81] sm:$0xff] }
  0xe8   : > { %15303 = vst [vmem:[#allocation7_spill] sm:$0xff] %v12584_v58 }
  0xee   : > { %10225 = vmatmul.mubr.bf16.vlgmr.msra.gmra.mrb[0].mxu0 %v1081_v12  ;;  %v1085_v12 = vpack.c.bf16 %v12578_v56, %v12575_v55  ;;  %v12622_v56 = vld [vmem:[%s12227_s8 + $0xb1] sm:$0xff] }
  0xef   : > { %10273 = vmatpush3.bf16.msra.mxu0 %v12422_v63  ;;  %10228 = vmatprep.mubr.bf16.mxu0 %v1082_v13  ;;  %v1083_v63 = vpack.c.bf16 %v12556_v24, %v12553_v19  ;;  %v1086_v13 = vpack.c.bf16 %v12584_v58, %v12581_v57  ;;  %v12606_v58 = vld [vmem:[%s12227_s8 + $0xa1] sm:$0xff]  ;;  %v12619_v57 = vld [vmem:[%s12227_s8 + $0xa9] sm:$0xff]  ;;  %15309 = vst [vmem:[#allocation13_spill] sm:$0xff] %v12622_v56 }
  0xf0   : > { %10274 = vmatprep.subr.bf16.mxu0 %v12038_v18  ;;  %15307 = vst [vmem:[#allocation11_spill] sm:$0xff] %v12606_v58  ;;  %15308 = vst [vmem:[#allocation12_spill] sm:$0xff] %v12619_v57 }
  0xf3   : > { %10275 = vmatpush3.bf16.msra.mxu0 %v12038_v18  ;;  %v12042_v18 = vld [vmem:[%s15156_s1 + $0xe8] sm:$0xff]  }
  0xf4   : > { %10276 = vmatprep.subr.bf16.mxu0 %v12039_v34 }
  0xf6   : > { %10229 = vmatmul.mubr.bf16.gmra.mrb[4].mxu0 %v1083_v63  ;;  %v12600_v63 = vld [vmem:[%s12227_s8 + $0x91] sm:$0xff] }
  0xf7   : > { %10232 = vmatprep.mubr.bf16.mxu0 %v1084_v47  ;;  %10277 = vmatpush3.bf16.msra.mxu0 %v12039_v34  ;;  %v12597_v34 = vld [vmem:[%s12227_s8 + $0x89] sm:$0xff]  ;;  %15305 = vst [vmem:[#allocation9_spill] sm:$0xff] %v12600_v63  ;;  %v12603_v47 = vld [vmem:[%s12227_s8 + $0x99] sm:$0xff] }
  0xf8   : > { %10278 = vmatprep.subr.bf16.mxu0 %v12040_v48  ;;  %15304 = vst [vmem:[#allocation8_spill] sm:$0xff] %v12597_v34  ;;  %15306 = vst [vmem:[#allocation10_spill] sm:$0xff] %v12603_v47 }
  0xfb   : > { %10279 = vmatpush3.bf16.msra.mxu0 %v12040_v48  ;;  %v12043_v48 = vld [vmem:[%s15156_s1 + $0xf0] sm:$0xff]  }
  0xfc   : > { %10280 = vmatprep.subr.bf16.mxu0 %v12041_v0 }
  0xfe   : > { %10233 = vmatmul.mubr.bf16.gmra.mrb[8].mxu0 %v1085_v12  ;;  %v1087_v12 = vpack.c.bf16 %v12600_v63, %v12597_v34  ;;  %v12625_v63 = vld [vmem:[%s12227_s8 + $0xb9] sm:$0xff] }
  0xff   : > { %10236 = vmatprep.mubr.bf16.mxu0 %v1086_v13  ;;  %10281 = vmatpush3.bf16.msra.mxu0 %v12041_v0  ;;  %v1088_v13 = vpack.c.bf16 %v12606_v58, %v12603_v47  ;;  %v12044_v0 = vld [vmem:[%s15156_s1 + $0xf8] sm:$0xff]   ;;  %15310 = vst [vmem:[#allocation14_spill] sm:$0xff] %v12625_v63  ;;  %v12628_v58 = vld [vmem:[%s12227_s8 + $0xc1] sm:$0xff] }
 0x100   : > { %10282 = vmatprep.subr.bf16.mxu0 %v12042_v18  ;;  %15311 = vst [vmem:[#allocation15_spill] sm:$0xff] %v12628_v58  ;;  %v12644_v47 = vld [vmem:[%s12227_s8 + $0xd1] sm:$0xff]  ;;  %v12647_v34 = vld [vmem:[%s12227_s8 + $0xd9] sm:$0xff] }
 0x101   : > { %15313 = vst [vmem:[#allocation17_spill] sm:$0xff] %v12644_v47  ;;  %15314 = vst [vmem:[#allocation18_spill] sm:$0xff] %v12647_v34 }
 0x103   : > { %10283 = vmatpush3.bf16.msra.mxu0 %v12042_v18  ;;  %v12633_v18 = vld [vmem:[%s15156_s1 + $0x100] sm:$0xff]  }
 0x104   : > { %10284 = vmatprep.subr.bf16.mxu0 %v12043_v48 }
 0x106   : > { %10237 = vmatmul.mubr.bf16.gmra.mrb[12].mxu0 %v1087_v12  ;;  %v1089_v12 = vpack.c.bf16 %v12622_v56, %v12619_v57  ;;  %v12650_v56 = vld [vmem:[%s12227_s8 + $0xe1] sm:$0xff] }
 0x107   : > { %10240 = vmatprep.mubr.bf16.mxu0 %v1088_v13  ;;  %10285 = vmatpush3.bf16.msra.mxu0 %v12043_v48  ;;  %v1090_v13 = vpack.c.bf16 %v12628_v58, %v12625_v63  ;;  %v12641_v48 = vld [vmem:[%s12227_s8 + $0xc9] sm:$0xff]  ;;  %15315 = vst [vmem:[#allocation19_spill] sm:$0xff] %v12650_v56  ;;  %v12663_v63 = vld [vmem:[%s12227_s8 + $0xf9] sm:$0xff]  ;;  %v12666_v57 = vld [vmem:[%s12227_s8 + $0x101] sm:$0xff] }
 0x108   : > { %10286 = vmatprep.subr.bf16.mxu0 %v12044_v0  ;;  %15312 = vst [vmem:[#allocation16_spill] sm:$0xff] %v12641_v48  ;;  %v1091_v58 = vpack.c.bf16 %v12644_v47, %v12641_v48  ;;  %15318 = vst [vmem:[#allocation22_spill] sm:$0xff] %v12663_v63  ;;  %v12682_v48 = vld [vmem:[%s12227_s8 + $0x121] sm:$0xff] }
 0x109   : > { %15319 = vst [vmem:[#allocation23_spill] sm:$0xff] %v12666_v57  ;;  %15323 = vst [vmem:[#allocation27_spill] sm:$0xff] %v12682_v48 }
 0x10b   : > { %10287 = vmatpush3.bf16.msra.mxu0 %v12044_v0  ;;  %v1092_v0 = vpack.c.bf16 %v12650_v56, %v12647_v34  ;;  %v1094_v56 = vpack.c.bf16 %v12666_v57, %v12663_v63  ;;  %v12679_v34 = vld [vmem:[%s12227_s8 + $0x119] sm:$0xff] }
 0x10c   : > { %10336 = vmatprep.subr.bf16.mxu0 %v12633_v18  ;;  %15322 = vst [vmem:[#allocation26_spill] sm:$0xff] %v12679_v34  ;;  %v1096_v57 = vpack.c.bf16 %v12682_v48, %v12679_v34  ;;  %v12695_v63 = vld [vmem:[%s12227_s8 + $0x139] sm:$0xff] }
 0x10d   : > { %15326 = vst [vmem:[#allocation30_spill] sm:$0xff] %v12695_v63  ;;  %v12711_v34 = vld [vmem:[%s12227_s8 + $0x159] sm:$0xff] }
 0x10e   : > { %10241 = vmatmul.mubr.bf16.gmra.mrb[16].mxu0 %v1089_v12  ;;  %v12657_v12 = vld [vmem:[%s12227_s8 + $0xe9] sm:$0xff] }
 0x10f   : > { %10244 = vmatprep.mubr.bf16.mxu0 %v1090_v13  ;;  %15316 = vst [vmem:[#allocation20_spill] sm:$0xff] %v12657_v12  ;;  %v12660_v13 = vld [vmem:[%s12227_s8 + $0xf1] sm:$0xff] }
 0x110   : > { %15317 = vst [vmem:[#allocation21_spill] sm:$0xff] %v12660_v13  ;;  %v1093_v47 = vpack.c.bf16 %v12660_v13, %v12657_v12  ;;  %v12698_v12 = vld [vmem:[%s12227_s8 + $0x141] sm:$0xff] }
 0x111   : > { %15327 = vst [vmem:[#allocation31_spill] sm:$0xff] %v12698_v12  ;;  %v1098_v48 = vpack.c.bf16 %v12698_v12, %v12695_v63  ;;  %v12727_v12 = vld [vmem:[%s12227_s8 + $0x179] sm:$0xff]  ;;  %v12730_v63 = vld [vmem:[%s12227_s8 + $0x181] sm:$0xff] }
 0x112   : > { %15331 = vst [vmem:[#allocation35_spill] sm:$0xff] %v12730_v63  ;;  %v1102_v33 = vpack.c.bf16 %v12730_v63, %v12727_v12  ;;  %v1492_v63 = vpack.c.bf16 %v12347_v37, %v12344_v36  ;;  %v12049_v36 = vld [vmem:[%s15156_s1 + $0x120] sm:$0xff]   ;;  %v1495_v37 = vpack.c.bf16 %v12386_v51, %v12373_v46  ;;  %v1498_v46 = vpack.c.bf16 %v12414_v61, %v12411_v60  ;;  %v12052_v51 = vld [vmem:[%s15156_s1 + $0x138] sm:$0xff]  }
 0x113   : > { %v1502_v60 = vpack.c.bf16 %v12452_v10, %v12449_v9  ;;  %v1503_v61 = vpack.c.bf16 %v12462_v14, %v12455_v11  ;;  %v1510_v9 = vpack.c.bf16 %v12516_v41, %v12513_v40  ;;  %v12812_v10 = vld [vmem:[%s12227_s8 + $0x197] sm:$0xff]  ;;  %v1511_v11 = vpack.c.bf16 %v12526_v49, %v12519_v42  ;;  %v12054_v40 = vld [vmem:[%s15156_s1 + $0x148] sm:$0xff]   ;;  %v12845_v41 = vld [vmem:[%s12227_s8 + $0x60] sm:$0xff] }
 0x114   : > { %v1512_v14 = vpack.c.bf16 %v12812_v10, %v12529_v50  ;;  %v12848_v42 = vld [vmem:[%s12227_s8 + $0x68] sm:$0xff]  ;;  %v12851_v49 = vld [vmem:[%s12227_s8 + $0x70] sm:$0xff]  ;;  %v12854_v50 = vld [vmem:[%s12227_s8 + $0x78] sm:$0xff] }
 0x116   : > { %10245 = vmatmul.mubr.bf16.gmra.mrb[20].mxu0 %v1091_v58  ;;  %v12673_v58 = vld [vmem:[%s12227_s8 + $0x109] sm:$0xff] }
 0x117   : > { %10248 = vmatprep.mubr.bf16.mxu0 %v1092_v0  ;;  %15320 = vst [vmem:[#allocation24_spill] sm:$0xff] %v12673_v58  ;;  %v12676_v0 = vld [vmem:[%s12227_s8 + $0x111] sm:$0xff] }
 0x118   : > { %15321 = vst [vmem:[#allocation25_spill] sm:$0xff] %v12676_v0  ;;  %v1095_v13 = vpack.c.bf16 %v12676_v0, %v12673_v58  ;;  %v12714_v58 = vld [vmem:[%s12227_s8 + $0x161] sm:$0xff] }
 0x119   : > { %15329 = vst [vmem:[#allocation33_spill] sm:$0xff] %v12714_v58 }
 0x11e   : > { %10249 = vmatmul.mubr.bf16.gmra.mrb[24].mxu0 %v1093_v47  ;;  %v12692_v47 = vld [vmem:[%s12227_s8 + $0x131] sm:$0xff] }
 0x11f   : > { %10252 = vmatprep.mubr.bf16.mxu0 %v1094_v56  ;;  %v12689_v56 = vld [vmem:[%s12227_s8 + $0x129] sm:$0xff]  ;;  %15325 = vst [vmem:[#allocation29_spill] sm:$0xff] %v12692_v47 }
 0x120   : > { %15324 = vst [vmem:[#allocation28_spill] sm:$0xff] %v12689_v56  ;;  %v1097_v0 = vpack.c.bf16 %v12692_v47, %v12689_v56  ;;  %v1100_v47 = vpack.c.bf16 %v12714_v58, %v12711_v34  ;;  %v1490_v58 = vpack.c.bf16 %v12329_v30, %v12326_v29  ;;  %v12047_v29 = vld [vmem:[%s15156_s1 + $0x110] sm:$0xff]   ;;  %v1493_v30 = vpack.c.bf16 %v12364_v43, %v12351_v38  ;;  %v12050_v43 = vld [vmem:[%s15156_s1 + $0x128] sm:$0xff]  }
 0x121   : > { %v1496_v38 = vpack.c.bf16 %v12392_v53, %v12389_v52  ;;  %v12053_v52 = vld [vmem:[%s15156_s1 + $0x140] sm:$0xff]   ;;  %v1499_v53 = vpack.c.bf16 %v12430_v2, %v12417_v62  ;;  %v1504_v62 = vpack.c.bf16 %v12468_v16, %v12465_v15  ;;  %v1505_v2 = vpack.c.bf16 %v12478_v20, %v12471_v17  ;;  %v1852_v17 = vld [vmem:[%s12227_s8 + $0x30] sm:$0xff]  ;;  %v1853_v20 = vld [vmem:[%s12227_s8 + $0x38] sm:$0xff] }
 0x122   : > { %v12819_v15 = vld [vmem:[%s12227_s8 + $0x19f] sm:$0xff]  ;;  %v12822_v16 = vld [vmem:[%s12227_s8 + $0x1a7] sm:$0xff] }
 0x126   : > { %10253 = vmatmul.mubr.bf16.gmra.mrb[28].mxu0 %v1095_v13  ;;  %v12708_v13 = vld [vmem:[%s12227_s8 + $0x151] sm:$0xff] }
 0x127   : > { %10256 = vmatprep.mubr.bf16.mxu0 %v1096_v57  ;;  %v12705_v57 = vld [vmem:[%s12227_s8 + $0x149] sm:$0xff]  ;;  %15328 = vst [vmem:[#allocation32_spill] sm:$0xff] %v12708_v13 }
 0x128   : > { %v1099_v55 = vpack.c.bf16 %v12708_v13, %v12705_v57  ;;  %v12737_v13 = vld [vmem:[%s12227_s8 + $0x189] sm:$0xff] }
 0x12e   : > { %10257 = vmatmul.mubr.bf16.gmra.mrb[32].mxu0 %v1097_v0  ;;  %v12721_v0 = vld [vmem:[%s12227_s8 + $0x169] sm:$0xff] }
 0x12f   : > { %10260 = vmatprep.mubr.bf16.mxu0 %v1098_v48  ;;  %v12724_v48 = vld [vmem:[%s12227_s8 + $0x171] sm:$0xff] }
 0x130   : > { %15330 = vst [vmem:[#allocation34_spill] sm:$0xff] %v12724_v48  ;;  %v1101_v56 = vpack.c.bf16 %v12724_v48, %v12721_v0  ;;  %v1491_v48 = vpack.c.bf16 %v12341_v35, %v12332_v31  ;;  %v1494_v31 = vpack.c.bf16 %v12370_v45, %v12367_v44  ;;  %v12048_v35 = vld [vmem:[%s15156_s1 + $0x118] sm:$0xff]   ;;  %v12051_v44 = vld [vmem:[%s15156_s1 + $0x130] sm:$0xff]   ;;  %v1497_v45 = vpack.c.bf16 %v12408_v59, %v12395_v54 }
 0x131   : > { %v1500_v54 = vpack.c.bf16 %v12436_v4, %v12433_v3  ;;  %v1501_v59 = vpack.c.bf16 %v12446_v8, %v12439_v5  ;;  %v1506_v3 = vpack.c.bf16 %v12484_v22, %v12481_v21  ;;  %v1507_v4 = vpack.c.bf16 %v12494_v26, %v12487_v23  ;;  %v1854_v23 = vld [vmem:[%s12227_s8 + $0x40] sm:$0xff]  ;;  %v12830_v26 = vld [vmem:[%s12227_s8 + $0x48] sm:$0xff] }
 0x132   : > { %v1508_v5 = vpack.c.bf16 %v12500_v28, %v12497_v27  ;;  %v1509_v8 = vpack.c.bf16 %v12510_v39, %v12503_v32  ;;  %v1513_v21 = vpack.c.bf16 %v12822_v16, %v12819_v15  ;;  %v1900_v22 = vpack.c.bf16 %v1853_v20, %v1852_v17  ;;  %v12833_v27 = vld [vmem:[%s12227_s8 + $0x50] sm:$0xff]  ;;  %v12836_v28 = vld [vmem:[%s12227_s8 + $0x58] sm:$0xff]  ;;  %v12952_v17 = vld [vmem:[%s12227_s8 + $0x108] sm:$0xff] }
 0x133   : > { %v1901_v32 = vpack.c.bf16 %v12830_v26, %v1854_v23  ;;  %v1902_v39 = vpack.c.bf16 %v12836_v28, %v12833_v27  ;;  %v12955_v20 = vld [vmem:[%s12227_s8 + $0x110] sm:$0xff] }
 0x136   : > { %10261 = vmatmul.mubr.bf16.gmra.mrb[36].mxu0 %v1099_v55  ;;  %v12740_v55 = vld [vmem:[%s12227_s8 + $0x191] sm:$0xff] }
 0x137   : > { %10264 = vmatprep.mubr.bf16.mxu0 %v1100_v47  ;;  %v1103_v47 = vpack.c.bf16 %v12740_v55, %v12737_v13 }
 0x13e   : > { %10265 = vmatmul.mubr.bf16.gmra.mrb[40].mxu0 %v1101_v56  ;;  %v12056_v56 = vld [vmem:[%s15156_s1 + $0x158] sm:$0xff]  }
 0x13f   : > { %10268 = vmatprep.mubr.bf16.mxu0 %v1102_v33  ;;  %v12046_v33 = vld [vmem:[%s15156_s1 + $0x108] sm:$0xff]  }
 0x146   : > { %10269 = vmatmul.mubr.bf16.gmra.mrb[44].mxu0 %v1103_v47  ;;  %v12870_v47 = vld [vmem:[%s12227_s8 + $0x88] sm:$0xff] }
 0x147   : > { %10288 = vmatprep.mubr.bf16.mxu0 %v1490_v58  ;;  %v1904_v58 = vpack.c.bf16 %v12854_v50, %v12851_v49 }
 0x14e   : > { %10289 = vmatmul.mubr.bf16.vlgmr.msra.gmra.mrb[0].mxu0 %v1491_v48  ;;  %v12867_v48 = vld [vmem:[%s12227_s8 + $0x80] sm:$0xff] }
 0x14f   : > { %10337 = vmatpush3.bf16.msra.mxu0 %v12633_v18  ;;  %10292 = vmatprep.mubr.bf16.mxu0 %v1492_v63  ;;  %v12055_v63 = vld [vmem:[%s15156_s1 + $0x150] sm:$0xff]   ;;  %v1903_v18 = vpack.c.bf16 %v12848_v42, %v12845_v41 }
 0x150   : > { %10338 = vmatprep.subr.bf16.mxu0 %v12046_v33 }
 0x153   : > { %10339 = vmatpush3.bf16.msra.mxu0 %v12046_v33  ;;  %v12873_v33 = vld [vmem:[%s12227_s8 + $0x90] sm:$0xff] }
 0x154   : > { %10340 = vmatprep.subr.bf16.mxu0 %v12047_v29 }
 0x156   : > { %10293 = vmatmul.mubr.bf16.gmra.mrb[4].mxu0 %v1493_v30  ;;  %v12057_v30 = vld [vmem:[%s15156_s1 + $0x160] sm:$0xff]  }
 0x157   : > { %10296 = vmatprep.mubr.bf16.mxu0 %v1494_v31  ;;  %10341 = vmatpush3.bf16.msra.mxu0 %v12047_v29  ;;  %v12876_v29 = vld [vmem:[%s12227_s8 + $0x98] sm:$0xff]  ;;  %v1905_v31 = vpack.c.bf16 %v12870_v47, %v12867_v48 }
 0x158   : > { %10342 = vmatprep.subr.bf16.mxu0 %v12048_v35 }
 0x15b   : > { %10343 = vmatpush3.bf16.msra.mxu0 %v12048_v35  ;;  %v1906_v35 = vpack.c.bf16 %v12876_v29, %v12873_v33 }
 0x15c   : > { %10344 = vmatprep.subr.bf16.mxu0 %v12049_v36 }
 0x15e   : > { %10297 = vmatmul.mubr.bf16.gmra.mrb[8].mxu0 %v1495_v37  ;;  %v12889_v37 = vld [vmem:[%s12227_s8 + $0xa0] sm:$0xff] }
 0x15f   : > { %10300 = vmatprep.mubr.bf16.mxu0 %v1496_v38  ;;  %10345 = vmatpush3.bf16.msra.mxu0 %v12049_v36  ;;  %v12058_v36 = vld [vmem:[%s15156_s1 + $0x168] sm:$0xff]  }
 0x160   : > { %10346 = vmatprep.subr.bf16.mxu0 %v12050_v43  ;;  %v12892_v38 = vld [vmem:[%s12227_s8 + $0xa8] sm:$0xff] }
 0x163   : > { %10347 = vmatpush3.bf16.msra.mxu0 %v12050_v43  ;;  %v12895_v43 = vld [vmem:[%s12227_s8 + $0xb0] sm:$0xff] }
 0x164   : > { %10348 = vmatprep.subr.bf16.mxu0 %v12051_v44 }
 0x166   : > { %10301 = vmatmul.mubr.bf16.gmra.mrb[12].mxu0 %v1497_v45  ;;  %v12059_v45 = vld [vmem:[%s15156_s1 + $0x170] sm:$0xff]  }
 0x167   : > { %10304 = vmatprep.mubr.bf16.mxu0 %v1498_v46  ;;  %10349 = vmatpush3.bf16.msra.mxu0 %v12051_v44  ;;  %v12898_v44 = vld [vmem:[%s12227_s8 + $0xb8] sm:$0xff]  ;;  %v1907_v46 = vpack.c.bf16 %v12892_v38, %v12889_v37 }
 0x168   : > { %10350 = vmatprep.subr.bf16.mxu0 %v12052_v51 }
 0x16b   : > { %10351 = vmatpush3.bf16.msra.mxu0 %v12052_v51  ;;  %v1908_v51 = vpack.c.bf16 %v12898_v44, %v12895_v43 }
 0x16c   : > { %10400 = vmatprep.subr.bf16.mxu0 %v12053_v52 }
 0x16e   : > { %10305 = vmatmul.mubr.bf16.gmra.mrb[16].mxu0 %v1499_v53  ;;  %v12911_v53 = vld [vmem:[%s12227_s8 + $0xc0] sm:$0xff] }
 0x16f   : > { %10308 = vmatprep.mubr.bf16.mxu0 %v1500_v54  ;;  %v12914_v54 = vld [vmem:[%s12227_s8 + $0xc8] sm:$0xff] }
 0x176   : > { %10309 = vmatmul.mubr.bf16.gmra.mrb[20].mxu0 %v1501_v59  ;;  %v12917_v59 = vld [vmem:[%s12227_s8 + $0xd0] sm:$0xff] }
 0x177   : > { %10312 = vmatprep.mubr.bf16.mxu0 %v1502_v60  ;;  %v12920_v60 = vld [vmem:[%s12227_s8 + $0xd8] sm:$0xff] }
 0x17e   : > { %10313 = vmatmul.mubr.bf16.gmra.mrb[24].mxu0 %v1503_v61  ;;  %v12925_v61 = vld [vmem:[%s15156_s1 + $0x180] sm:$0xff]  }
 0x17f   : > { %10316 = vmatprep.mubr.bf16.mxu0 %v1504_v62  ;;  %v1909_v62 = vpack.c.bf16 %v12914_v54, %v12911_v53 }
 0x186   : > { %10317 = vmatmul.mubr.bf16.gmra.mrb[28].mxu0 %v1505_v2  ;;  %v1910_v2 = vpack.c.bf16 %v12920_v60, %v12917_v59 }
 0x187   : > { %10320 = vmatprep.mubr.bf16.mxu0 %v1506_v3  ;;  %v12933_v3 = vld [vmem:[%s12227_s8 + $0xe0] sm:$0xff] }
 0x18e   : > { %10321 = vmatmul.mubr.bf16.gmra.mrb[32].mxu0 %v1507_v4  ;;  %v12936_v4 = vld [vmem:[%s12227_s8 + $0xe8] sm:$0xff] }
 0x18f   : > { %10324 = vmatprep.mubr.bf16.mxu0 %v1508_v5  ;;  %v12939_v5 = vld [vmem:[%s12227_s8 + $0xf0] sm:$0xff] }
 0x196   : > { %10325 = vmatmul.mubr.bf16.gmra.mrb[36].mxu0 %v1509_v8  ;;  %v12942_v8 = vld [vmem:[%s12227_s8 + $0xf8] sm:$0xff] }
 0x197   : > { %10328 = vmatprep.mubr.bf16.mxu0 %v1510_v9  ;;  %v1911_v9 = vpack.c.bf16 %v12936_v4, %v12933_v3 }
 0x19e   : > { %10329 = vmatmul.mubr.bf16.gmra.mrb[40].mxu0 %v1511_v11  ;;  %v1912_v11 = vpack.c.bf16 %v12942_v8, %v12939_v5 }
 0x19f   : > { %10332 = vmatprep.mubr.bf16.mxu0 %v1512_v14  ;;  %v12949_v14 = vld [vmem:[%s12227_s8 + $0x100] sm:$0xff] }
 0x1a6   : > { %10333 = vmatmul.mubr.bf16.gmra.mrb[44].mxu0 %v1513_v21  ;;  %v12958_v21 = vld [vmem:[%s12227_s8 + $0x118] sm:$0xff] }
 0x1a7   : > { %10352 = vmatprep.mubr.bf16.mxu0 %v1900_v22  ;;  %v1913_v22 = vpack.c.bf16 %v12952_v17, %v12949_v14  ;;  %v1914_v23 = vpack.c.bf16 %v12958_v21, %v12955_v20 }
 0x1ae   : > { %10353 = vmatmul.mubr.bf16.vlgmr.msra.gmra.mrb[0].mxu0 %v1901_v32  ;;  %v12965_v32 = vld [vmem:[%s12227_s8 + $0x120] sm:$0xff] }
 0x1af   : > { %10401 = vmatpush3.bf16.msra.mxu0 %v12053_v52  ;;  %10356 = vmatprep.mubr.bf16.mxu0 %v1902_v39  ;;  %v12060_v52 = vld [vmem:[%s15156_s1 + $0x178] sm:$0xff]   ;;  %v12968_v39 = vld [vmem:[%s12227_s8 + $0x128] sm:$0xff] }
 0x1b0   : > { %10402 = vmatprep.subr.bf16.mxu0 %v12054_v40 }
 0x1b3   : > { %10403 = vmatpush3.bf16.msra.mxu0 %v12054_v40  ;;  %v12971_v40 = vld [vmem:[%s12227_s8 + $0x130] sm:$0xff] }
 0x1b4   : > { %10404 = vmatprep.subr.bf16.mxu0 %v12055_v63 }
 0x1b6   : > { %10357 = vmatmul.mubr.bf16.gmra.mrb[4].mxu0 %v1903_v18  ;;  %v1915_v18 = vpack.c.bf16 %v12968_v39, %v12965_v32 }
 0x1b7   : > { %10360 = vmatprep.mubr.bf16.mxu0 %v1904_v58  ;;  %10405 = vmatpush3.bf16.msra.mxu0 %v12055_v63  ;;  %v12974_v63 = vld [vmem:[%s12227_s8 + $0x138] sm:$0xff] }
 0x1b8   : > { %10406 = vmatprep.subr.bf16.mxu0 %v12056_v56  ;;  %v1916_v58 = vpack.c.bf16 %v12974_v63, %v12971_v40 }
 0x1bb   : > { %10407 = vmatpush3.bf16.msra.mxu0 %v12056_v56  ;;  %v12981_v56 = vld [vmem:[%s12227_s8 + $0x140] sm:$0xff] }
 0x1bc   : > { %10408 = vmatprep.subr.bf16.mxu0 %v12057_v30 }
 0x1be   : > { %10361 = vmatmul.mubr.bf16.gmra.mrb[8].mxu0 %v1905_v31  ;;  %v12987_v31 = vld [vmem:[%s12227_s8 + $0x150] sm:$0xff] }
 0x1bf   : > { %10364 = vmatprep.mubr.bf16.mxu0 %v1906_v35  ;;  %10409 = vmatpush3.bf16.msra.mxu0 %v12057_v30  ;;  %v12984_v30 = vld [vmem:[%s12227_s8 + $0x148] sm:$0xff]  ;;  %v12990_v35 = vld [vmem:[%s12227_s8 + $0x158] sm:$0xff] }
 0x1c0   : > { %10410 = vmatprep.subr.bf16.mxu0 %v12058_v36 }
 0x1c3   : > { %10411 = vmatpush3.bf16.msra.mxu0 %v12058_v36  ;;  %v1917_v36 = vpack.c.bf16 %v12984_v30, %v12981_v56 }
 0x1c4   : > { %10412 = vmatprep.subr.bf16.mxu0 %v12059_v45 }
 0x1c6   : > { %10365 = vmatmul.mubr.bf16.gmra.mrb[12].mxu0 %v1907_v46  ;;  %v12997_v46 = vld [vmem:[%s12227_s8 + $0x160] sm:$0xff] }
 0x1c7   : > { %10368 = vmatprep.mubr.bf16.mxu0 %v1908_v51  ;;  %10413 = vmatpush3.bf16.msra.mxu0 %v12059_v45  ;;  %v1918_v45 = vpack.c.bf16 %v12990_v35, %v12987_v31  ;;  %v13000_v51 = vld [vmem:[%s12227_s8 + $0x168] sm:$0xff] }
 0x1c8   : > { %10414 = vmatprep.subr.bf16.mxu0 %v12060_v52 }
 0x1cb   : > { %10415 = vmatpush3.bf16.msra.mxu0 %v12060_v52  ;;  %v13003_v52 = vld [vmem:[%s12227_s8 + $0x170] sm:$0xff] }
 0x1cc   : > { %10464 = vmatprep.subr.bf16.mxu0 %v12925_v61  ;;  %15332 = vst [vmem:[#allocation36_spill] sm:$0xff] %v13003_v52 }
 0x1ce   : > { %10369 = vmatmul.mubr.bf16.gmra.mrb[16].mxu0 %v1909_v62  ;;  %v13006_v62 = vld [vmem:[%s12227_s8 + $0x178] sm:$0xff] }
 0x1cf   : > { %10372 = vmatprep.mubr.bf16.mxu0 %v1910_v2  ;;  %15333 = vst [vmem:[#allocation37_spill] sm:$0xff] %v13006_v62  ;;  %v1919_v2 = vpack.c.bf16 %v13000_v51, %v12997_v46 }
 0x1d6   : > { %10373 = vmatmul.mubr.bf16.gmra.mrb[20].mxu0 %v1911_v9  ;;  %v1920_v9 = vpack.c.bf16 %v13006_v62, %v13003_v52  ;;  %v2310_v62 = vpack.c.bf16 %v12540_v6, %v12537_v1  ;;  %v12063_v1 = vld [vmem:[%s15156_s1 + $0x190] sm:$0xff]   ;;  %v15362_v52 = vld [vmem:[#allocation25_spill] sm:$0xff] }
 0x1d7   : > { %10376 = vmatprep.mubr.bf16.mxu0 %v1912_v11  ;;  %v13013_v11 = vld [vmem:[%s12227_s8 + $0x180] sm:$0xff]  ;;  %v15340_v6 = vld [vmem:[#allocation3_spill] sm:$0xff] }
 0x1d8   : > { %15334 = vst [vmem:[#allocation38_spill] sm:$0xff] %v13013_v11 }
 0x1de   : > { %10377 = vmatmul.mubr.bf16.gmra.mrb[24].mxu0 %v1913_v22  ;;  %v13016_v22 = vld [vmem:[%s12227_s8 + $0x188] sm:$0xff] }
 0x1df   : > { %10380 = vmatprep.mubr.bf16.mxu0 %v1914_v23  ;;  %15335 = vst [vmem:[#allocation39_spill] sm:$0xff] %v13016_v22  ;;  %v13019_v23 = vld [vmem:[%s12227_s8 + $0x190] sm:$0xff] }
 0x1e0   : > { %15336 = vst [vmem:[#allocation40_spill] sm:$0xff] %v13019_v23 }
 0x1e6   : > { %10381 = vmatmul.mubr.bf16.gmra.mrb[28].mxu0 %v1915_v18  ;;  %v13022_v18 = vld [vmem:[%s12227_s8 + $0x198] sm:$0xff] }
 0x1e7   : > { %10384 = vmatprep.mubr.bf16.mxu0 %v1916_v58  ;;  %15337 = vst [vmem:[#allocation41_spill] sm:$0xff] %v13022_v18  ;;  %v1921_v58 = vpack.c.bf16 %v13016_v22, %v13013_v11  ;;  %v2311_v22 = vpack.c.bf16 %v12553_v19, %v12543_v7  ;;  %v15342_v7 = vld [vmem:[#allocation5_spill] sm:$0xff]  ;;  %v15343_v19 = vld [vmem:[#allocation6_spill] sm:$0xff] }
 0x1ee   : > { %10385 = vmatmul.mubr.bf16.gmra.mrb[32].mxu0 %v1917_v36  ;;  %v1922_v36 = vpack.c.bf16 %v13022_v18, %v13019_v23  ;;  %v2312_v18 = vpack.c.bf16 %v12559_v25, %v12556_v24  ;;  %v2314_v24 = vpack.c.bf16 %v15343_v19, %v15342_v7  ;;  %v12064_v25 = vld [vmem:[%s15156_s1 + $0x198] sm:$0xff]   ;;  %v12066_v7 = vld [vmem:[%s15156_s1 + $0x1a8] sm:$0xff]  }
 0x1ef   : > { %10388 = vmatprep.mubr.bf16.mxu0 %v1918_v45  ;;  %v13029_v45 = vld [vmem:[%s12227_s8 + $0x1a0] sm:$0xff]  ;;  %v15349_v19 = vld [vmem:[#allocation12_spill] sm:$0xff] }
 0x1f0   : > { %15338 = vst [vmem:[#allocation42_spill] sm:$0xff] %v13029_v45  ;;  %v15361_v23 = vld [vmem:[#allocation24_spill] sm:$0xff] }
 0x1f6   : > { %10389 = vmatmul.mubr.bf16.gmra.mrb[36].mxu0 %v1919_v2  ;;  %v13032_v2 = vld [vmem:[%s12227_s8 + $0x1a8] sm:$0xff] }
 0x1f7   : > { %10392 = vmatprep.mubr.bf16.mxu0 %v1920_v9  ;;  %15339 = vst [vmem:[#allocation43_spill] sm:$0xff] %v13032_v2  ;;  %v1923_v9 = vpack.c.bf16 %v13032_v2, %v13029_v45  ;;  %v15360_v45 = vld [vmem:[#allocation23_spill] sm:$0xff] }
 0x1f8   : > { %v2323_v11 = vpack.c.bf16 %v15361_v23, %v15360_v45  ;;  %v15369_v45 = vld [vmem:[#allocation32_spill] sm:$0xff] }
 0x1fe   : > { %10393 = vmatmul.mubr.bf16.gmra.mrb[40].mxu0 %v1921_v58  ;;  %v12062_v58 = vld [vmem:[%s15156_s1 + $0x188] sm:$0xff]  }
 0x1ff   : > { %10396 = vmatprep.mubr.bf16.mxu0 %v1922_v36 }
 0x206   : > { %10397 = vmatmul.mubr.bf16.gmra.mrb[44].mxu0 %v1923_v9 }
 0x207   : > { %10416 = vmatprep.mubr.bf16.mxu0 %v2310_v62  ;;  %v15341_v62 = vld [vmem:[#allocation4_spill] sm:$0xff] }
 0x208   : > { %v2313_v36 = vpack.c.bf16 %v15341_v62, %v15340_v6  ;;  %v15347_v6 = vld [vmem:[#allocation10_spill] sm:$0xff] }
 0x20e   : > { %10417 = vmatmul.mubr.bf16.vlgmr.msra.gmra.mrb[0].mxu0 %v2311_v22  ;;  %v15344_v22 = vld [vmem:[#allocation7_spill] sm:$0xff] }
 0x20f   : > { %10465 = vmatpush3.bf16.msra.mxu0 %v12925_v61  ;;  %10420 = vmatprep.mubr.bf16.mxu0 %v2312_v18  ;;  %v12065_v61 = vld [vmem:[%s15156_s1 + $0x1a0] sm:$0xff]   ;;  %v15345_v18 = vld [vmem:[#allocation8_spill] sm:$0xff] }
 0x210   : > { %10466 = vmatprep.subr.bf16.mxu0 %v12062_v58  ;;  %v2315_v9 = vpack.c.bf16 %v15345_v18, %v15344_v22  ;;  %v15350_v22 = vld [vmem:[#allocation13_spill] sm:$0xff]  ;;  %v15351_v18 = vld [vmem:[#allocation14_spill] sm:$0xff] }
 0x213   : > { %10467 = vmatpush3.bf16.msra.mxu0 %v12062_v58  ;;  %v15346_v58 = vld [vmem:[#allocation9_spill] sm:$0xff] }
 0x214   : > { %10468 = vmatprep.subr.bf16.mxu0 %v12063_v1  ;;  %v2316_v62 = vpack.c.bf16 %v15347_v6, %v15346_v58  ;;  %v2318_v58 = vpack.c.bf16 %v15351_v18, %v15350_v22  ;;  %v15353_v6 = vld [vmem:[#allocation16_spill] sm:$0xff] }
 0x215   : > { %v15357_v18 = vld [vmem:[#allocation20_spill] sm:$0xff] }
 0x216   : > { %10421 = vmatmul.mubr.bf16.gmra.mrb[4].mxu0 %v2313_v36  ;;  %v15348_v36 = vld [vmem:[#allocation11_spill] sm:$0xff] }
 0x217   : > { %10424 = vmatprep.mubr.bf16.mxu0 %v2314_v24  ;;  %10469 = vmatpush3.bf16.msra.mxu0 %v12063_v1  ;;  %v12067_v1 = vld [vmem:[%s15156_s1 + $0x1b0] sm:$0xff]   ;;  %v2317_v24 = vpack.c.bf16 %v15349_v19, %v15348_v36  ;;  %v15354_v36 = vld [vmem:[#allocation17_spill] sm:$0xff]  ;;  %v15355_v19 = vld [vmem:[#allocation18_spill] sm:$0xff] }
 0x218   : > { %10470 = vmatprep.subr.bf16.mxu0 %v12064_v25  ;;  %v2320_v22 = vpack.c.bf16 %v15355_v19, %v15354_v36  ;;  %v15366_v19 = vld [vmem:[#allocation29_spill] sm:$0xff] }
 0x21b   : > { %10471 = vmatpush3.bf16.msra.mxu0 %v12064_v25  ;;  %v12068_v25 = vld [vmem:[%s15156_s1 + $0x1b8] sm:$0xff]  }
 0x21c   : > { %10472 = vmatprep.subr.bf16.mxu0 %v12065_v61 }
 0x21e   : > { %10425 = vmatmul.mubr.bf16.gmra.mrb[8].mxu0 %v2315_v9  ;;  %v15352_v9 = vld [vmem:[#allocation15_spill] sm:$0xff] }
 0x21f   : > { %10428 = vmatprep.mubr.bf16.mxu0 %v2316_v62  ;;  %10473 = vmatpush3.bf16.msra.mxu0 %v12065_v61  ;;  %v12069_v61 = vld [vmem:[%s15156_s1 + $0x1c0] sm:$0xff]   ;;  %v2319_v62 = vpack.c.bf16 %v15353_v6, %v15352_v9  ;;  %v15363_v9 = vld [vmem:[#allocation26_spill] sm:$0xff] }
 0x220   : > { %10474 = vmatprep.subr.bf16.mxu0 %v12066_v7  ;;  %v2324_v6 = vpack.c.bf16 %v15363_v9, %v15362_v52  ;;  %v2328_v52 = vpack.c.bf16 %v12711_v34, %v15369_v45  ;;  %v2678_v45 = vld [vmem:[%s12227_s8 + $0x77] sm:$0xff] }
 0x223   : > { %10475 = vmatpush3.bf16.msra.mxu0 %v12066_v7  ;;  %v15356_v7 = vld [vmem:[#allocation19_spill] sm:$0xff] }
 0x224   : > { %10476 = vmatprep.subr.bf16.mxu0 %v12067_v1 }
 0x226   : > { %10429 = vmatmul.mubr.bf16.gmra.mrb[12].mxu0 %v2317_v24  ;;  %v2321_v24 = vpack.c.bf16 %v15357_v18, %v15356_v7 }
 0x227   : > { %10432 = vmatprep.mubr.bf16.mxu0 %v2318_v58  ;;  %10477 = vmatpush3.bf16.msra.mxu0 %v12067_v1  ;;  %v15358_v58 = vld [vmem:[#allocation21_spill] sm:$0xff]  ;;  %v15359_v1 = vld [vmem:[#allocation22_spill] sm:$0xff] }
 0x228   : > { %10478 = vmatprep.subr.bf16.mxu0 %v12068_v25  ;;  %v2322_v2 = vpack.c.bf16 %v15359_v1, %v15358_v58  ;;  %v13104_v1 = vld [vmem:[%s12227_s8 + $0x199] sm:$0xff] }
 0x229   : > { %v2332_v34 = vpack.c.bf16 %v13104_v1, %v12740_v55  ;;  %v2675_v55 = vld [vmem:[%s12227_s8 + $0x5f] sm:$0xff] }
 0x22b   : > { %10479 = vmatpush3.bf16.msra.mxu0 %v12068_v25  ;;  %v15364_v25 = vld [vmem:[#allocation27_spill] sm:$0xff] }
 0x22c   : > { %10528 = vmatprep.subr.bf16.mxu0 %v12069_v61 }
 0x22e   : > { %10433 = vmatmul.mubr.bf16.gmra.mrb[16].mxu0 %v2319_v62  ;;  %v15365_v62 = vld [vmem:[#allocation28_spill] sm:$0xff] }
 0x22f   : > { %10436 = vmatprep.mubr.bf16.mxu0 %v2320_v22  ;;  %v2325_v36 = vpack.c.bf16 %v15365_v62, %v15364_v25  ;;  %v15367_v22 = vld [vmem:[#allocation30_spill] sm:$0xff] }
 0x230   : > { %v2326_v7 = vpack.c.bf16 %v15367_v22, %v15366_v19  ;;  %v2673_v25 = vld [vmem:[%s12227_s8 + $0x4f] sm:$0xff]  ;;  %v2676_v19 = vld [vmem:[%s12227_s8 + $0x67] sm:$0xff] }
 0x231   : > { %v2677_v22 = vld [vmem:[%s12227_s8 + $0x6f] sm:$0xff] }
 0x236   : > { %10437 = vmatmul.mubr.bf16.gmra.mrb[20].mxu0 %v2321_v24  ;;  %v15371_v24 = vld [vmem:[#allocation34_spill] sm:$0xff] }
 0x237   : > { %10440 = vmatprep.mubr.bf16.mxu0 %v2322_v2  ;;  %v15368_v2 = vld [vmem:[#allocation31_spill] sm:$0xff]  ;;  %v2330_v58 = vpack.c.bf16 %v12727_v12, %v15371_v24  ;;  %v2672_v12 = vld [vmem:[%s12227_s8 + $0x47] sm:$0xff] }
 0x238   : > { %v2327_v23 = vpack.c.bf16 %v12705_v57, %v15368_v2  ;;  %v15372_v57 = vld [vmem:[#allocation35_spill] sm:$0xff]  ;;  %v2722_v2 = vpack.c.bf16 %v2677_v22, %v2676_v19  ;;  %v2687_v22 = vld [vmem:[%s12227_s8 + $0xbf] sm:$0xff] }
 0x239   : > { %v2331_v9 = vpack.c.bf16 %v12737_v13, %v15372_v57  ;;  %v2674_v13 = vld [vmem:[%s12227_s8 + $0x57] sm:$0xff] }
 0x23a   : > { %v12071_v24 = vld [vmem:[%s15156_s1 + $0x1d0] sm:$0xff]  }
 0x23b   : > { %v2686_v19 = vld [vmem:[%s12227_s8 + $0xb7] sm:$0xff] }
 0x23e   : > { %10441 = vmatmul.mubr.bf16.gmra.mrb[24].mxu0 %v2323_v11  ;;  %v15370_v11 = vld [vmem:[#allocation33_spill] sm:$0xff] }
 0x23f   : > { %10444 = vmatprep.mubr.bf16.mxu0 %v2324_v6  ;;  %v2329_v18 = vpack.c.bf16 %v12721_v0, %v15370_v11  ;;  %v13111_v0 = vld [vmem:[%s12227_s8 + $0x1a1] sm:$0xff]  ;;  %v13114_v6 = vld [vmem:[%s12227_s8 + $0x1a9] sm:$0xff] }
 0x240   : > { %v2333_v62 = vpack.c.bf16 %v13114_v6, %v13111_v0  ;;  %v2680_v11 = vld [vmem:[%s12227_s8 + $0x87] sm:$0xff] }
 0x246   : > { %10445 = vmatmul.mubr.bf16.gmra.mrb[28].mxu0 %v2325_v36  ;;  %v2720_v36 = vpack.c.bf16 %v2673_v25, %v2672_v12  ;;  %v2684_v12 = vld [vmem:[%s12227_s8 + $0xa7] sm:$0xff]  ;;  %v2685_v25 = vld [vmem:[%s12227_s8 + $0xaf] sm:$0xff] }
 0x247   : > { %10448 = vmatprep.mubr.bf16.mxu0 %v2326_v7  ;;  %v2721_v7 = vpack.c.bf16 %v2675_v55, %v2674_v13  ;;  %v2726_v13 = vpack.c.bf16 %v2685_v25, %v2684_v12  ;;  %v12074_v55 = vld [vmem:[%s15156_s1 + $0x1e8] sm:$0xff]   ;;  %v2694_v12 = vld [vmem:[%s12227_s8 + $0xf7] sm:$0xff]  ;;  %v2695_v25 = vld [vmem:[%s12227_s8 + $0xff] sm:$0xff] }
 0x24e   : > { %10449 = vmatmul.mubr.bf16.gmra.mrb[32].mxu0 %v2327_v23  ;;  %v12070_v23 = vld [vmem:[%s15156_s1 + $0x1c8] sm:$0xff]  }
 0x24f   : > { %10452 = vmatprep.mubr.bf16.mxu0 %v2328_v52  ;;  %v2679_v52 = vld [vmem:[%s12227_s8 + $0x7f] sm:$0xff] }
 0x256   : > { %10453 = vmatmul.mubr.bf16.gmra.mrb[36].mxu0 %v2329_v18  ;;  %v2681_v18 = vld [vmem:[%s12227_s8 + $0x8f] sm:$0xff] }
 0x257   : > { %10456 = vmatprep.mubr.bf16.mxu0 %v2330_v58  ;;  %v2723_v58 = vpack.c.bf16 %v2679_v52, %v2678_v45  ;;  %v2724_v57 = vpack.c.bf16 %v2681_v18, %v2680_v11  ;;  %v2727_v45 = vpack.c.bf16 %v2687_v22, %v2686_v19  ;;  %v12076_v11 = vld [vmem:[%s15156_s1 + $0x1f8] sm:$0xff]  }
 0x258   : > { %v2690_v18 = vld [vmem:[%s12227_s8 + $0xd7] sm:$0xff]  ;;  %v2699_v22 = vld [vmem:[%s12227_s8 + $0x11f] sm:$0xff] }
 0x259   : > { %v2698_v19 = vld [vmem:[%s12227_s8 + $0x117] sm:$0xff] }
 0x25e   : > { %10457 = vmatmul.mubr.bf16.gmra.mrb[40].mxu0 %v2331_v9  ;;  %v2682_v9 = vld [vmem:[%s12227_s8 + $0x97] sm:$0xff] }
 0x25f   : > { %10460 = vmatprep.mubr.bf16.mxu0 %v2332_v34  ;;  %v2683_v34 = vld [vmem:[%s12227_s8 + $0x9f] sm:$0xff] }
 0x266   : > { %10461 = vmatmul.mubr.bf16.gmra.mrb[44].mxu0 %v2333_v62  ;;  %v12073_v62 = vld [vmem:[%s15156_s1 + $0x1e0] sm:$0xff]  }
 0x267   : > { %10480 = vmatprep.mubr.bf16.mxu0 %v2720_v36  ;;  %v2725_v36 = vpack.c.bf16 %v2683_v34, %v2682_v9 }
 0x26e   : > { %10481 = vmatmul.mubr.bf16.vlgmr.msra.gmra.mrb[0].mxu0 %v2721_v7  ;;  %v2688_v7 = vld [vmem:[%s12227_s8 + $0xc7] sm:$0xff] }
 0x26f   : > { %10529 = vmatpush3.bf16.msra.mxu0 %v12069_v61  ;;  %10484 = vmatprep.mubr.bf16.mxu0 %v2722_v2  ;;  %v12072_v61 = vld [vmem:[%s15156_s1 + $0x1d8] sm:$0xff]   ;;  %v2689_v2 = vld [vmem:[%s12227_s8 + $0xcf] sm:$0xff] }
 0x270   : > { %10530 = vmatprep.subr.bf16.mxu0 %v12070_v23  ;;  %v2728_v52 = vpack.c.bf16 %v2689_v2, %v2688_v7  ;;  %v2700_v7 = vld [vmem:[%s12227_s8 + $0x127] sm:$0xff]  ;;  %v2701_v2 = vld [vmem:[%s12227_s8 + $0x12f] sm:$0xff] }
 0x273   : > { %10531 = vmatpush3.bf16.msra.mxu0 %v12070_v23  ;;  %v12075_v23 = vld [vmem:[%s15156_s1 + $0x1f0] sm:$0xff]  }
 0x274   : > { %10532 = vmatprep.subr.bf16.mxu0 %v12071_v24 }
 0x276   : > { %10485 = vmatmul.mubr.bf16.gmra.mrb[4].mxu0 %v2723_v58  ;;  %v2692_v58 = vld [vmem:[%s12227_s8 + $0xe7] sm:$0xff] }
 0x277   : > { %10488 = vmatprep.mubr.bf16.mxu0 %v2724_v57  ;;  %10533 = vmatpush3.bf16.msra.mxu0 %v12071_v24  ;;  %v2691_v24 = vld [vmem:[%s12227_s8 + $0xdf] sm:$0xff]  ;;  %v2693_v57 = vld [vmem:[%s12227_s8 + $0xef] sm:$0xff] }
 0x278   : > { %10534 = vmatprep.subr.bf16.mxu0 %v12072_v61  ;;  %v2729_v9 = vpack.c.bf16 %v2691_v24, %v2690_v18  ;;  %v2730_v34 = vpack.c.bf16 %v2693_v57, %v2692_v58  ;;  %v2704_v18 = vld [vmem:[%s12227_s8 + $0x147] sm:$0xff]  ;;  %v2705_v24 = vld [vmem:[%s12227_s8 + $0x14f] sm:$0xff] }
 0x279   : > { %v2736_v57 = vpack.c.bf16 %v2705_v24, %v2704_v18  ;;  %v266_v18 = vld [vmem:[%s15160_s5 + $0x28] sm:$0xff]  ;;  %v267_v24 = vld [vmem:[%s15160_s5 + $0x30] sm:$0xff] }
 0x27b   : > { %10535 = vmatpush3.bf16.msra.mxu0 %v12072_v61  ;;  %v13164_v61 = vld [vmem:[%s15156_s1 + $0x200] sm:$0xff]  }
 0x27c   : > { %10536 = vmatprep.subr.bf16.mxu0 %v12073_v62 }
 0x27e   : > { %10489 = vmatmul.mubr.bf16.gmra.mrb[8].mxu0 %v2725_v36  ;;  %v2697_v36 = vld [vmem:[%s12227_s8 + $0x10f] sm:$0xff] }
 0x27f   : > { %10492 = vmatprep.mubr.bf16.mxu0 %v2726_v13  ;;  %10537 = vmatpush3.bf16.msra.mxu0 %v12073_v62  ;;  %v2696_v62 = vld [vmem:[%s12227_s8 + $0x107] sm:$0xff]  ;;  %v2731_v13 = vpack.c.bf16 %v2695_v25, %v2694_v12  ;;  %v2707_v12 = vld [vmem:[%s12227_s8 + $0x15f] sm:$0xff]  ;;  %v12168_v25 = vmov 0  }
 0x280   : > { %10538 = vmatprep.subr.bf16.mxu0 %v12074_v55  ;;  %12011 = vset.pattern.permute.xlu0 %v12168_v25  ;;  %253 = vst [vmem:[#allocation2] sm:$0xff] %v12168_v25  ;;  %254 = vst [vmem:[#allocation2 + $0x8] sm:$0xff] %v12168_v25 }
 0x281   : > { %255 = vst [vmem:[#allocation2 + $0x10] sm:$0xff] %v12168_v25  ;;  %256 = vst [vmem:[#allocation2 + $0xd8] sm:$0xff] %v12168_v25  ;;  %12012 = vset.pattern.permute.xlu1 %v12168_v25 }
 0x282   : > { %257 = vst [vmem:[#allocation2 + $0xe0] sm:$0xff] %v12168_v25 }
 0x283   : > { %10539 = vmatpush3.bf16.msra.mxu0 %v12074_v55  ;;  %v2732_v55 = vpack.c.bf16 %v2697_v36, %v2696_v62  ;;  %v263_v62 = vld [vmem:[%s15160_s5 + $0x10] sm:$0xff]  ;;  %v2708_v36 = vld [vmem:[%s12227_s8 + $0x167] sm:$0xff] }
 0x284   : > { %10540 = vmatprep.subr.bf16.mxu0 %v12075_v23  ;;  %4016 = vperm.xlu1 %12012, %v263_v62   ;;  %v270_v62 = vld [vmem:[%s15160_s5 + $0x48] sm:$0xff] }
 0x286   : > { %10493 = vmatmul.mubr.bf16.gmra.mrb[12].mxu0 %v2727_v45  ;;  %v2734_v45 = vpack.c.bf16 %v2701_v2, %v2700_v7  ;;  %v264_v7 = vld [vmem:[%s15160_s5 + $0x18] sm:$0xff]  ;;  %v265_v2 = vld [vmem:[%s15160_s5 + $0x20] sm:$0xff] }
 0x287   : > { %10496 = vmatprep.mubr.bf16.mxu0 %v2728_v52  ;;  %10541 = vmatpush3.bf16.msra.mxu0 %v12075_v23  ;;  %v2733_v23 = vpack.c.bf16 %v2699_v22, %v2698_v19  ;;  %v2702_v52 = vld [vmem:[%s12227_s8 + $0x137] sm:$0xff] }
 0x288   : > { %10542 = vmatprep.subr.bf16.mxu0 %v12076_v11  ;;  %4021 = vperm.xlu1 %12012, %v264_v7   ;;  %v2718_v7 = vld [vmem:[%s12227_s8 + $0x1b7] sm:$0xff] }
 0x28b   : > { %10543 = vmatpush3.bf16.msra.mxu0 %v12076_v11  ;;  %v2703_v11 = vld [vmem:[%s12227_s8 + $0x13f] sm:$0xff] }
 0x28c   : > { %10592 = vmatprep.subr.bf16.mxu0 %v13164_v61  ;;  %v2735_v58 = vpack.c.bf16 %v2703_v11, %v2702_v52  ;;  %v2712_v52 = vld [vmem:[%s12227_s8 + $0x187] sm:$0xff]  ;;  %v2713_v11 = vld [vmem:[%s12227_s8 + $0x18f] sm:$0xff]  ;;  %4031 = vperm.xlu1 %12012, %v266_v18   ;;  %v3132_v18 = vpack.c.bf16 %v12851_v49, %v12848_v42  ;;  %v3133_v42 = vpack.c.bf16 %v12867_v48, %v12854_v50  ;;  %v284_v50 = vld [vmem:[%s15160_s5 + $0xb8] sm:$0xff] }
 0x28d   : > { %v283_v49 = vld [vmem:[%s15160_s5 + $0xb0] sm:$0xff]  ;;  %v285_v48 = vld [vmem:[%s15160_s5 + $0xc0] sm:$0xff] }
 0x28e   : > { %10497 = vmatmul.mubr.bf16.gmra.mrb[16].mxu0 %v2729_v9  ;;  %v261_v9 = vld [vmem:[%s15160_s5] sm:$0xff] }
 0x28f   : > { %10500 = vmatprep.mubr.bf16.mxu0 %v2730_v34  ;;  %v2706_v34 = vld [vmem:[%s12227_s8 + $0x157] sm:$0xff]  ;;  %4006 = vperm.xlu0 %12011, %v261_v9  }
 0x290   : > { %v2737_v19 = vpack.c.bf16 %v2707_v12, %v2706_v34  ;;  %v268_v9 = vld [vmem:[%s15160_s5 + $0x38] sm:$0xff]  ;;  %v269_v34 = vld [vmem:[%s15160_s5 + $0x40] sm:$0xff]  ;;  %v2717_v12 = vld [vmem:[%s12227_s8 + $0x1af] sm:$0xff] }
 0x291   : > { %4041 = vperm.xlu1 %12012, %v268_v9   ;;  %v12080_v9 = vld [vmem:[%s15156_s1 + $0x218] sm:$0xff]  }
 0x295   : > { %4051 = vperm.xlu1 %12012, %v270_v62   ;;  %v3136_v62 = vpack.c.bf16 %v12895_v43, %v12892_v38  ;;  %v12083_v38 = vld [vmem:[%s15156_s1 + $0x230] sm:$0xff]   ;;  %v290_v43 = vld [vmem:[%s15160_s5 + $0xe8] sm:$0xff] }
 0x296   : > { %10501 = vmatmul.mubr.bf16.gmra.mrb[20].mxu0 %v2731_v13  ;;  %v2709_v13 = vld [vmem:[%s12227_s8 + $0x16f] sm:$0xff] }
 0x297   : > { %10504 = vmatprep.mubr.bf16.mxu0 %v2732_v55  ;;  %v262_v55 = vld [vmem:[%s15160_s5 + $0x8] sm:$0xff]  ;;  %v2738_v22 = vpack.c.bf16 %v2709_v13, %v2708_v36  ;;  %v271_v36 = vld [vmem:[%s15160_s5 + $0x50] sm:$0xff]  ;;  %v2741_v13 = vpack.c.bf16 %v12819_v15, %v12812_v10 }
 0x298   : > { %4011 = vperm.xlu0 %12011, %v262_v55   ;;  %v2742_v55 = vpack.c.bf16 %v2717_v12, %v12822_v16  ;;  %v274_v10 = vld [vmem:[%s15160_s5 + $0x68] sm:$0xff]  ;;  %v275_v15 = vld [vmem:[%s15160_s5 + $0x70] sm:$0xff] }
 0x299   : > { %v287_v12 = vld [vmem:[%s15160_s5 + $0xd0] sm:$0xff] }
 0x29c   : > { %4026 = vperm.xlu0 %12011, %v265_v2   ;;  %v2719_v2 = vld [vmem:[%s12227_s8 + $0x1bf] sm:$0xff] }
 0x29d   : > { %v2743_v16 = vpack.c.bf16 %v2719_v2, %v2718_v7  ;;  %v295_v7 = vld [vmem:[%s15160_s5 + $0x110] sm:$0xff]  ;;  %v3140_v2 = vpack.c.bf16 %v12939_v5, %v12936_v4  ;;  %v3142_v5 = vpack.c.bf16 %v12955_v20, %v12952_v17  ;;  %v3144_v20 = vpack.c.bf16 %v12971_v40, %v12968_v39 }
 0x29e   : > { %10505 = vmatmul.mubr.bf16.gmra.mrb[24].mxu0 %v2733_v23  ;;  %v2710_v23 = vld [vmem:[%s12227_s8 + $0x177] sm:$0xff]  ;;  %v3146_v40 = vpack.c.bf16 %v12987_v31, %v12984_v30 }
 0x29f   : > { %10508 = vmatprep.mubr.bf16.mxu0 %v2734_v45  ;;  %v2711_v45 = vld [vmem:[%s12227_s8 + $0x17f] sm:$0xff]  ;;  %v299_v4 = vld [vmem:[%s15160_s5 + $0x130] sm:$0xff] }
 0x2a0   : > { %4036 = vperm.xlu0 %12011, %v267_v24   ;;  %v12078_v24 = vld [vmem:[%s15156_s1 + $0x208] sm:$0xff]   ;;  %v303_v17 = vld [vmem:[%s15160_s5 + $0x150] sm:$0xff]  ;;  %v15373_v31 = vld [vmem:[#allocation36_spill] sm:$0xff] }
 0x2a1   : > { %v307_v39 = vld [vmem:[%s15160_s5 + $0x170] sm:$0xff] }
 0x2a2   : > { %v12087_v30 = vld [vmem:[%s15158_s3 + $0x50] sm:$0xff]  }
 0x2a4   : > { %4046 = vperm.xlu0 %12011, %v269_v34   ;;  %v3135_v34 = vpack.c.bf16 %v12889_v37, %v12876_v29  ;;  %v288_v29 = vld [vmem:[%s15160_s5 + $0xd8] sm:$0xff]  ;;  %v289_v37 = vld [vmem:[%s15160_s5 + $0xe0] sm:$0xff] }
 0x2a6   : > { %10509 = vmatmul.mubr.bf16.gmra.mrb[28].mxu0 %v2735_v58  ;;  %v2739_v58 = vpack.c.bf16 %v2711_v45, %v2710_v23  ;;  %v3130_v23 = vpack.c.bf16 %v12833_v27, %v12830_v26  ;;  %v276_v45 = vld [vmem:[%s15160_s5 + $0x78] sm:$0xff]  ;;  %v279_v26 = vld [vmem:[%s15160_s5 + $0x90] sm:$0xff]  ;;  %v3131_v27 = vpack.c.bf16 %v12845_v41, %v12836_v28  ;;  %v282_v41 = vld [vmem:[%s15160_s5 + $0xa8] sm:$0xff] }
 0x2a7   : > { %10512 = vmatprep.mubr.bf16.mxu0 %v2736_v57  ;;  %v2740_v57 = vpack.c.bf16 %v2713_v11, %v2712_v52  ;;  %v277_v52 = vld [vmem:[%s15160_s5 + $0x80] sm:$0xff]  ;;  %v278_v11 = vld [vmem:[%s15160_s5 + $0x88] sm:$0xff]  ;;  %v12079_v28 = vld [vmem:[%s15156_s1 + $0x210] sm:$0xff]  }
 0x2a8   : > { %4056 = vperm.xlu0 %12011, %v271_v36   ;;  %v12082_v36 = vld [vmem:[%s15156_s1 + $0x228] sm:$0xff]  }
 0x2ae   : > { %10513 = vmatmul.mubr.bf16.gmra.mrb[32].mxu0 %v2737_v19  ;;  %v272_v19 = vld [vmem:[%s15160_s5 + $0x58] sm:$0xff] }
 0x2af   : > { %10516 = vmatprep.mubr.bf16.mxu0 %v2738_v22  ;;  %v273_v22 = vld [vmem:[%s15160_s5 + $0x60] sm:$0xff]  ;;  %4061 = vperm.xlu1 %12012, %v272_v19   ;;  %v3138_v19 = vpack.c.bf16 %v12917_v59, %v12914_v54  ;;  %v294_v54 = vld [vmem:[%s15160_s5 + $0x108] sm:$0xff]  ;;  %v3139_v59 = vpack.c.bf16 %v12933_v3, %v12920_v60  ;;  %v3141_v3 = vpack.c.bf16 %v12949_v14, %v12942_v8 }
 0x2b0   : > { %4066 = vperm.xlu0 %12011, %v273_v22   ;;  %v12084_v22 = vld [vmem:[%s15156_s1 + $0x238] sm:$0xff]   ;;  %v298_v60 = vld [vmem:[%s15160_s5 + $0x128] sm:$0xff]  ;;  %v3143_v14 = vpack.c.bf16 %v12965_v32, %v12958_v21  ;;  %v3145_v32 = vpack.c.bf16 %v12981_v56, %v12974_v63  ;;  %v3147_v56 = vpack.c.bf16 %v12997_v46, %v12990_v35  ;;  %v15376_v46 = vld [vmem:[#allocation39_spill] sm:$0xff] }
 0x2b1   : > { %v302_v8 = vld [vmem:[%s15160_s5 + $0x148] sm:$0xff] }
 0x2b2   : > { %v306_v21 = vld [vmem:[%s15160_s5 + $0x168] sm:$0xff] }
 0x2b3   : > { %4071 = vperm.xlu1 %12012, %v274_v10   ;;  %v296_v10 = vld [vmem:[%s15160_s5 + $0x118] sm:$0xff]  ;;  %v12086_v63 = vld [vmem:[%s15158_s3 + $0x48] sm:$0xff]  }
 0x2b4   : > { %4076 = vperm.xlu0 %12011, %v275_v15   ;;  %v297_v15 = vld [vmem:[%s15160_s5 + $0x120] sm:$0xff] }
 0x2b6   : > { %10517 = vmatmul.mubr.bf16.gmra.mrb[36].mxu0 %v2739_v58  ;;  %v280_v58 = vld [vmem:[%s15160_s5 + $0x98] sm:$0xff] }
 0x2b7   : > { %10520 = vmatprep.mubr.bf16.mxu0 %v2740_v57  ;;  %4081 = vperm.xlu1 %12012, %v276_v45   ;;  %v281_v57 = vld [vmem:[%s15160_s5 + $0xa0] sm:$0xff]  ;;  %v304_v45 = vld [vmem:[%s15160_s5 + $0x158] sm:$0xff] }
 0x2b8   : > { %4086 = vperm.xlu0 %12011, %v277_v52   ;;  %v305_v52 = vld [vmem:[%s15160_s5 + $0x160] sm:$0xff] }
 0x2bb   : > { %4091 = vperm.xlu1 %12012, %v278_v11   ;;  %v308_v11 = vld [vmem:[%s15160_s5 + $0x178] sm:$0xff] }
 0x2bc   : > { %4096 = vperm.xlu0 %12011, %v279_v26   ;;  %v12085_v26 = vld [vmem:[%s15158_s3 + $0x40] sm:$0xff]  }
 0x2bd   : > { %10656 = vmatprep.subr.bf16.mxu1 %v12085_v26 }
 0x2be   : > { %10521 = vmatmul.mubr.bf16.gmra.mrb[40].mxu0 %v2741_v13  ;;  %v3137_v13 = vpack.c.bf16 %v12911_v53, %v12898_v44  ;;  %v292_v44 = vld [vmem:[%s15160_s5 + $0xf8] sm:$0xff]  ;;  %v293_v53 = vld [vmem:[%s15160_s5 + $0x100] sm:$0xff]  ;;  %10657 = vmatpush3.bf16.msra.mxu1 %v12085_v26 }
 0x2bf   : > { %10524 = vmatprep.mubr.bf16.mxu0 %v2742_v55  ;;  %4101 = vperm.xlu1 %12012, %v280_v58   ;;  %v291_v55 = vld [vmem:[%s15160_s5 + $0xf0] sm:$0xff]  ;;  %v15377_v58 = vld [vmem:[#allocation40_spill] sm:$0xff] }
 0x2c0   : > { %4106 = vperm.xlu0 %12011, %v281_v57   ;;  %10658 = vmatprep.subr.bf16.mxu1 %v12086_v63  ;;  %v3150_v57 = vpack.c.bf16 %v15377_v58, %v15376_v46  ;;  %v3518_v26 = vld [vmem:[%s12227_s8 + $0x119] sm:$0xff]  ;;  %v3525_v46 = vld [vmem:[%s12227_s8 + $0x151] sm:$0xff] }
 0x2c2   : > { %10659 = vmatpush3.bf16.msra.mxu1 %v12086_v63  ;;  %v3519_v63 = vld [vmem:[%s12227_s8 + $0x121] sm:$0xff] }
 0x2c3   : > { %4111 = vperm.xlu1 %12012, %v282_v41   ;;  %10660 = vmatprep.subr.bf16.mxu1 %v12087_v30  ;;  %v15379_v41 = vld [vmem:[#allocation42_spill] sm:$0xff] }
 0x2c4   : > { %4116 = vperm.xlu0 %12011, %v283_v49   ;;  %v15380_v49 = vld [vmem:[#allocation43_spill] sm:$0xff] }
 0x2c6   : > { %10525 = vmatmul.mubr.bf16.gmra.mrb[44].mxu0 %v2743_v16  ;;  %v300_v16 = vld [vmem:[%s15160_s5 + $0x138] sm:$0xff]  ;;  %10661 = vmatpush3.bf16.msra.mxu1 %v12087_v30 }
 0x2c7   : > { %10544 = vmatprep.mubr.bf16.mxu0 %v3130_v23  ;;  %4121 = vperm.xlu1 %12012, %v284_v50   ;;  %v301_v23 = vld [vmem:[%s15160_s5 + $0x140] sm:$0xff]  ;;  %v3521_v30 = vld [vmem:[%s12227_s8 + $0x131] sm:$0xff] }
 0x2c8   : > { %4126 = vperm.xlu0 %12011, %v285_v48   ;;  %v3129_v50 = vld [vmem:[%s12227_s8 + $0x1c0] sm:$0xff]  ;;  %v3492_v48 = vld [vmem:[%s12227_s8 + $0x49] sm:$0xff] }
 0x2cc   : > { %4136 = vperm.xlu0 %12011, %v287_v12   ;;  %v3494_v12 = vld [vmem:[%s12227_s8 + $0x59] sm:$0xff] }
 0x2ce   : > { %10545 = vmatmul.mubr.bf16.vlgmr.msra.gmra.mrb[0].mxu0 %v3131_v27  ;;  %v3148_v27 = vpack.c.bf16 %v15373_v31, %v13000_v51  ;;  %v3127_v51 = vld [vmem:[%s12227_s8 + $0x1b0] sm:$0xff]  ;;  %v3553_v31 = vpack.c.bf16 %v3519_v63, %v3518_v26 }
 0x2cf   : > { %10593 = vmatpush3.bf16.msra.mxu0 %v13164_v61  ;;  %10548 = vmatprep.mubr.bf16.mxu0 %v3132_v18  ;;  %v3134_v61 = vpack.c.bf16 %v12873_v33, %v12870_v47  ;;  %v12081_v47 = vld [vmem:[%s15156_s1 + $0x220] sm:$0xff]   ;;  %v286_v33 = vld [vmem:[%s15160_s5 + $0xc8] sm:$0xff] }
 0x2d0   : > { %10594 = vmatprep.subr.bf16.mxu0 %v12078_v24  ;;  %4131 = vperm.xlu1 %12012, %v286_v33   ;;  %v15374_v18 = vld [vmem:[#allocation37_spill] sm:$0xff] }
 0x2d1   : > { %4146 = vperm.xlu0 %12011, %v289_v37  }
 0x2d3   : > { %10595 = vmatpush3.bf16.msra.mxu0 %v12078_v24  ;;  %v15375_v24 = vld [vmem:[#allocation38_spill] sm:$0xff] }
 0x2d4   : > { %10596 = vmatprep.subr.bf16.mxu0 %v12079_v28  ;;  %4141 = vperm.xlu1 %12012, %v288_v29   ;;  %v3149_v35 = vpack.c.bf16 %v15375_v24, %v15374_v18  ;;  %v3497_v29 = vld [vmem:[%s12227_s8 + $0x71] sm:$0xff]  ;;  %v3522_v18 = vld [vmem:[%s12227_s8 + $0x139] sm:$0xff]  ;;  %v3523_v24 = vld [vmem:[%s12227_s8 + $0x141] sm:$0xff] }
 0x2d5   : > { %4156 = vperm.xlu0 %12011, %v291_v55   ;;  %v3500_v55 = vld [vmem:[%s12227_s8 + $0x89] sm:$0xff]  ;;  %v3555_v58 = vpack.c.bf16 %v3523_v24, %v3522_v18 }
 0x2d6   : > { %10549 = vmatmul.mubr.bf16.gmra.mrb[4].mxu0 %v3133_v42 }
 0x2d7   : > { %10552 = vmatprep.mubr.bf16.mxu0 %v3134_v61  ;;  %10597 = vmatpush3.bf16.msra.mxu0 %v12079_v28  ;;  %v15378_v28 = vld [vmem:[#allocation41_spill] sm:$0xff]  ;;  %v3152_v61 = vpack.c.bf16 %v3127_v51, %v15380_v49 }
 0x2d8   : > { %10598 = vmatprep.subr.bf16.mxu0 %v12080_v9  ;;  %4151 = vperm.xlu1 %12012, %v290_v43   ;;  %v3151_v42 = vpack.c.bf16 %v15379_v41, %v15378_v28  ;;  %v3498_v43 = vld [vmem:[%s12227_s8 + $0x79] sm:$0xff]  ;;  %v3527_v28 = vld [vmem:[%s12227_s8 + $0x161] sm:$0xff]  ;;  %v3528_v41 = vld [vmem:[%s12227_s8 + $0x169] sm:$0xff] }
 0x2d9   : > { %4166 = vperm.xlu0 %12011, %v293_v53   ;;  %v3502_v53 = vld [vmem:[%s12227_s8 + $0x99] sm:$0xff] }
 0x2da   : > { %v3526_v51 = vld [vmem:[%s12227_s8 + $0x159] sm:$0xff] }
 0x2db   : > { %10599 = vmatpush3.bf16.msra.mxu0 %v12080_v9  ;;  %v3128_v9 = vld [vmem:[%s12227_s8 + $0x1b8] sm:$0xff]  ;;  %v3557_v49 = vpack.c.bf16 %v3527_v28, %v3526_v51 }
 0x2dc   : > { %10600 = vmatprep.subr.bf16.mxu0 %v12081_v47  ;;  %4161 = vperm.xlu1 %12012, %v292_v44   ;;  %v3153_v33 = vpack.c.bf16 %v3129_v50, %v3128_v9  ;;  %v3530_v9 = vld [vmem:[%s12227_s8 + $0x179] sm:$0xff]  ;;  %v3531_v50 = vld [vmem:[%s12227_s8 + $0x181] sm:$0xff] }
 0x2dd   : > { %4176 = vperm.xlu0 %12011, %v295_v7   ;;  %v3505_v7 = vld [vmem:[%s12227_s8 + $0xb1] sm:$0xff] }
 0x2de   : > { %10553 = vmatmul.mubr.bf16.gmra.mrb[8].mxu0 %v3135_v34 }
 0x2df   : > { %10556 = vmatprep.mubr.bf16.mxu0 %v3136_v62  ;;  %10601 = vmatpush3.bf16.msra.mxu0 %v12081_v47  ;;  %v3493_v47 = vld [vmem:[%s12227_s8 + $0x51] sm:$0xff]  ;;  %v3495_v62 = vld [vmem:[%s12227_s8 + $0x61] sm:$0xff] }
 0x2e0   : > { %10602 = vmatprep.subr.bf16.mxu0 %v12082_v36  ;;  %4171 = vperm.xlu1 %12012, %v294_v54   ;;  %v3540_v34 = vpack.c.bf16 %v3493_v47, %v3492_v48  ;;  %v3541_v37 = vpack.c.bf16 %v3495_v62, %v3494_v12  ;;  %v3503_v54 = vld [vmem:[%s12227_s8 + $0xa1] sm:$0xff]  ;;  %v3532_v48 = vld [vmem:[%s12227_s8 + $0x189] sm:$0xff]  ;;  %v3533_v47 = vld [vmem:[%s12227_s8 + $0x191] sm:$0xff]  ;;  %v3561_v62 = vpack.c.bf16 %v13111_v0, %v13104_v1 }
 0x2e1   : > { %4186 = vperm.xlu0 %12011, %v297_v15   ;;  %v3506_v15 = vld [vmem:[%s12227_s8 + $0xb9] sm:$0xff]  ;;  %v3537_v12 = vld [vmem:[%s12227_s8 + $0x1b1] sm:$0xff]  ;;  %v12090_v1 = vld [vmem:[%s15158_s3 + $0x68] sm:$0xff]  }
 0x2e2   : > { %v12091_v0 = vld [vmem:[%s15158_s3 + $0x70] sm:$0xff]  }
 0x2e3   : > { %10603 = vmatpush3.bf16.msra.mxu0 %v12082_v36  ;;  %v3496_v36 = vld [vmem:[%s12227_s8 + $0x69] sm:$0xff] }
 0x2e4   : > { %10604 = vmatprep.subr.bf16.mxu0 %v12083_v38  ;;  %4181 = vperm.xlu1 %12012, %v296_v10  }
 0x2e5   : > { %4196 = vperm.xlu0 %12011, %v299_v4   ;;  %v3509_v4 = vld [vmem:[%s12227_s8 + $0xd1] sm:$0xff] }
 0x2e6   : > { %10557 = vmatmul.mubr.bf16.gmra.mrb[12].mxu0 %v3137_v13  ;;  %v3499_v13 = vld [vmem:[%s12227_s8 + $0x81] sm:$0xff] }
 0x2e7   : > { %10560 = vmatprep.mubr.bf16.mxu0 %v3138_v19  ;;  %10605 = vmatpush3.bf16.msra.mxu0 %v12083_v38  ;;  %v3542_v38 = vpack.c.bf16 %v3497_v29, %v3496_v36  ;;  %v3501_v19 = vld [vmem:[%s12227_s8 + $0x91] sm:$0xff]  ;;  %v3562_v29 = vpack.c.bf16 %v3537_v12, %v13114_v6 }
 0x2e8   : > { %10606 = vmatprep.subr.bf16.mxu0 %v12084_v22  ;;  %4191 = vperm.xlu1 %12012, %v298_v60   ;;  %v3544_v44 = vpack.c.bf16 %v3501_v19, %v3500_v55  ;;  %v3507_v60 = vld [vmem:[%s12227_s8 + $0xc1] sm:$0xff]  ;;  %v12088_v36 = vld [vmem:[%s15158_s3 + $0x58] sm:$0xff]   ;;  %v4381_v55 = vld [vmem:[#allocation2 + $0x8] sm:$0xf0] }
 0x2e9   : > { %4206 = vperm.xlu0 %12011, %v301_v23   ;;  %v3510_v23 = vld [vmem:[%s12227_s8 + $0xd9] sm:$0xff]  ;;  %10662 = vmatprep.subr.bf16.mxu1 %v12088_v36  ;;  %v4425_v19 = vrot.slane %v4381_v55, 4 }
 0x2ea   : > { %10663 = vmatpush3.bf16.msra.mxu1 %v12088_v36  ;;  %v12092_v6 = vld [vmem:[%s15158_s3 + $0x78] sm:$0xff]  }
 0x2eb   : > { %10607 = vmatpush3.bf16.msra.mxu0 %v12084_v22  ;;  %v3543_v22 = vpack.c.bf16 %v3499_v13, %v3498_v43  ;;  %v3539_v43 = vld [vmem:[%s12227_s8 + $0x1c1] sm:$0xff] }
 0x2ec   : > { %4201 = vperm.xlu1 %12012, %v300_v16  }
 0x2ed   : > { %4216 = vperm.xlu0 %12011, %v303_v17   ;;  %v3513_v17 = vld [vmem:[%s12227_s8 + $0xf1] sm:$0xff] }
 0x2ee   : > { %10561 = vmatmul.mubr.bf16.gmra.mrb[16].mxu0 %v3139_v59  ;;  %v3504_v59 = vld [vmem:[%s12227_s8 + $0xa9] sm:$0xff] }
 0x2ef   : > { %10564 = vmatprep.mubr.bf16.mxu0 %v3140_v2  ;;  %v3545_v2 = vpack.c.bf16 %v3503_v54, %v3502_v53  ;;  %v3546_v10 = vpack.c.bf16 %v3505_v7, %v3504_v59  ;;  %v5321_v53 = vrot.slane %v12168_v25, 5  ;;  %v13498_v59 = vld [vmem:[%s15158_s3] sm:$0xff]  }
 0x2f0   : > { %4211 = vperm.xlu1 %12012, %v302_v8   ;;  %v3511_v8 = vld [vmem:[%s12227_s8 + $0xe1] sm:$0xff] }
 0x2f1   : > { %4226 = vperm.xlu0 %12011, %v305_v52   ;;  %v3514_v52 = vld [vmem:[%s12227_s8 + $0xf9] sm:$0xff] }
 0x2f4   : > { %4221 = vperm.xlu1 %12012, %v304_v45  }
 0x2f5   : > { %4236 = vperm.xlu0 %12011, %v307_v39   ;;  %v3517_v39 = vld [vmem:[%s12227_s8 + $0x111] sm:$0xff] }
 0x2f6   : > { %10565 = vmatmul.mubr.bf16.gmra.mrb[20].mxu0 %v3141_v3  ;;  %v3508_v3 = vld [vmem:[%s12227_s8 + $0xc9] sm:$0xff] }
 0x2f7   : > { %10568 = vmatprep.mubr.bf16.mxu0 %v3142_v5  ;;  %v3547_v5 = vpack.c.bf16 %v3507_v60, %v3506_v15  ;;  %v3548_v16 = vpack.c.bf16 %v3509_v4, %v3508_v3 }
 0x2f8   : > { %4231 = vperm.xlu1 %12012, %v306_v21   ;;  %v3515_v21 = vld [vmem:[%s12227_s8 + $0x101] sm:$0xff] }
 0x2fc   : > { %4241 = vperm.xlu1 %12012, %v308_v11  }
 0x2fe   : > { %10569 = vmatmul.mubr.bf16.gmra.mrb[24].mxu0 %v3143_v14  ;;  %v3512_v14 = vld [vmem:[%s12227_s8 + $0xe9] sm:$0xff] }
 0x2ff   : > { %10572 = vmatprep.mubr.bf16.mxu0 %v3144_v20  ;;  %v3549_v20 = vpack.c.bf16 %v3511_v8, %v3510_v23  ;;  %v3550_v45 = vpack.c.bf16 %v3513_v17, %v3512_v14 }
 0x306   : > { %10573 = vmatmul.mubr.bf16.gmra.mrb[28].mxu0 %v3145_v32  ;;  %v3516_v32 = vld [vmem:[%s12227_s8 + $0x109] sm:$0xff] }
 0x307   : > { %10576 = vmatprep.mubr.bf16.mxu0 %v3146_v40  ;;  %v3551_v40 = vpack.c.bf16 %v3515_v21, %v3514_v52  ;;  %v3552_v11 = vpack.c.bf16 %v3517_v39, %v3516_v32  ;;  %v13524_v21 = vld [vmem:[%s15157_s2] ss:$0 sm:$0xff] }
 0x30e   : > { %10577 = vmatmul.mubr.bf16.gmra.mrb[32].mxu0 %v3147_v56  ;;  %v3520_v56 = vld [vmem:[%s12227_s8 + $0x129] sm:$0xff]  ;;  %v4007_v7 = vpop.permute.xlu0 %4006 }
 0x30f   : > { %10580 = vmatprep.mubr.bf16.mxu0 %v3148_v27  ;;  %v3554_v27 = vpack.c.bf16 %v3521_v30, %v3520_v56 }
 0x316   : > { %10581 = vmatmul.mubr.bf16.gmra.mrb[36].mxu0 %v3149_v35  ;;  %v3524_v35 = vld [vmem:[%s12227_s8 + $0x149] sm:$0xff] }
 0x317   : > { %10584 = vmatprep.mubr.bf16.mxu0 %v3150_v57  ;;  %v3556_v57 = vpack.c.bf16 %v3525_v46, %v3524_v35 }
 0x31e   : > { %10585 = vmatmul.mubr.bf16.gmra.mrb[40].mxu0 %v3151_v42  ;;  %v3529_v42 = vld [vmem:[%s12227_s8 + $0x171] sm:$0xff] }
 0x31f   : > { %10588 = vmatprep.mubr.bf16.mxu0 %v3152_v61  ;;  %v3558_v61 = vpack.c.bf16 %v3529_v42, %v3528_v41 }
 0x326   : > { %10589 = vmatmul.mubr.bf16.gmra.mrb[44].mxu0 %v3153_v33  ;;  %v3559_v33 = vpack.c.bf16 %v3531_v50, %v3530_v9 }
 0x327   : > { %10608 = vmatprep.mubr.bf16.mxu0 %v3540_v34  ;;  %v3560_v34 = vpack.c.bf16 %v3533_v47, %v3532_v48 }
 0x32e   : > { %10609 = vmatmul.mubr.bf16.vlgmr.msra.gmra.mrb[0].mxu0 %v3541_v37  ;;  %v12089_v37 = vld [vmem:[%s15158_s3 + $0x60] sm:$0xff]  }
 0x32f   : > { %10612 = vmatprep.mubr.bf16.mxu0 %v3542_v38  ;;  %v3538_v38 = vld [vmem:[%s12227_s8 + $0x1b9] sm:$0xff]  ;;  %10664 = vmatprep.subr.bf16.mxu1 %v12089_v37 }
 0x330   : > { %10665 = vmatpush3.bf16.msra.mxu1 %v12089_v37  ;;  %v3563_v13 = vpack.c.bf16 %v3539_v43, %v3538_v38 }
 0x331   : > { %10666 = vmatprep.subr.bf16.mxu1 %v12090_v1 }
 0x334   : > { %10667 = vmatpush3.bf16.msra.mxu1 %v12090_v1 }
 0x335   : > { %10668 = vmatprep.subr.bf16.mxu1 %v12091_v0 }
 0x336   : > { %10613 = vmatmul.mubr.bf16.gmra.mrb[4].mxu0 %v3543_v22  ;;  %v13487_v22 = vrot.slane %v12168_v25, 4 }
 0x337   : > { %10616 = vmatprep.mubr.bf16.mxu0 %v3544_v44 }
 0x338   : > { %10669 = vmatpush3.bf16.msra.mxu1 %v12091_v0  ;;  %v4427_v44 = vsel %vm4424_vm0, %v4425_v19, %v13487_v22  ;;  %v13493_v54 = vor.u32 %v5321_v53, %v13487_v22  ;;  %v12094_v19 = vld [vmem:[%s15158_s3 + $0x8] sm:$0xff]  }
 0x339   : > { %10670 = vmatprep.subr.bf16.mxu1 %v12092_v6  ;;  %10672 = vmatprep.mubr.bf16.mxu1 %v4427_v44 }
 0x33a   : > { %15381 = vst [vmem:[#allocation3_spill] sm:$0xff] %v13493_v54 }
 0x33c   : > { %10671 = vmatpush3.bf16.msra.mxu1 %v12092_v6 }
 0x33d   : > { %10720 = vmatprep.subr.bf16.mxu1 %v13498_v59 }
 0x33e   : > { %10617 = vmatmul.mubr.bf16.gmra.mrb[8].mxu0 %v3545_v2  ;;  %v4017_v2 = vpop.permute.xlu1 %4016 }
 0x33f   : > { %10620 = vmatprep.mubr.bf16.mxu0 %v3546_v10  ;;  %v4012_v10 = vpop.permute.xlu0 %4011 }
 0x342   : > { %v4022_v15 = vpop.permute.xlu1 %4021 }
 0x343   : > { %v13501_v60 = vpop.permute.xlu0 %4026 }
 0x346   : > { %10621 = vmatmul.mubr.bf16.gmra.mrb[12].mxu0 %v3547_v5  ;;  %v13503_v3 = vpop.permute.xlu1 %4031 }
 0x347   : > { %10624 = vmatprep.mubr.bf16.mxu0 %v3548_v16  ;;  %v4037_v4 = vpop.permute.xlu0 %4036 }
 0x34a   : > { %v4042_v5 = vpop.permute.xlu1 %4041 }
 0x34b   : > { %v13505_v16 = vpop.permute.xlu0 %4046 }
 0x34e   : > { %10625 = vmatmul.mubr.bf16.gmra.mrb[16].mxu0 %v3549_v20  ;;  %v13507_v23 = vpop.permute.xlu1 %4051 }
 0x34f   : > { %10628 = vmatprep.mubr.bf16.mxu0 %v3550_v45  ;;  %v13509_v8 = vpop.permute.xlu0 %4056 }
 0x352   : > { %v13511_v14 = vpop.permute.xlu1 %4061 }
 0x353   : > { %v13513_v17 = vpop.permute.xlu0 %4066 }
 0x356   : > { %10629 = vmatmul.mubr.bf16.gmra.mrb[20].mxu0 %v3551_v40  ;;  %v13515_v20 = vpop.permute.xlu1 %4071 }
 0x357   : > { %10632 = vmatprep.mubr.bf16.mxu0 %v3552_v11  ;;  %v13517_v45 = vpop.permute.xlu0 %4076 }
 0x35a   : > { %v13519_v52 = vpop.permute.xlu1 %4081 }
 0x35b   : > { %v13528_v63 = vpop.permute.xlu0 %4086 }
 0x35e   : > { %10633 = vmatmul.mubr.bf16.gmra.mrb[24].mxu0 %v3553_v31 }
 0x35f   : > { %10636 = vmatprep.mubr.bf16.mxu0 %v3554_v27  ;;  %v13531_v27 = vpop.permute.xlu1 %4091 }
 0x363   : > { %v13540_v48 = vpop.permute.xlu1 %4101 }
 0x366   : > { %10637 = vmatmul.mubr.bf16.gmra.mrb[28].mxu0 %v3555_v58  ;;  %v4783_v58 = vrot.slane %v12168_v25, 3 }
 0x367   : > { %10640 = vmatprep.mubr.bf16.mxu0 %v3556_v57 }
 0x368   : > { %v13544_v25 = vor.u32 %v4783_v58, %v13487_v22 }
 0x36e   : > { %10641 = vmatmul.mubr.bf16.gmra.mrb[32].mxu0 %v3557_v49  ;;  %v13535_v49 = vpop.permute.xlu0 %4096 }
 0x36f   : > { %10644 = vmatprep.mubr.bf16.mxu0 %v3558_v61 }
 0x376   : > { %10645 = vmatmul.mubr.bf16.gmra.mrb[36].mxu0 %v3559_v33 }
 0x377   : > { %10648 = vmatprep.mubr.bf16.mxu0 %v3560_v34 }
 0x37e   : > { %10649 = vmatmul.mubr.bf16.gmra.mrb[40].mxu0 %v3561_v62 }
 0x37f   : > { %10652 = vmatprep.mubr.bf16.mxu0 %v3562_v29 }
 0x386   : > { %10653 = vmatmul.mubr.bf16.gmra.mrb[44].mxu0 %v3563_v13 }
 0x401   : > { %v10610_v32 = vpop.f32.mrb[0].mxu0 }
 0x402   : > { %v3910_v39 = vadd.f32 %v10610_v32, %v13524_v21  ;;  %v3663_v40 = vpop.f32.mrb[1].mxu0 }
 0x403   : > { %v3908_v11 = vadd.f32 %v13524_v21, %v3663_v40  ;;  %v10611_v26 = vpop.f32.mrb[2].mxu0  ;;  %v13562_v40 = vpop.permute.xlu1 %4111 }
 0x404   : > { %v3958_v56 = vmax.f32 %v3910_v39, 0.0  ;;  %v3911_v30 = vadd.f32 %v10611_v26, %v13524_v21  ;;  %v3666_v31 = vpop.f32.mrb[3].mxu0 }
 0x405   : > { %v3956_v18 = vmax.f32 %v3908_v11, 0.0  ;;  %v3909_v24 = vadd.f32 %v13524_v21, %v3666_v31 }
 0x406   : > { %v3959_v35 = vmax.f32 %v3911_v30, 0.0  ;;  %v4246_v57 = vmul.f32 %v4017_v2, %v3958_v56 }
 0x407   : > { %v3957_v46 = vmax.f32 %v3909_v24, 0.0  ;;  %v4244_v28 = vmul.f32 %v4007_v7, %v3956_v18  ;;  %v12095_v24 = vld [vmem:[%s15158_s3 + $0x10] sm:$0xff]  }
 0x408   : > { %v4247_v51 = vmul.f32 %v4022_v15, %v3959_v35 }
 0x409   : > { %v4245_v41 = vmul.f32 %v4012_v10, %v3957_v46  ;;  %v10614_v42 = vpop.f32.mrb[4].mxu0  ;;  %v13559_v10 = vpop.permute.xlu0 %4106 }
 0x40a   : > { %v13537_v61 = vpack.c.bf16 %v4247_v51, %v4246_v57  ;;  %v3914_v9 = vadd.f32 %v10614_v42, %v13524_v21  ;;  %v3679_v50 = vpop.f32.mrb[5].mxu0 }
 0x40b   : > { %v4292_v47 = vpack.c.bf16 %v4245_v41, %v4244_v28  ;;  %v3912_v33 = vadd.f32 %v13524_v21, %v3679_v50  ;;  %v10615_v34 = vpop.f32.mrb[6].mxu0 }
 0x40c   : > { %4317 = vst [vmem:[#allocation2 + $0x20] sm:$0xff] %v13537_v61  ;;  %v3962_v12 = vmax.f32 %v3914_v9, 0.0  ;;  %v3915_v62 = vadd.f32 %v10615_v34, %v13524_v21  ;;  %v3682_v36 = vpop.f32.mrb[7].mxu0  ;;  %v4430_v29 = vrot.slane %v13537_v61, 4  ;;  %v4799_v37 = vshrl.u32 %v13537_v61, 16 }
 0x40d   : > { %4316 = vst [vmem:[#allocation2 + $0x18] sm:$0xff] %v4292_v47  ;;  %v3960_v38 = vmax.f32 %v3912_v33, 0.0  ;;  %v3913_v43 = vadd.f32 %v13524_v21, %v3682_v36  ;;  %v4428_v13 = vrot.slane %v4292_v47, 4  ;;  %v4790_v1 = vshrl.u32 %v4292_v47, 16 }
 0x40e   : > { %v4250_v0 = vmul.f32 %v4037_v4, %v3962_v12  ;;  %v3963_v6 = vmax.f32 %v3915_v62, 0.0  ;;  %v4793_v55 = vshll.u32 %v4292_v47, 16  ;;  %v4801_v2 = vrot.slane %v4799_v37, 3  ;;  %v13586_v12 = vpop.permute.xlu0 %4116 }
 0x40f   : > { %v3961_v44 = vmax.f32 %v3913_v43, 0.0  ;;  %v4429_v53 = vsel %vm4424_vm0, %v13487_v22, %v4428_v13  ;;  %v4431_v7 = vsel %vm4424_vm0, %v4428_v13, %v4430_v29  ;;  %v4792_v4 = vrot.slane %v4790_v1, 3  ;;  %v13594_v13 = vpop.permute.xlu1 %4121 }
 0x410   : > { %v4251_v15 = vmul.f32 %v4042_v5, %v3963_v6  ;;  %10673 = vmatmul.mubr.bf16.vlgmr.msra.gmra.mrb[0].mxu1 %v4429_v53  ;;  %v4795_v32 = vrot.slane %v4793_v55, 4  ;;  %v4802_v39 = vshll.u32 %v13537_v61, 16  ;;  %v4248_v11 = vmul.f32 %v13501_v60, %v3960_v38 }
 0x411   : > { %v4249_v26 = vmul.f32 %v13503_v3, %v3961_v44  ;;  %v10618_v22 = vpop.f32.mrb[8].mxu0  ;;  %10676 = vmatprep.mubr.bf16.mxu1 %v4431_v7  ;;  %10721 = vmatpush3.bf16.msra.mxu1 %v13498_v59  ;;  %v5324_v56 = vrot.slane %v4790_v1, 4  ;;  %v5325_v30 = vrot.slane %v4793_v55, 5  ;;  %v5328_v60 = vrot.slane %v4799_v37, 4  ;;  %v12096_v37 = vld [vmem:[%s15158_s3 + $0x18] sm:$0xff]  }
 0x412   : > { %v13567_v31 = vpack.c.bf16 %v4251_v15, %v4250_v0  ;;  %v3918_v5 = vadd.f32 %v10618_v22, %v13524_v21  ;;  %v3695_v18 = vpop.f32.mrb[9].mxu0  ;;  %10722 = vmatprep.subr.bf16.mxu1 %v12094_v19  ;;  %v4804_v35 = vrot.slane %v4802_v39, 4  ;;  %v13576_v59 = vor.u32 %v4795_v32, %v4792_v4 }
 0x413   : > { %v13573_v46 = vpack.c.bf16 %v4249_v26, %v4248_v11  ;;  %v3916_v3 = vadd.f32 %v13524_v21, %v3695_v18  ;;  %v10619_v58 = vpop.f32.mrb[10].mxu0  ;;  %v13578_v57 = vor.u32 %v5325_v30, %v5324_v56  ;;  %v5329_v9 = vrot.slane %v4802_v39, 5 }
 0x414   : > { %4319 = vst [vmem:[#allocation2 + $0x30] sm:$0xff] %v13567_v31  ;;  %v3966_v51 = vmax.f32 %v3918_v5, 0.0  ;;  %v3919_v28 = vadd.f32 %v10619_v58, %v13524_v21  ;;  %v3698_v41 = vpop.f32.mrb[11].mxu0  ;;  %v4434_v42 = vrot.slane %v13567_v31, 4  ;;  %v4805_v34 = vor.u32 %v4804_v35, %v4801_v2  ;;  %v13635_v5 = vpop.permute.xlu0 %4126 }
 0x415   : > { %4318 = vst [vmem:[#allocation2 + $0x28] sm:$0xff] %v13573_v46  ;;  %v3964_v50 = vmax.f32 %v3916_v3, 0.0  ;;  %v3917_v47 = vadd.f32 %v13524_v21, %v3698_v41  ;;  %v4432_v33 = vrot.slane %v13573_v46, 4  ;;  %10723 = vmatpush3.bf16.msra.mxu1 %v12094_v19  ;;  %v4808_v38 = vshrl.u32 %v13573_v46, 16  ;;  %v13643_v58 = vpop.permute.xlu1 %4131 }
 0x416   : > { %v4254_v62 = vmul.f32 %v13509_v8, %v3966_v51  ;;  %v3967_v36 = vmax.f32 %v3919_v28, 0.0  ;;  %10724 = vmatprep.subr.bf16.mxu1 %v12095_v24  ;;  %v4811_v43 = vshll.u32 %v13573_v46, 16  ;;  %v13606_v19 = vsel %vm4771_vm1, %v13576_v59, %v4805_v34 }
 0x417   : > { %v4252_v1 = vmul.f32 %v13505_v16, %v3964_v50  ;;  %v3965_v0 = vmax.f32 %v3917_v47, 0.0  ;;  %v4433_v6 = vsel %vm4424_vm0, %v4430_v29, %v4432_v33  ;;  %v4435_v8 = vsel %vm4424_vm0, %v4432_v33, %v4434_v42  ;;  %v12098_v33 = vld [vmem:[%s15158_s3 + $0x28] sm:$0xff]  }
 0x418   : > { %v4255_v55 = vmul.f32 %v13511_v14, %v3967_v36  ;;  %10677 = vmatmul.mubr.bf16.gmra.mrb[4].mxu1 %v4433_v6  ;;  %v4810_v44 = vrot.slane %v4808_v38, 3  ;;  %v4813_v16 = vrot.slane %v4811_v43, 4  ;;  %v4817_v53 = vshrl.u32 %v13567_v31, 16 }
 0x419   : > { %v4253_v61 = vmul.f32 %v13507_v23, %v3965_v0  ;;  %v10622_v29 = vpop.f32.mrb[12].mxu0  ;;  %10680 = vmatprep.mubr.bf16.mxu1 %v4435_v8  ;;  %10725 = vmatpush3.bf16.msra.mxu1 %v12095_v24  ;;  %v4820_v14 = vshll.u32 %v13567_v31, 16  ;;  %v13618_v7 = vsel %vm5311_vm2, %v13493_v54, %v13578_v57  ;;  %v12097_v23 = vld [vmem:[%s15158_s3 + $0x20] sm:$0xff]   ;;  %v13626_v39 = vor.u32 %v5329_v9, %v5328_v60 }
 0x41a   : > { %15382 = vst [vmem:[#allocation4_spill] sm:$0xff] %v13618_v7  ;;  %v13620_v2 = vpack.c.bf16 %v4255_v55, %v4254_v62  ;;  %v3922_v15 = vadd.f32 %v10622_v29, %v13524_v21  ;;  %v3711_v4 = vpop.f32.mrb[13].mxu0  ;;  %10726 = vmatprep.subr.bf16.mxu1 %v12096_v37  ;;  %v4814_v32 = vor.u32 %v4813_v16, %v4810_v44  ;;  %v4819_v56 = vrot.slane %v4817_v53, 3 }
 0x41b   : > { %v13628_v11 = vpack.c.bf16 %v4253_v61, %v4252_v1  ;;  %v3920_v26 = vadd.f32 %v13524_v21, %v3711_v4  ;;  %v10623_v22 = vpop.f32.mrb[14].mxu0  ;;  %v4822_v30 = vrot.slane %v4820_v14, 4  ;;  %v13677_v61 = vpop.permute.xlu0 %4136 }
 0x41c   : > { %4321 = vst [vmem:[#allocation2 + $0x40] sm:$0xff] %v13620_v2  ;;  %v3970_v18 = vmax.f32 %v3922_v15, 0.0  ;;  %v3923_v24 = vadd.f32 %v10623_v22, %v13524_v21  ;;  %v3714_v35 = vpop.f32.mrb[15].mxu0  ;;  %v4438_v60 = vrot.slane %v13620_v2, 4  ;;  %v13641_v3 = vsel %vm4771_vm1, %v4805_v34, %v4814_v32 }
 0x41d   : > { %4320 = vst [vmem:[#allocation2 + $0x38] sm:$0xff] %v13628_v11  ;;  %v3968_v51 = vmax.f32 %v3920_v26, 0.0  ;;  %v3921_v28 = vadd.f32 %v13524_v21, %v3714_v35  ;;  %v4436_v41 = vrot.slane %v13628_v11, 4  ;;  %10727 = vmatpush3.bf16.msra.mxu1 %v12096_v37  ;;  %v4823_v9 = vor.u32 %v4822_v30, %v4819_v56  ;;  %v13689_v26 = vpop.permute.xlu1 %4141 }
 0x41e   : > { %v4258_v50 = vmul.f32 %v13517_v45, %v3970_v18  ;;  %v3971_v47 = vmax.f32 %v3923_v24, 0.0  ;;  %10728 = vmatprep.subr.bf16.mxu1 %v12097_v23  ;;  %v15222_v34 = vshrl.u32 %v13628_v11, 16  ;;  %v15221_v62 = vshll.u32 %v13628_v11, 16 }
 0x41f   : > { %v4256_v36 = vmul.f32 %v13513_v17, %v3968_v51  ;;  %v3969_v1 = vmax.f32 %v3921_v28, 0.0  ;;  %v4437_v37 = vsel %vm4424_vm0, %v4434_v42, %v4436_v41  ;;  %v4439_v45 = vsel %vm4424_vm0, %v4436_v41, %v4438_v60 }
 0x420   : > { %v4259_v0 = vmul.f32 %v13519_v52, %v3971_v47  ;;  %10681 = vmatmul.mubr.bf16.gmra.mrb[8].mxu1 %v4437_v37  ;;  %v13663_v6 = vsel %vm4771_vm1, %v4814_v32, %v4823_v9  ;;  %v4828_v8 = vrot.slane %v15222_v34, 3  ;;  %v4831_v17 = vrot.slane %v15221_v62, 4 }
 0x421   : > { %v4257_v55 = vmul.f32 %v13515_v20, %v3969_v1  ;;  %v10626_v44 = vpop.f32.mrb[16].mxu0  ;;  %10684 = vmatprep.mubr.bf16.mxu1 %v4439_v45  ;;  %10729 = vmatpush3.bf16.msra.mxu1 %v12097_v23  ;;  %v15220_v42 = vshrl.u32 %v13620_v2, 16  ;;  %v15219_v16 = vshll.u32 %v13620_v2, 16  ;;  %v13675_v52 = vsel %vm5311_vm2, %v13578_v57, %v13626_v39  ;;  %v12099_v20 = vld [vmem:[%s15158_s3 + $0x30] sm:$0xff]   ;;  %v12100_v45 = vld [vmem:[%s15158_s3 + $0x38] sm:$0xff]  }
 0x422   : > { %15383 = vst [vmem:[#allocation5_spill] sm:$0xff] %v13675_v52  ;;  %v13679_v29 = vpack.c.bf16 %v4259_v0, %v4258_v50  ;;  %v3926_v15 = vadd.f32 %v10626_v44, %v13524_v21  ;;  %v3727_v4 = vpop.f32.mrb[17].mxu0  ;;  %10730 = vmatprep.subr.bf16.mxu1 %v12098_v33  ;;  %v4832_v23 = vor.u32 %v4831_v17, %v4828_v8  ;;  %v13687_v32 = vrot.slane %v4808_v38, 4 }
 0x423   : > { %v13691_v57 = vpack.c.bf16 %v4257_v55, %v4256_v36  ;;  %v3924_v22 = vadd.f32 %v13524_v21, %v3727_v4  ;;  %v10627_v56 = vpop.f32.mrb[18].mxu0  ;;  %v4837_v30 = vrot.slane %v15220_v42, 3  ;;  %v4840_v18 = vrot.slane %v15219_v16, 4  ;;  %v13720_v55 = vpop.permute.xlu0 %4146 }
 0x424   : > { %4323 = vst [vmem:[#allocation2 + $0x50] sm:$0xff] %v13679_v29  ;;  %v3974_v24 = vmax.f32 %v3926_v15, 0.0  ;;  %v3927_v35 = vadd.f32 %v10627_v56, %v13524_v21  ;;  %v3730_v38 = vpop.f32.mrb[19].mxu0  ;;  %v4442_v51 = vrot.slane %v13679_v29, 4  ;;  %v13702_v28 = vsel %vm4771_vm1, %v4823_v9, %v4832_v23 }
 0x425   : > { %4322 = vst [vmem:[#allocation2 + $0x48] sm:$0xff] %v13691_v57  ;;  %v3972_v41 = vmax.f32 %v3924_v22, 0.0  ;;  %v3925_v50 = vadd.f32 %v13524_v21, %v3730_v38  ;;  %v4440_v47 = vrot.slane %v13691_v57, 4  ;;  %10731 = vmatpush3.bf16.msra.mxu1 %v12098_v33  ;;  %v4841_v36 = vor.u32 %v4840_v18, %v4837_v30  ;;  %v13730_v22 = vpop.permute.xlu1 %4151 }
 0x426   : > { %v4262_v1 = vmul.f32 %v13535_v49, %v3974_v24  ;;  %v3975_v37 = vmax.f32 %v3927_v35, 0.0  ;;  %10732 = vmatprep.subr.bf16.mxu1 %v12099_v20  ;;  %v15216_v9 = vshrl.u32 %v13691_v57, 16  ;;  %v15213_v0 = vshll.u32 %v13691_v57, 16 }
 0x427   : > { %v4260_v8 = vmul.f32 %v13528_v63, %v3972_v41  ;;  %v3973_v17 = vmax.f32 %v3925_v50, 0.0  ;;  %v4441_v33 = vsel %vm4424_vm0, %v4438_v60, %v4440_v47  ;;  %v4443_v49 = vsel %vm4424_vm0, %v4440_v47, %v4442_v51 }
 0x428   : > { %v4263_v44 = vmul.f32 %v13540_v48, %v3975_v37  ;;  %10685 = vmatmul.mubr.bf16.gmra.mrb[12].mxu1 %v4441_v33  ;;  %v13724_v15 = vsel %vm4771_vm1, %v4832_v23, %v4841_v36  ;;  %v4846_v63 = vrot.slane %v15216_v9, 3  ;;  %v4849_v4 = vrot.slane %v15213_v0, 4 }
 0x429   : > { %v4261_v60 = vmul.f32 %v13531_v27, %v3973_v17  ;;  %v10630_v56 = vpop.f32.mrb[20].mxu0  ;;  %10688 = vmatprep.mubr.bf16.mxu1 %v4443_v49  ;;  %10733 = vmatpush3.bf16.msra.mxu1 %v12099_v20  ;;  %v15208_v30 = vshrl.u32 %v13679_v29, 16  ;;  %v15207_v48 = vshll.u32 %v13679_v29, 16  ;;  %v5333_v23 = vrot.slane %v4811_v43, 5  ;;  %v13743_v27 = vld [vmem:[%s15158_s3 + $0x80] sm:$0xff]  }
 0x42a   : > { %v13737_v18 = vpack.c.bf16 %v4263_v44, %v4262_v1  ;;  %v3930_v24 = vadd.f32 %v10630_v56, %v13524_v21  ;;  %v3743_v35 = vpop.f32.mrb[21].mxu0  ;;  %10734 = vmatprep.subr.bf16.mxu1 %v12100_v45  ;;  %v4850_v38 = vor.u32 %v4849_v4, %v4846_v63  ;;  %v13747_v20 = vrot.slane %v4817_v53, 4  ;;  %v13765_v4 = vpop.permute.xlu0 %4156 }
 0x42b   : > { %v13749_v41 = vpack.c.bf16 %v4261_v60, %v4260_v8  ;;  %v3928_v46 = vadd.f32 %v13524_v21, %v3743_v35  ;;  %v10631_v43 = vpop.f32.mrb[22].mxu0  ;;  %v4855_v50 = vrot.slane %v15208_v30, 3  ;;  %v4858_v47 = vrot.slane %v15207_v48, 4  ;;  %v13771_v35 = vpop.permute.xlu1 %4161 }
 0x42c   : > { %4325 = vst [vmem:[#allocation2 + $0x60] sm:$0xff] %v13737_v18  ;;  %v3978_v1 = vmax.f32 %v3930_v24, 0.0  ;;  %v3931_v37 = vadd.f32 %v10631_v43, %v13524_v21  ;;  %v3746_v17 = vpop.f32.mrb[23].mxu0  ;;  %v4446_v53 = vrot.slane %v13737_v18, 4  ;;  %v13760_v8 = vsel %vm4771_vm1, %v4841_v36, %v4850_v38 }
 0x42d   : > { %4324 = vst [vmem:[#allocation2 + $0x58] sm:$0xff] %v13749_v41  ;;  %v3976_v33 = vmax.f32 %v3928_v46, 0.0  ;;  %v3929_v49 = vadd.f32 %v13524_v21, %v3746_v17  ;;  %v4444_v44 = vrot.slane %v13749_v41, 4  ;;  %10735 = vmatpush3.bf16.msra.mxu1 %v12100_v45  ;;  %v4859_v63 = vor.u32 %v4858_v47, %v4855_v50 }
 0x42e   : > { %v4266_v60 = vmul.f32 %v13586_v12, %v3978_v1  ;;  %v3979_v56 = vmax.f32 %v3931_v37, 0.0  ;;  %10784 = vmatprep.subr.bf16.mxu1 %v13743_v27  ;;  %v15206_v24 = vshrl.u32 %v13749_v41, 16  ;;  %v15203_v36 = vshll.u32 %v13749_v41, 16 }
 0x42f   : > { %v4264_v46 = vmul.f32 %v13559_v10, %v3976_v33  ;;  %v3977_v43 = vmax.f32 %v3929_v49, 0.0  ;;  %v4445_v45 = vsel %vm4424_vm0, %v4442_v51, %v4444_v44  ;;  %v4447_v50 = vsel %vm4424_vm0, %v4444_v44, %v4446_v53 }
 0x430   : > { %v4267_v12 = vmul.f32 %v13594_v13, %v3979_v56  ;;  %10689 = vmatmul.mubr.bf16.gmra.mrb[16].mxu1 %v4445_v45  ;;  %v13780_v47 = vsel %vm4771_vm1, %v4850_v38, %v4859_v63  ;;  %v4864_v1 = vrot.slane %v15206_v24, 3  ;;  %v4867_v37 = vrot.slane %v15203_v36, 4 }
 0x431   : > { %v4265_v10 = vmul.f32 %v13562_v40, %v3977_v43  ;;  %v10634_v17 = vpop.f32.mrb[24].mxu0  ;;  %10692 = vmatprep.mubr.bf16.mxu1 %v4447_v50  ;;  %v15205_v51 = vshrl.u32 %v13737_v18, 16  ;;  %v15204_v33 = vshll.u32 %v13737_v18, 16  ;;  %v13790_v13 = vor.u32 %v5333_v23, %v13687_v32  ;;  %v13804_v23 = vpop.permute.xlu0 %4166 }
 0x432   : > { %v13792_v49 = vpack.c.bf16 %v4267_v12, %v4266_v60  ;;  %v3934_v38 = vadd.f32 %v10634_v17, %v13524_v21  ;;  %v3759_v44 = vpop.f32.mrb[25].mxu0  ;;  %v4868_v56 = vor.u32 %v4867_v37, %v4864_v1  ;;  %v5337_v45 = vrot.slane %v4820_v14, 5  ;;  %v13812_v1 = vpop.permute.xlu1 %4171 }
 0x433   : > { %v13797_v36 = vpack.c.bf16 %v4265_v10, %v4264_v46  ;;  %v3932_v40 = vadd.f32 %v13524_v21, %v3759_v44  ;;  %v10635_v43 = vpop.f32.mrb[26].mxu0  ;;  %v4873_v50 = vrot.slane %v15205_v51, 3  ;;  %v4876_v32 = vrot.slane %v15204_v33, 4 }
 0x434   : > { %4327 = vst [vmem:[#allocation2 + $0x70] sm:$0xff] %v13792_v49  ;;  %v3982_v60 = vmax.f32 %v3934_v38, 0.0  ;;  %v3935_v12 = vadd.f32 %v10635_v43, %v13524_v21  ;;  %v3762_v31 = vpop.f32.mrb[27].mxu0  ;;  %v4450_v14 = vrot.slane %v13792_v49, 4  ;;  %v13810_v46 = vsel %vm4771_vm1, %v4859_v63, %v4868_v56 }
 0x435   : > { %4326 = vst [vmem:[#allocation2 + $0x68] sm:$0xff] %v13797_v36  ;;  %v3980_v37 = vmax.f32 %v3932_v40, 0.0  ;;  %v3933_v10 = vadd.f32 %v13524_v21, %v3762_v31  ;;  %v4448_v17 = vrot.slane %v13797_v36, 4  ;;  %v4877_v44 = vor.u32 %v4876_v32, %v4873_v50 }
 0x436   : > { %v4270_v38 = vmul.f32 %v13677_v61, %v3982_v60  ;;  %v3983_v33 = vmax.f32 %v3935_v12, 0.0  ;;  %v15212_v43 = vshrl.u32 %v13797_v36, 16  ;;  %v15211_v51 = vshll.u32 %v13797_v36, 16 }
 0x437   : > { %v4268_v63 = vmul.f32 %v13635_v5, %v3980_v37  ;;  %v3981_v24 = vmax.f32 %v3933_v10, 0.0  ;;  %v4449_v48 = vsel %vm4424_vm0, %v4446_v53, %v4448_v17  ;;  %v4451_v30 = vsel %vm4424_vm0, %v4448_v17, %v4450_v14 }
 0x438   : > { %v4271_v40 = vmul.f32 %v13689_v26, %v3983_v33  ;;  %10693 = vmatmul.mubr.bf16.gmra.mrb[20].mxu1 %v4449_v48  ;;  %v13825_v31 = vsel %vm4771_vm1, %v4868_v56, %v4877_v44  ;;  %v4882_v61 = vrot.slane %v15212_v43, 3  ;;  %v4885_v50 = vrot.slane %v15211_v51, 4  ;;  %v13839_v48 = vpop.permute.xlu0 %4176 }
 0x439   : > { %v4269_v32 = vmul.f32 %v13643_v58, %v3981_v24  ;;  %v10638_v5 = vpop.f32.mrb[28].mxu0  ;;  %10696 = vmatprep.mubr.bf16.mxu1 %v4451_v30  ;;  %v15210_v53 = vshrl.u32 %v13792_v49, 16  ;;  %v15209_v60 = vshll.u32 %v13792_v49, 16  ;;  %v13837_v26 = vsel %vm5311_vm2, %v13626_v39, %v13790_v13  ;;  %v13847_v30 = vpop.permute.xlu1 %4181 }
 0x43a   : > { %15384 = vst [vmem:[#allocation6_spill] sm:$0xff] %v13837_v26  ;;  %v13841_v33 = vpack.c.bf16 %v4271_v40, %v4270_v38  ;;  %v3938_v56 = vadd.f32 %v10638_v5, %v13524_v21  ;;  %v3775_v12 = vpop.f32.mrb[29].mxu0  ;;  %v4886_v37 = vor.u32 %v4885_v50, %v4882_v61  ;;  %v13845_v58 = vor.u32 %v5337_v45, %v13747_v20 }
 0x43b   : > { %v13849_v24 = vpack.c.bf16 %v4269_v32, %v4268_v63  ;;  %v3936_v10 = vadd.f32 %v13524_v21, %v3775_v12  ;;  %v10639_v17 = vpop.f32.mrb[30].mxu0  ;;  %v4891_v39 = vrot.slane %v15210_v53, 3  ;;  %v4894_v38 = vrot.slane %v15209_v60, 4 }
 0x43c   : > { %4329 = vst [vmem:[#allocation2 + $0x80] sm:$0xff] %v13841_v33  ;;  %v3986_v40 = vmax.f32 %v3938_v56, 0.0  ;;  %v3939_v61 = vadd.f32 %v10639_v17, %v13524_v21  ;;  %v3778_v20 = vpop.f32.mrb[31].mxu0  ;;  %v4454_v45 = vrot.slane %v13841_v33, 4  ;;  %v13860_v63 = vsel %vm4771_vm1, %v4877_v44, %v4886_v37 }
 0x43d   : > { %4328 = vst [vmem:[#allocation2 + $0x78] sm:$0xff] %v13849_v24  ;;  %v3984_v50 = vmax.f32 %v3936_v10, 0.0  ;;  %v3937_v32 = vadd.f32 %v13524_v21, %v3778_v20  ;;  %v4452_v5 = vrot.slane %v13849_v24, 4  ;;  %v4895_v12 = vor.u32 %v4894_v38, %v4891_v39  ;;  %v13871_v10 = vld [vmem:[#allocation2 + $0x8] sm:$0xf8]  ;;  %v13873_v20 = vpop.permute.xlu0 %4186 }
 0x43e   : > { %v4274_v60 = vmul.f32 %v13765_v4, %v3986_v40  ;;  %v3987_v53 = vmax.f32 %v3939_v61, 0.0  ;;  %v15215_v56 = vshrl.u32 %v13849_v24, 16  ;;  %v15214_v17 = vshll.u32 %v13849_v24, 16  ;;  %v13883_v40 = vpop.permute.xlu1 %4191 }
 0x43f   : > { %v4272_v51 = vmul.f32 %v13720_v55, %v3984_v50  ;;  %v3985_v43 = vmax.f32 %v3937_v32, 0.0  ;;  %v4453_v44 = vsel %vm4424_vm0, %v4450_v14, %v4452_v5  ;;  %v4455_v0 = vsel %vm4424_vm0, %v4452_v5, %v4454_v45 }
 0x440   : > { %v4275_v39 = vmul.f32 %v13771_v35, %v3987_v53  ;;  %10697 = vmatmul.mubr.bf16.gmra.mrb[24].mxu1 %v4453_v44  ;;  %v13877_v4 = vsel %vm4771_vm1, %v4886_v37, %v4895_v12  ;;  %v4900_v38 = vrot.slane %v15215_v56, 3  ;;  %v4903_v55 = vrot.slane %v15214_v17, 4 }
 0x441   : > { %v4273_v14 = vmul.f32 %v13730_v22, %v3985_v43  ;;  %v10642_v61 = vpop.f32.mrb[32].mxu0  ;;  %10700 = vmatprep.mubr.bf16.mxu1 %v4455_v0  ;;  %v15218_v50 = vshrl.u32 %v13841_v33, 16  ;;  %v15217_v35 = vshll.u32 %v13841_v33, 16  ;;  %v13891_v53 = vsel %vm5311_vm2, %v13790_v13, %v13845_v58 }
 0x442   : > { %15385 = vst [vmem:[#allocation7_spill] sm:$0xff] %v13891_v53  ;;  %v13893_v37 = vpack.c.bf16 %v4275_v39, %v4274_v60  ;;  %v3942_v32 = vadd.f32 %v10642_v61, %v13524_v21  ;;  %v3791_v5 = vpop.f32.mrb[33].mxu0  ;;  %v4773_v44 = vshrl.u32 %v13871_v10, 16  ;;  %v4904_v17 = vor.u32 %v4903_v55, %v4900_v38  ;;  %v4202_v42 = vpop.permute.xlu1 %4201 }
 0x443   : > { %v13897_v22 = vpack.c.bf16 %v4273_v14, %v4272_v51  ;;  %v3940_v0 = vadd.f32 %v13524_v21, %v3791_v5  ;;  %v10643_v43 = vpop.f32.mrb[34].mxu0  ;;  %v4909_v56 = vrot.slane %v15218_v50, 3  ;;  %v4912_v13 = vrot.slane %v15217_v35, 4  ;;  %v4197_v35 = vpop.permute.xlu0 %4196 }
 0x444   : > { %4331 = vst [vmem:[#allocation2 + $0x90] sm:$0xff] %v13893_v37  ;;  %v3990_v60 = vmax.f32 %v3942_v32, 0.0  ;;  %v3943_v39 = vadd.f32 %v10643_v43, %v13524_v21  ;;  %v3794_v61 = vpop.f32.mrb[35].mxu0  ;;  %v4458_v9 = vrot.slane %v13893_v37, 4  ;;  %v13908_v51 = vsel %vm4771_vm1, %v4895_v12, %v4904_v17 }
 0x445   : > { %4330 = vst [vmem:[#allocation2 + $0x88] sm:$0xff] %v13897_v22  ;;  %v3988_v38 = vmax.f32 %v3940_v0, 0.0  ;;  %v3941_v55 = vadd.f32 %v13524_v21, %v3794_v61  ;;  %v4456_v14 = vrot.slane %v13897_v22, 4  ;;  %v4913_v5 = vor.u32 %v4912_v13, %v4909_v56 }
 0x446   : > { %v3991_v50 = vmax.f32 %v3943_v39, 0.0  ;;  %v4776_v32 = vshll.u32 %v13871_v10, 16  ;;  %v15223_v43 = vshrl.u32 %v13897_v22, 16  ;;  %v15226_v16 = vshll.u32 %v13897_v22, 16 }
 0x447   : > { %v4278_v12 = vmul.f32 %v13839_v48, %v3990_v60  ;;  %v3989_v62 = vmax.f32 %v3941_v55, 0.0  ;;  %v4457_v34 = vsel %vm4424_vm0, %v4454_v45, %v4456_v14  ;;  %v4459_v0 = vsel %vm4424_vm0, %v4456_v14, %v4458_v9 }
 0x448   : > { %v4279_v61 = vmul.f32 %v13847_v30, %v3991_v50  ;;  %10701 = vmatmul.mubr.bf16.gmra.mrb[28].mxu1 %v4457_v34  ;;  %v13921_v56 = vsel %vm4771_vm1, %v4904_v17, %v4913_v5  ;;  %v4918_v10 = vrot.slane %v15223_v43, 3  ;;  %v4921_v13 = vrot.slane %v15226_v16, 4 }
 0x449   : > { %v4276_v39 = vmul.f32 %v13804_v23, %v3988_v38  ;;  %v4277_v48 = vmul.f32 %v13812_v1, %v3989_v62  ;;  %v10646_v60 = vpop.f32.mrb[36].mxu0  ;;  %10704 = vmatprep.mubr.bf16.mxu1 %v4459_v0  ;;  %v15225_v45 = vshrl.u32 %v13893_v37, 16  ;;  %v15224_v30 = vshll.u32 %v13893_v37, 16  ;;  %v13943_v0 = vpop.permute.xlu0 %4206 }
 0x44a   : > { %v13931_v34 = vpack.c.bf16 %v4279_v61, %v4278_v12  ;;  %v3946_v17 = vadd.f32 %v10646_v60, %v13524_v21  ;;  %v3807_v50 = vpop.f32.mrb[37].mxu0  ;;  %v13934_v55 = vrot.slane %v4773_v44, 3  ;;  %v4922_v14 = vor.u32 %v4921_v13, %v4918_v10 }
 0x44b   : > { %v13936_v43 = vpack.c.bf16 %v4277_v48, %v4276_v39  ;;  %v3944_v23 = vadd.f32 %v13524_v21, %v3807_v50  ;;  %v10647_v38 = vpop.f32.mrb[38].mxu0  ;;  %v4927_v62 = vrot.slane %v15225_v45, 3  ;;  %v4930_v1 = vrot.slane %v15224_v30, 4  ;;  %v13951_v39 = vpop.permute.xlu1 %4211 }
 0x44c   : > { %4333 = vst [vmem:[#allocation2 + $0xa0] sm:$0xff] %v13931_v34  ;;  %v3994_v12 = vmax.f32 %v3946_v17, 0.0  ;;  %v3947_v44 = vadd.f32 %v10647_v38, %v13524_v21  ;;  %v3810_v61 = vpop.f32.mrb[39].mxu0  ;;  %v4462_v10 = vrot.slane %v13931_v34, 4  ;;  %v13949_v13 = vsel %vm4771_vm1, %v4913_v5, %v4922_v14 }
 0x44d   : > { %4332 = vst [vmem:[#allocation2 + $0x98] sm:$0xff] %v13936_v43  ;;  %v3992_v48 = vmax.f32 %v3944_v23, 0.0  ;;  %v3945_v60 = vadd.f32 %v13524_v21, %v3810_v61  ;;  %v4460_v50 = vrot.slane %v13936_v43, 4  ;;  %v4931_v30 = vor.u32 %v4930_v1, %v4927_v62 }
 0x44e   : > { %v3995_v45 = vmax.f32 %v3947_v44, 0.0  ;;  %v13956_v17 = vrot.slane %v4776_v32, 4  ;;  %v15230_v38 = vshrl.u32 %v13936_v43, 16  ;;  %v15229_v16 = vshll.u32 %v13936_v43, 16 }
 0x44f   : > { %v4282_v53 = vmul.f32 %v4197_v35, %v3994_v12  ;;  %v3993_v5 = vmax.f32 %v3945_v60, 0.0  ;;  %v4461_v26 = vsel %vm4424_vm0, %v4458_v9, %v4460_v50  ;;  %v4463_v52 = vsel %vm4424_vm0, %v4460_v50, %v4462_v10  ;;  %v4222_v50 = vpop.permute.xlu1 %4221 }
 0x450   : > { %v4283_v7 = vmul.f32 %v4202_v42, %v3995_v45  ;;  %10705 = vmatmul.mubr.bf16.gmra.mrb[32].mxu1 %v4461_v26  ;;  %v13963_v23 = vsel %vm4771_vm1, %v4922_v14, %v4931_v30  ;;  %v4936_v62 = vrot.slane %v15230_v38, 3  ;;  %v4939_v32 = vrot.slane %v15229_v16, 4  ;;  %v4217_v26 = vpop.permute.xlu0 %4216 }
 0x451   : > { %15386 = vst [vmem:[#allocation8_spill] sm:$0xff] %v13963_v23  ;;  %v4280_v1 = vmul.f32 %v13873_v20, %v3992_v48  ;;  %v4281_v35 = vmul.f32 %v13883_v40, %v3993_v5  ;;  %v10650_v12 = vpop.f32.mrb[40].mxu0  ;;  %10708 = vmatprep.mubr.bf16.mxu1 %v4463_v52  ;;  %v15227_v9 = vshrl.u32 %v13931_v34, 16  ;;  %v15228_v42 = vshll.u32 %v13931_v34, 16 }
 0x452   : > { %v13973_v45 = vpack.c.bf16 %v4283_v7, %v4282_v53  ;;  %v3950_v14 = vadd.f32 %v10650_v12, %v13524_v21  ;;  %v3823_v44 = vpop.f32.mrb[41].mxu0  ;;  %v4940_v60 = vor.u32 %v4939_v32, %v4936_v62 }
 0x453   : > { %v13978_v20 = vpack.c.bf16 %v4281_v35, %v4280_v1  ;;  %v3948_v40 = vadd.f32 %v13524_v21, %v3823_v44  ;;  %v10651_v52 = vpop.f32.mrb[42].mxu0  ;;  %v4945_v48 = vrot.slane %v15227_v9, 3  ;;  %v4948_v7 = vrot.slane %v15228_v42, 4 }
 0x454   : > { %4335 = vst [vmem:[#allocation2 + $0xb0] sm:$0xff] %v13973_v45  ;;  %v3998_v53 = vmax.f32 %v3950_v14, 0.0  ;;  %v3951_v5 = vadd.f32 %v10651_v52, %v13524_v21  ;;  %v3826_v12 = vpop.f32.mrb[43].mxu0  ;;  %v4466_v62 = vrot.slane %v13973_v45, 4  ;;  %v13989_v32 = vsel %vm4771_vm1, %v4931_v30, %v4940_v60 }
 0x455   : > { %15387 = vst [vmem:[#allocation9_spill] sm:$0xff] %v13989_v32  ;;  %4334 = vst [vmem:[#allocation2 + $0xa8] sm:$0xff] %v13978_v20  ;;  %v3996_v1 = vmax.f32 %v3948_v40, 0.0  ;;  %v3949_v35 = vadd.f32 %v13524_v21, %v3826_v12  ;;  %v4464_v44 = vrot.slane %v13978_v20, 4  ;;  %v4949_v9 = vor.u32 %v4948_v7, %v4945_v48  ;;  %v4227_v40 = vpop.permute.xlu0 %4226 }
 0x456   : > { %v3999_v42 = vmax.f32 %v3951_v5, 0.0  ;;  %v15233_v16 = vshrl.u32 %v13978_v20, 16  ;;  %v15232_v14 = vshll.u32 %v13978_v20, 16  ;;  %v15388_v52 = vshrl.u32 %v13628_v11, 16  ;;  %v4232_v5 = vpop.permute.xlu1 %4231 }
 0x457   : > { %v4286_v61 = vmul.f32 %v4217_v26, %v3998_v53  ;;  %v3997_v54 = vmax.f32 %v3949_v35, 0.0  ;;  %v4465_v30 = vsel %vm4424_vm0, %v4462_v10, %v4464_v44  ;;  %v4467_v32 = vsel %vm4424_vm0, %v4464_v44, %v4466_v62 }
 0x458   : > { %v5340_v38 = vrot.slane %v15388_v52, 4  ;;  %v4287_v23 = vmul.f32 %v4222_v50, %v3999_v42  ;;  %10709 = vmatmul.mubr.bf16.gmra.mrb[36].mxu1 %v4465_v30  ;;  %v14001_v12 = vsel %vm4771_vm1, %v4940_v60, %v4949_v9  ;;  %v4954_v48 = vrot.slane %v15233_v16, 3 }
 0x459   : > { %15389 = vst [vmem:[#allocation10_spill] sm:$0xff] %v14001_v12  ;;  %v4957_v7 = vrot.slane %v15232_v14, 4  ;;  %v4284_v26 = vmul.f32 %v13943_v0, %v3996_v1  ;;  %v4285_v53 = vmul.f32 %v13951_v39, %v3997_v54  ;;  %v10654_v10 = vpop.f32.mrb[44].mxu0  ;;  %10712 = vmatprep.mubr.bf16.mxu1 %v4467_v32  ;;  %v15235_v35 = vshrl.u32 %v13973_v45, 16 }
 0x45a   : > { %v15234_v42 = vshll.u32 %v13973_v45, 16  ;;  %v14011_v50 = vpack.c.bf16 %v4287_v23, %v4286_v61  ;;  %v3954_v60 = vadd.f32 %v10654_v10, %v13524_v21  ;;  %v3839_v44 = vpop.f32.mrb[45].mxu0  ;;  %v15390_v30 = vshll.u32 %v13628_v11, 16  ;;  %v4242_v11 = vpop.permute.xlu1 %4241 }
 0x45b   : > { %v4958_v52 = vor.u32 %v4957_v7, %v4954_v48  ;;  %v14016_v16 = vpack.c.bf16 %v4285_v53, %v4284_v26  ;;  %v3952_v0 = vadd.f32 %v13524_v21, %v3839_v44  ;;  %v10655_v54 = vpop.f32.mrb[46].mxu0  ;;  %v4963_v39 = vrot.slane %v15235_v35, 3  ;;  %v4237_v44 = vpop.permute.xlu0 %4236 }
 0x45c   : > { %v5341_v14 = vrot.slane %v15390_v30, 5  ;;  %v4966_v32 = vrot.slane %v15234_v42, 4  ;;  %4337 = vst [vmem:[#allocation2 + $0xc0] sm:$0xff] %v14011_v50  ;;  %v4002_v23 = vmax.f32 %v3954_v60, 0.0  ;;  %v3955_v61 = vadd.f32 %v10655_v54, %v13524_v21  ;;  %v3842_v1 = vpop.f32.mrb[47].mxu0 }
 0x45d   : > { %v14027_v48 = vsel %vm4771_vm1, %v4949_v9, %v4958_v52  ;;  %4336 = vst [vmem:[#allocation2 + $0xb8] sm:$0xff] %v14016_v16  ;;  %v4000_v7 = vmax.f32 %v3952_v0, 0.0  ;;  %v3953_v26 = vadd.f32 %v13524_v21, %v3842_v1  ;;  %v4468_v53 = vrot.slane %v14016_v16, 4 }
 0x45e   : > { %15391 = vst [vmem:[#allocation11_spill] sm:$0xff] %v14027_v48  ;;  %v4967_v10 = vor.u32 %v4966_v32, %v4963_v39  ;;  %v4003_v30 = vmax.f32 %v3955_v61, 0.0  ;;  %v4970_v60 = vshrl.u32 %v14016_v16, 16  ;;  %v15236_v54 = vshll.u32 %v14016_v16, 16 }
 0x45f   : > { %v15392_v42 = vshrl.u32 %v13620_v2, 16  ;;  %v4290_v9 = vmul.f32 %v4237_v44, %v4002_v23  ;;  %v4001_v48 = vmax.f32 %v3953_v26, 0.0  ;;  %v4469_v12 = vsel %vm4424_vm0, %v4466_v62, %v4468_v53 }
 0x460   : > { %v15393_v0 = vrot.slane %v14011_v50, 4  ;;  %v4291_v1 = vmul.f32 %v4242_v11, %v4003_v30  ;;  %10713 = vmatmul.mubr.bf16.gmra.mrb[40].mxu1 %v4469_v12  ;;  %v14041_v39 = vsel %vm4771_vm1, %v4958_v52, %v4967_v10  ;;  %v4972_v32 = vrot.slane %v4970_v60, 3 }
 0x461   : > { %v5344_v35 = vrot.slane %v15392_v42, 4  ;;  %v4975_v42 = vrot.slane %v15236_v54, 4  ;;  %v4288_v61 = vmul.f32 %v4227_v40, %v4000_v7  ;;  %v4289_v23 = vmul.f32 %v4232_v5, %v4001_v48 }
 0x462   : > { %v4471_v21 = vsel %vm4424_vm0, %v4468_v53, %v15393_v0  ;;  %v4979_v62 = vshrl.u32 %v14011_v50, 16  ;;  %v4982_v26 = vshll.u32 %v14011_v50, 16  ;;  %v4315_v44 = vpack.c.bf16 %v4291_v1, %v4290_v9 }
 0x463   : > { %10716 = vmatprep.mubr.bf16.mxu1 %v4471_v21  ;;  %v4976_v53 = vor.u32 %v4975_v42, %v4972_v32  ;;  %v5342_v11 = vor.u32 %v5341_v14, %v5340_v38  ;;  %v15394_v12 = vshll.u32 %v13620_v2, 16  ;;  %v4314_v30 = vpack.c.bf16 %v4289_v23, %v4288_v61 }
 0x464   : > { %v15395_v0 = vor.u32 %v13956_v17, %v13934_v55  ;;  %v4981_v40 = vrot.slane %v4979_v62, 3  ;;  %v4984_v5 = vrot.slane %v4982_v26, 4  ;;  %4339 = vst [vmem:[#allocation2 + $0xd0] sm:$0xff] %v4315_v44  ;;  %v15396_v14 = vshrl.u32 %v13691_v57, 16 }
 0x465   : > { %v5345_v52 = vrot.slane %v15394_v12, 5  ;;  %v14061_v48 = vsel %vm4771_vm1, %v4967_v10, %v4976_v53  ;;  %v14065_v2 = vsel %vm5311_vm2, %v13845_v58, %v5342_v11  ;;  %4338 = vst [vmem:[#allocation2 + $0xc8] sm:$0xff] %v4314_v30  ;;  %v15397_v7 = vshll.u32 %v13691_v57, 16 }
 0x466   : > { %v4788_v54 = vsel %vm4771_vm1, %v15395_v0, %v13544_v25  ;;  %v5348_v55 = vrot.slane %v15396_v14, 4  ;;  %v4985_v17 = vor.u32 %v4984_v5, %v4981_v40  ;;  %v15398_v21 = vshrl.u32 %v13679_v29, 16 }
 0x467   : > { %v5346_v38 = vor.u32 %v5345_v52, %v5344_v35  ;;  %v5349_v9 = vrot.slane %v15397_v7, 5  ;;  %v15399_v32 = vshll.u32 %v13679_v29, 16  ;;  %v15400_v58 = vshrl.u32 %v13749_v41, 16 }
 0x468   : > { %v5352_v1 = vrot.slane %v15398_v21, 4  ;;  %v15401_v61 = vshll.u32 %v13749_v41, 16  ;;  %v15402_v44 = vshrl.u32 %v13737_v18, 16  ;;  %v14085_v57 = vsel %vm4771_vm1, %v4976_v53, %v4985_v17 }
 0x469   : > { %v5353_v10 = vrot.slane %v15399_v32, 5  ;;  %v14076_v42 = vsel %vm5311_vm2, %v5342_v11, %v5346_v38  ;;  %v5356_v35 = vrot.slane %v15400_v58, 4  ;;  %v5350_v52 = vor.u32 %v5349_v9, %v5348_v55 }
 0x46a   : > { %v5357_v23 = vrot.slane %v15401_v61, 5  ;;  %v5360_v12 = vrot.slane %v15402_v44, 4  ;;  %v15403_v29 = vshll.u32 %v13737_v18, 16  ;;  %v15404_v11 = vshrl.u32 %v13797_v36, 16 }
 0x46b   : > { %v5354_v30 = vor.u32 %v5353_v10, %v5352_v1  ;;  %v15405_v14 = vshll.u32 %v13797_v36, 16  ;;  %v15406_v41 = vshrl.u32 %v13792_v49, 16  ;;  %v14096_v32 = vsel %vm5311_vm2, %v5346_v38, %v5350_v52 }
 0x46c   : > { %v5361_v0 = vrot.slane %v15403_v29, 5  ;;  %v5358_v40 = vor.u32 %v5357_v23, %v5356_v35  ;;  %v5364_v5 = vrot.slane %v15404_v11, 4  ;;  %v15407_v18 = vshll.u32 %v13792_v49, 16  ;;  %v4364_v29 = vld [vmem:[#allocation2 + $0xc8] sm:$0xf] }
 0x46d   : > { %v5365_v7 = vrot.slane %v15405_v14, 5  ;;  %v5368_v21 = vrot.slane %v15406_v41, 4  ;;  %v14099_v53 = vsel %vm5311_vm2, %v5350_v52, %v5354_v30  ;;  %v15408_v36 = vshrl.u32 %v13849_v24, 16 }
 0x46e   : > { %v5362_v55 = vor.u32 %v5361_v0, %v5360_v12  ;;  %v5369_v9 = vrot.slane %v15407_v18, 5  ;;  %v14104_v1 = vsel %vm5311_vm2, %v5354_v30, %v5358_v40  ;;  %v15409_v35 = vshll.u32 %v13849_v24, 16 }
 0x46f   : > { %v5366_v10 = vor.u32 %v5365_v7, %v5364_v5  ;;  %v5372_v58 = vrot.slane %v15408_v36, 4  ;;  %v15410_v44 = vshrl.u32 %v13841_v33, 16  ;;  %v15411_v49 = vshll.u32 %v13841_v33, 16 }
 0x470   : > { %v5373_v61 = vrot.slane %v15409_v35, 5  ;;  %v14111_v38 = vsel %vm5311_vm2, %v5358_v40, %v5362_v55  ;;  %v5370_v23 = vor.u32 %v5369_v9, %v5368_v21  ;;  %v15412_v11 = vshrl.u32 %v13897_v22, 16 }
 0x471   : > { %v5376_v12 = vrot.slane %v15410_v44, 4  ;;  %v5377_v52 = vrot.slane %v15411_v49, 5  ;;  %v14118_v30 = vsel %vm5311_vm2, %v5362_v55, %v5366_v10  ;;  %v15413_v24 = vshll.u32 %v13897_v22, 16 }
 0x472   : > { %v5374_v0 = vor.u32 %v5373_v61, %v5372_v58  ;;  %v5380_v5 = vrot.slane %v15412_v11, 4  ;;  %v4472_v40 = vrot.slane %v4364_v29, 4  ;;  %v4988_v7 = vshrl.u32 %v4364_v29, 16 }
 0x473   : > { %v5381_v14 = vrot.slane %v15413_v24, 5  ;;  %v4991_v41 = vshll.u32 %v4364_v29, 16  ;;  %v14125_v21 = vsel %vm5311_vm2, %v5366_v10, %v5370_v23  ;;  %v5378_v18 = vor.u32 %v5377_v52, %v5376_v12 }
 0x474   : > { %v14128_v33 = vsel %vm5311_vm2, %v5370_v23, %v5374_v0  ;;  %v15414_v55 = vshrl.u32 %v13893_v37, 16  ;;  %v15415_v58 = vrot.slane %v14011_v50, 4  ;;  %v4990_v22 = vrot.slane %v4988_v7, 3 }
 0x475   : > { %v5382_v9 = vor.u32 %v5381_v14, %v5380_v5  ;;  %v4993_v61 = vrot.slane %v4991_v41, 4  ;;  %v15416_v44 = vshll.u32 %v13893_v37, 16  ;;  %v14138_v10 = vsel %vm5311_vm2, %v5374_v0, %v5378_v18 }
 0x476   : > { %v5384_v36 = vrot.slane %v15414_v55, 4  ;;  %v4473_v35 = vsel %vm4424_vm0, %v15415_v58, %v4472_v40  ;;  %v15417_v12 = vshrl.u32 %v13936_v43, 16  ;;  %v15418_v29 = vshll.u32 %v13936_v43, 16 }
 0x477   : > { %v5385_v49 = vrot.slane %v15416_v44, 5  ;;  %10717 = vmatmul.mubr.bf16.gmra.mrb[44].mxu1 %v4473_v35  ;;  %v14141_v23 = vsel %vm5311_vm2, %v5378_v18, %v5382_v9  ;;  %v4994_v5 = vor.u32 %v4993_v61, %v4990_v22  ;;  %v15419_v14 = vshrl.u32 %v13931_v34, 16 }
 0x478   : > { %v5388_v52 = vrot.slane %v15417_v12, 4  ;;  %v5389_v11 = vrot.slane %v15418_v29, 5  ;;  %10736 = vmatprep.mubr.bf16.mxu1 %v4788_v54  ;;  %v15420_v40 = vshll.u32 %v13931_v34, 16  ;;  %v15421_v41 = vshrl.u32 %v13978_v20, 16 }
 0x479   : > { %v5386_v24 = vor.u32 %v5385_v49, %v5384_v36  ;;  %v5392_v37 = vrot.slane %v15419_v14, 4  ;;  %v15422_v55 = vshll.u32 %v13978_v20, 16  ;;  %v15423_v35 = vshrl.u32 %v13973_v45, 16 }
 0x47a   : > { %v5393_v7 = vrot.slane %v15420_v40, 5  ;;  %v5390_v0 = vor.u32 %v5389_v11, %v5388_v52  ;;  %v5396_v18 = vrot.slane %v15421_v41, 4  ;;  %v14158_v54 = vsel %vm4771_vm1, %v4985_v17, %v4994_v5  ;;  %v12102_v11 = vld [vmem:[%s15158_s3 + $0x88] sm:$0xff]   ;;  %v12109_v40 = vld [vmem:[%s15158_s3 + $0xc0] sm:$0xff]  }
 0x47b   : > { %v5397_v58 = vrot.slane %v15422_v55, 5  ;;  %v5400_v43 = vrot.slane %v15423_v35, 4  ;;  %v14161_v36 = vsel %vm5311_vm2, %v5382_v9, %v5386_v24  ;;  %v15424_v34 = vshll.u32 %v13973_v45, 16  ;;  %v15427_v35 = vld [vmem:[#allocation9_spill] sm:$0xff] }
 0x47c   : > { %v5394_v22 = vor.u32 %v5393_v7, %v5392_v37  ;;  %v14166_v44 = vsel %vm5311_vm2, %v5386_v24, %v5390_v0  ;;  %v5404_v20 = vrot.slane %v4970_v60, 4  ;;  %v15425_v12 = vshll.u32 %v14016_v16, 16  ;;  %v14226_v37 = vld [vmem:[#allocation2 + $0x20] sm:$0xff] }
 0x47d   : > { %v5401_v61 = vrot.slane %v15424_v34, 5  ;;  %v5398_v49 = vor.u32 %v5397_v58, %v5396_v18  ;;  %v5408_v9 = vrot.slane %v4979_v62, 4  ;;  %v5409_v45 = vrot.slane %v4982_v26, 5  ;;  %v14224_v26 = vld [vmem:[#allocation2 + $0x18] sm:$0xff] }
 0x47e   : > { %v5405_v52 = vrot.slane %v15425_v12, 5  ;;  %v14173_v17 = vsel %vm5311_vm2, %v5390_v0, %v5394_v22  ;;  %v4797_v16 = vsel %vm4771_vm1, %v13544_v25, %v13576_v59  ;;  %v12103_v25 = vld [vmem:[%s15158_s3 + $0x90] sm:$0xff]   ;;  %v12104_v59 = vld [vmem:[%s15158_s3 + $0x98] sm:$0xff]   ;;  %v5814_v7 = vshrl.u32 %v14224_v26, 16  ;;  %v15434_v12 = vld [vmem:[#allocation6_spill] sm:$0xff] }
 0x47f   : > { %v5402_v29 = vor.u32 %v5401_v61, %v5400_v43  ;;  %v14183_v5 = vsel %vm5311_vm2, %v5394_v22, %v5398_v49  ;;  %v14191_v14 = vor.u32 %v5409_v45, %v5408_v9  ;;  %10737 = vmatmul.mubr.bf16.vlgmr.msra.gmra.mrb[0].mxu1 %v4797_v16  ;;  %v5822_v0 = vshrl.u32 %v14226_v37, 16  ;;  %v15426_v58 = vld [vmem:[#allocation8_spill] sm:$0xff]  ;;  %v12157_v43 = vld [vmem:[#allocation2 + $0x8] sm:$0xf0]  ;;  %v12113_v9 = vld [vmem:[%s15158_s3 + $0xe0] sm:$0xff]  }
 0x480   : > { %v5406_v60 = vor.u32 %v5405_v52, %v5404_v20  ;;  %10740 = vmatprep.mubr.bf16.mxu1 %v13606_v19  ;;  %10785 = vmatpush3.bf16.msra.mxu1 %v13743_v27  ;;  %v12105_v19 = vld [vmem:[%s15158_s3 + $0xa0] sm:$0xff]   ;;  %v12106_v27 = vld [vmem:[%s15158_s3 + $0xa8] sm:$0xff]   ;;  %v5316_v22 = vshll.u32 %v12157_v43, 16  ;;  %v15431_v61 = vld [vmem:[#allocation4_spill] sm:$0xff] }
 0x481   : > { %v14189_v24 = vsel %vm5311_vm2, %v5398_v49, %v5402_v29  ;;  %10786 = vmatprep.subr.bf16.mxu1 %v12102_v11  ;;  %v15432_v49 = vld [vmem:[#allocation5_spill] sm:$0xff] }
 0x482   : > { %v14194_v50 = vsel %vm5311_vm2, %v5402_v29, %v5406_v60  ;;  %v14200_v62 = vsel %vm5311_vm2, %v5406_v60, %v14191_v14  ;;  %v5318_v34 = vrot.slane %v5316_v22, 5  ;;  %v15435_v29 = vld [vmem:[#allocation7_spill] sm:$0xff]  ;;  %v12114_v60 = vld [vmem:[%s15158_s3 + $0xe8] sm:$0xff]  }
 0x484   : > { %10787 = vmatpush3.bf16.msra.mxu1 %v12102_v11 }
 0x485   : > { %10788 = vmatprep.subr.bf16.mxu1 %v12103_v25 }
 0x487   : > { %10741 = vmatmul.mubr.bf16.gmra.mrb[4].mxu1 %v13641_v3  ;;  %v12107_v3 = vld [vmem:[%s15158_s3 + $0xb0] sm:$0xff]  }
 0x488   : > { %10744 = vmatprep.mubr.bf16.mxu1 %v13663_v6  ;;  %10789 = vmatpush3.bf16.msra.mxu1 %v12103_v25  ;;  %v12108_v6 = vld [vmem:[%s15158_s3 + $0xb8] sm:$0xff]   ;;  %v12115_v25 = vld [vmem:[%s15158_s3 + $0xf0] sm:$0xff]  }
 0x489   : > { %10790 = vmatprep.subr.bf16.mxu1 %v12104_v59 }
 0x48c   : > { %10791 = vmatpush3.bf16.msra.mxu1 %v12104_v59  ;;  %v12116_v59 = vld [vmem:[%s15158_s3 + $0xf8] sm:$0xff]  }
 0x48d   : > { %10792 = vmatprep.subr.bf16.mxu1 %v12105_v19 }
 0x48f   : > { %10745 = vmatmul.mubr.bf16.gmra.mrb[8].mxu1 %v13702_v28  ;;  %v5817_v28 = vshll.u32 %v14224_v26, 16 }
 0x490   : > { %10748 = vmatprep.mubr.bf16.mxu1 %v13724_v15  ;;  %10793 = vmatpush3.bf16.msra.mxu1 %v12105_v19  ;;  %v5825_v15 = vshll.u32 %v14226_v37, 16  ;;  %v14338_v19 = vld [vmem:[#allocation2 + $0x30] sm:$0xff] }
 0x491   : > { %10794 = vmatprep.subr.bf16.mxu1 %v12106_v27  ;;  %15438 = vst [vmem:[#allocation15_spill] sm:$0xff] %v14338_v19 }
 0x494   : > { %10795 = vmatpush3.bf16.msra.mxu1 %v12106_v27  ;;  %v14340_v27 = vld [vmem:[#allocation2 + $0x38] sm:$0xff] }
 0x495   : > { %10796 = vmatprep.subr.bf16.mxu1 %v12107_v3  ;;  %15439 = vst [vmem:[#allocation16_spill] sm:$0xff] %v14340_v27 }
 0x497   : > { %10749 = vmatmul.mubr.bf16.gmra.mrb[12].mxu1 %v13760_v8  ;;  %v6736_v8 = vrot.slane %v5817_v28, 1 }
 0x498   : > { %10752 = vmatprep.mubr.bf16.mxu1 %v13780_v47  ;;  %10797 = vmatpush3.bf16.msra.mxu1 %v12107_v3  ;;  %v6741_v47 = vrot.slane %v5825_v15, 1 }
 0x499   : > { %10798 = vmatprep.subr.bf16.mxu1 %v12108_v6  ;;  %v6737_v41 = vor.u32 %v6736_v8, %v5814_v7 }
 0x49a   : > { %v14245_v18 = vor.u32 %v6741_v47, %v5822_v0 }
 0x49b   : > { %v14250_v55 = vsel %vm6730_vm3, %v6737_v41, %v6741_v47  ;;  %v14361_v41 = vld [vmem:[#allocation2 + $0x40] sm:$0xff] }
 0x49c   : > { %10799 = vmatpush3.bf16.msra.mxu1 %v12108_v6  ;;  %15440 = vst [vmem:[#allocation17_spill] sm:$0xff] %v14361_v41 }
 0x49d   : > { %10848 = vmatprep.subr.bf16.mxu1 %v12109_v40 }
 0x49f   : > { %10753 = vmatmul.mubr.bf16.gmra.mrb[16].mxu1 %v13810_v46  ;;  %v15428_v46 = vld [vmem:[#allocation10_spill] sm:$0xff] }
 0x4a0   : > { %10756 = vmatprep.mubr.bf16.mxu1 %v13825_v31  ;;  %v15429_v31 = vld [vmem:[#allocation11_spill] sm:$0xff] }
 0x4a7   : > { %10757 = vmatmul.mubr.bf16.gmra.mrb[20].mxu1 %v13860_v63  ;;  %v5313_v63 = vshrl.u32 %v12157_v43, 16 }
 0x4a8   : > { %10760 = vmatprep.mubr.bf16.mxu1 %v13877_v4 }
 0x4a9   : > { %v5315_v4 = vrot.slane %v5313_v63, 4  ;;  %v14376_v63 = vshrl.u32 %v14361_v41, 16 }
 0x4af   : > { %10761 = vmatmul.mubr.bf16.gmra.mrb[24].mxu1 %v13908_v51  ;;  %v5319_v51 = vor.u32 %v5318_v34, %v5315_v4  ;;  %v12120_v34 = vld [vmem:[%s15158_s3 + $0x118] sm:$0xff]  }
 0x4b0   : > { %10764 = vmatprep.mubr.bf16.mxu1 %v13921_v56  ;;  %v15430_v56 = vld [vmem:[#allocation3_spill] sm:$0xff] }
 0x4b7   : > { %10765 = vmatmul.mubr.bf16.gmra.mrb[28].mxu1 %v13949_v13  ;;  %v5323_v13 = vsel %vm5311_vm2, %v5319_v51, %v15430_v56  ;;  %v5856_v56 = vrot.slane %v14376_v63, 7 }
 0x4b8   : > { %10768 = vmatprep.mubr.bf16.mxu1 %v15426_v58  ;;  %v14364_v58 = vshll.u32 %v14338_v19, 16 }
 0x4bf   : > { %10769 = vmatmul.mubr.bf16.gmra.mrb[32].mxu1 %v15427_v35  ;;  %v14366_v35 = vld [vmem:[#allocation2 + $0x48] sm:$0xff] }
 0x4c0   : > { %10772 = vmatprep.mubr.bf16.mxu1 %v15428_v46  ;;  %15441 = vst [vmem:[#allocation18_spill] sm:$0xff] %v14366_v35  ;;  %v14369_v46 = vshll.u32 %v14340_v27, 16  ;;  %v14380_v4 = vshrl.u32 %v14366_v35, 16 }
 0x4c7   : > { %10773 = vmatmul.mubr.bf16.gmra.mrb[36].mxu1 %v15429_v31  ;;  %v12119_v31 = vld [vmem:[%s15158_s3 + $0x110] sm:$0xff]  }
 0x4c8   : > { %10776 = vmatprep.mubr.bf16.mxu1 %v14041_v39  ;;  %v12110_v39 = vld [vmem:[%s15158_s3 + $0xc8] sm:$0xff]  }
 0x4cf   : > { %10777 = vmatmul.mubr.bf16.gmra.mrb[40].mxu1 %v14061_v48  ;;  %v12111_v48 = vld [vmem:[%s15158_s3 + $0xd0] sm:$0xff]  }
 0x4d0   : > { %10780 = vmatprep.mubr.bf16.mxu1 %v14085_v57  ;;  %v12112_v57 = vld [vmem:[%s15158_s3 + $0xd8] sm:$0xff]  }
 0x4d7   : > { %10781 = vmatmul.mubr.bf16.gmra.mrb[44].mxu1 %v14158_v54  ;;  %v14278_v54 = vld [vmem:[#allocation2] sm:$0xff] }
 0x4d8   : > { %10800 = vmatprep.mubr.bf16.mxu1 %v5323_v13  ;;  %15433 = vst [vmem:[#allocation12_spill] sm:$0xff] %v14278_v54  ;;  %v15238_v20 = vshrl.u32 %v14278_v54, 16  ;;  %v15237_v52 = vshll.u32 %v14278_v54, 16  ;;  %v14539_v54 = vld [vmem:[#allocation2 + $0xb0] sm:$0xff] }
 0x4d9   : > { %15463 = vst [vmem:[#allocation40_spill] sm:$0xff] %v14539_v54 }
 0x4da   : > { %v8434_v45 = vrot.slane %v15238_v20, 4  ;;  %v8435_v11 = vrot.slane %v15237_v52, 5 }
 0x4dc   : > { %v14294_v16 = vor.u32 %v8435_v11, %v8434_v45 }
 0x4de   : > { %15436 = vst [vmem:[#allocation13_spill] sm:$0xff] %v14294_v16 }
 0x4df   : > { %10801 = vmatmul.mubr.bf16.vlgmr.msra.gmra.mrb[0].mxu1 %v15431_v61  ;;  %v14389_v61 = vld [vmem:[#allocation2 + $0x50] sm:$0xff] }
 0x4e0   : > { %10804 = vmatprep.mubr.bf16.mxu1 %v15432_v49  ;;  %10849 = vmatpush3.bf16.msra.mxu1 %v12109_v40  ;;  %v14352_v40 = vshrl.u32 %v14340_v27, 16  ;;  %15442 = vst [vmem:[#allocation19_spill] sm:$0xff] %v14389_v61  ;;  %v14392_v49 = vshll.u32 %v14361_v41, 16 }
 0x4e1   : > { %10850 = vmatprep.subr.bf16.mxu1 %v12110_v39 }
 0x4e4   : > { %10851 = vmatpush3.bf16.msra.mxu1 %v12110_v39  ;;  %v5864_v39 = vrot.slane %v14380_v4, 7 }
 0x4e5   : > { %10852 = vmatprep.subr.bf16.mxu1 %v12111_v48 }
 0x4e7   : > { %10805 = vmatmul.mubr.bf16.gmra.mrb[4].mxu1 %v15434_v12  ;;  %v12121_v12 = vld [vmem:[%s15158_s3 + $0x120] sm:$0xff]  }
 0x4e8   : > { %10808 = vmatprep.mubr.bf16.mxu1 %v15435_v29  ;;  %10853 = vmatpush3.bf16.msra.mxu1 %v12111_v48  ;;  %v14394_v48 = vld [vmem:[#allocation2 + $0x58] sm:$0xff]  ;;  %v5859_v29 = vor.u32 %v14392_v49, %v5856_v56 }
 0x4e9   : > { %10854 = vmatprep.subr.bf16.mxu1 %v12112_v57  ;;  %15443 = vst [vmem:[#allocation20_spill] sm:$0xff] %v14394_v48  ;;  %v14408_v11 = vshrl.u32 %v14394_v48, 16 }
 0x4ec   : > { %10855 = vmatpush3.bf16.msra.mxu1 %v12112_v57  ;;  %v14397_v57 = vshll.u32 %v14366_v35, 16 }
 0x4ed   : > { %10856 = vmatprep.subr.bf16.mxu1 %v12113_v9 }
 0x4ee   : > { %v5867_v45 = vor.u32 %v14397_v57, %v5864_v39 }
 0x4ef   : > { %10809 = vmatmul.mubr.bf16.gmra.mrb[8].mxu1 %v14065_v2  ;;  %v12117_v2 = vld [vmem:[%s15158_s3 + $0x100] sm:$0xff]  }
 0x4f0   : > { %10812 = vmatprep.mubr.bf16.mxu1 %v14076_v42  ;;  %10857 = vmatpush3.bf16.msra.mxu1 %v12113_v9  ;;  %v5293_v42 = vld [vmem:[#allocation2 + $0xc8] sm:$0x1f]  ;;  %v14404_v9 = vshrl.u32 %v14389_v61, 16 }
 0x4f1   : > { %10858 = vmatprep.subr.bf16.mxu1 %v12114_v60 }
 0x4f4   : > { %10859 = vmatpush3.bf16.msra.mxu1 %v12114_v60  ;;  %v12122_v60 = vld [vmem:[%s15158_s3 + $0x128] sm:$0xff]  }
 0x4f5   : > { %10860 = vmatprep.subr.bf16.mxu1 %v12115_v25 }
 0x4f7   : > { %10813 = vmatmul.mubr.bf16.gmra.mrb[12].mxu1 %v14096_v32  ;;  %v5413_v32 = vshrl.u32 %v5293_v42, 16 }
 0x4f8   : > { %10816 = vmatprep.mubr.bf16.mxu1 %v14099_v53  ;;  %10861 = vmatpush3.bf16.msra.mxu1 %v12115_v25  ;;  %v5416_v53 = vshll.u32 %v5293_v42, 16  ;;  %v5880_v42 = vrot.slane %v14408_v11, 7 }
 0x4f9   : > { %10862 = vmatprep.subr.bf16.mxu1 %v12116_v59 }
 0x4fc   : > { %10863 = vmatpush3.bf16.msra.mxu1 %v12116_v59  ;;  %v5872_v59 = vrot.slane %v14404_v9, 7 }
 0x4fd   : > { %10912 = vmatprep.subr.bf16.mxu1 %v12117_v2 }
 0x4ff   : > { %10817 = vmatmul.mubr.bf16.gmra.mrb[16].mxu1 %v14104_v1  ;;  %v5766_v1 = vld [vmem:[#allocation2 + $0x10] sm:$0x80] }
 0x500   : > { %10820 = vmatprep.mubr.bf16.mxu1 %v14111_v38  ;;  %v5415_v38 = vrot.slane %v5413_v32, 4  ;;  %v14417_v32 = vld [vmem:[#allocation2 + $0x60] sm:$0xff] }
 0x501   : > { %15444 = vst [vmem:[#allocation21_spill] sm:$0xff] %v14417_v32 }
 0x507   : > { %10821 = vmatmul.mubr.bf16.gmra.mrb[20].mxu1 %v14118_v30  ;;  %v5418_v30 = vrot.slane %v5416_v53, 5  ;;  %v14420_v53 = vshll.u32 %v14389_v61, 16 }
 0x508   : > { %10824 = vmatprep.mubr.bf16.mxu1 %v14125_v21  ;;  %v5810_v21 = vshrl.u32 %v5766_v1, 16  ;;  %v14422_v1 = vld [vmem:[#allocation2 + $0x68] sm:$0xff] }
 0x509   : > { %15445 = vst [vmem:[#allocation22_spill] sm:$0xff] %v14422_v1 }
 0x50f   : > { %10825 = vmatmul.mubr.bf16.gmra.mrb[24].mxu1 %v14128_v33  ;;  %v5816_v33 = vrot.slane %v5814_v7, 7  ;;  %v12118_v7 = vld [vmem:[%s15158_s3 + $0x108] sm:$0xff]  }
 0x510   : > { %10828 = vmatprep.mubr.bf16.mxu1 %v14138_v10  ;;  %v14325_v10 = vld [vmem:[#allocation2 + $0x28] sm:$0xff] }
 0x511   : > { %15437 = vst [vmem:[#allocation14_spill] sm:$0xff] %v14325_v10  ;;  %v14343_v3 = vshll.u32 %v14325_v10, 16 }
 0x517   : > { %10829 = vmatmul.mubr.bf16.gmra.mrb[28].mxu1 %v14141_v23  ;;  %v5419_v23 = vor.u32 %v5418_v30, %v5415_v38  ;;  %v14425_v38 = vshll.u32 %v14394_v48, 16  ;;  %v12123_v30 = vld [vmem:[%s15158_s3 + $0x130] sm:$0xff]  }
 0x518   : > { %10832 = vmatprep.mubr.bf16.mxu1 %v14161_v36  ;;  %v5812_v36 = vrot.slane %v5810_v21, 7  ;;  %v5875_v21 = vor.u32 %v14420_v53, %v5872_v59 }
 0x51f   : > { %10833 = vmatmul.mubr.bf16.gmra.mrb[32].mxu1 %v14166_v44  ;;  %v5819_v44 = vor.u32 %v5817_v28, %v5816_v33 }
 0x520   : > { %10836 = vmatprep.mubr.bf16.mxu1 %v14173_v17  ;;  %v14330_v17 = vshrl.u32 %v14325_v10, 16 }
 0x527   : > { %10837 = vmatmul.mubr.bf16.gmra.mrb[36].mxu1 %v14183_v5  ;;  %v5420_v5 = vsel %vm5311_vm2, %v14191_v14, %v5419_v23  ;;  %v14348_v14 = vshrl.u32 %v14338_v19, 16  ;;  %v5883_v23 = vor.u32 %v14425_v38, %v5880_v42 }
 0x528   : > { %10840 = vmatprep.mubr.bf16.mxu1 %v14189_v24  ;;  %v5824_v24 = vrot.slane %v5822_v0, 7 }
 0x529   : > { %v5840_v8 = vrot.slane %v14348_v14, 7 }
 0x52a   : > { %v5827_v6 = vor.u32 %v5825_v15, %v5824_v24  ;;  %v5848_v15 = vrot.slane %v14352_v40, 7 }
 0x52b   : > { %v5843_v43 = vor.u32 %v14364_v58, %v5840_v8 }
 0x52c   : > { %v5828_v0 = vsel %vm5808_vm4, %v5816_v33, %v5827_v6  ;;  %v5851_v22 = vor.u32 %v14369_v46, %v5848_v15  ;;  %v5860_v25 = vsel %vm5808_vm4, %v5848_v15, %v5859_v29  ;;  %v14432_v33 = vshrl.u32 %v14417_v32, 16  ;;  %v14445_v6 = vld [vmem:[#allocation2 + $0x70] sm:$0xff] }
 0x52d   : > { %15446 = vst [vmem:[#allocation23_spill] sm:$0xff] %v14445_v6  ;;  %v14462_v15 = vshrl.u32 %v14445_v6, 16 }
 0x52e   : > { %v5852_v13 = vsel %vm5808_vm4, %v5840_v8, %v5851_v22  ;;  %v14458_v8 = vld [vmem:[%s15158_s3 + $0x140] sm:$0xff]  }
 0x52f   : > { %10841 = vmatmul.mubr.bf16.gmra.mrb[40].mxu1 %v14194_v50  ;;  %v5820_v50 = vsel %vm5808_vm4, %v5812_v36, %v5819_v44  ;;  %v14436_v36 = vshrl.u32 %v14422_v1, 16  ;;  %v12124_v44 = vld [vmem:[%s15158_s3 + $0x138] sm:$0xff]  }
 0x530   : > { %10844 = vmatprep.mubr.bf16.mxu1 %v14200_v62  ;;  %v5832_v62 = vrot.slane %v14330_v17, 7 }
 0x532   : > { %v5835_v28 = vor.u32 %v14343_v3, %v5832_v62  ;;  %v5844_v51 = vsel %vm5808_vm4, %v5832_v62, %v5843_v43  ;;  %v5896_v62 = vrot.slane %v14436_v36, 7 }
 0x534   : > { %v5836_v47 = vsel %vm5808_vm4, %v5824_v24, %v5835_v28  ;;  %v5888_v24 = vrot.slane %v14432_v33, 7  ;;  %v14448_v28 = vshll.u32 %v14417_v32, 16 }
 0x537   : > { %10845 = vmatmul.mubr.bf16.gmra.mrb[44].mxu1 %v5420_v5  ;;  %v5876_v5 = vsel %vm5808_vm4, %v5864_v39, %v5875_v21  ;;  %v14476_v39 = vshll.u32 %v14445_v6, 16 }
 0x538   : > { %10864 = vmatprep.mubr.bf16.mxu1 %v5820_v50  ;;  %v5884_v50 = vsel %vm5808_vm4, %v5872_v59, %v5883_v23  ;;  %v14495_v23 = vld [vmem:[#allocation2 + $0x90] sm:$0xff] }
 0x539   : > { %15452 = vst [vmem:[#allocation29_spill] sm:$0xff] %v14495_v23 }
 0x53f   : > { %10865 = vmatmul.mubr.bf16.vlgmr.msra.gmra.mrb[0].mxu1 %v5828_v0  ;;  %v14453_v0 = vshll.u32 %v14422_v1, 16 }
 0x540   : > { %10868 = vmatprep.mubr.bf16.mxu1 %v5836_v47  ;;  %10913 = vmatpush3.bf16.msra.mxu1 %v12117_v2  ;;  %v5868_v2 = vsel %vm5808_vm4, %v5856_v56, %v5867_v45  ;;  %v5891_v47 = vor.u32 %v14448_v28, %v5888_v24 }
 0x541   : > { %10914 = vmatprep.subr.bf16.mxu1 %v12118_v7 }
 0x542   : > { %v5892_v22 = vsel %vm5808_vm4, %v5880_v42, %v5891_v47 }
 0x544   : > { %10915 = vmatpush3.bf16.msra.mxu1 %v12118_v7  ;;  %v14450_v7 = vld [vmem:[#allocation2 + $0x78] sm:$0xff] }
 0x545   : > { %10916 = vmatprep.subr.bf16.mxu1 %v12119_v31  ;;  %15447 = vst [vmem:[#allocation24_spill] sm:$0xff] %v14450_v7  ;;  %v14466_v43 = vshrl.u32 %v14450_v7, 16  ;;  %v14481_v29 = vshll.u32 %v14450_v7, 16 }
 0x547   : > { %10869 = vmatmul.mubr.bf16.gmra.mrb[4].mxu1 %v5844_v51  ;;  %v5912_v56 = vrot.slane %v14466_v43, 7 }
 0x548   : > { %10872 = vmatprep.mubr.bf16.mxu1 %v5852_v13  ;;  %10917 = vmatpush3.bf16.msra.mxu1 %v12119_v31  ;;  %v5899_v31 = vor.u32 %v14453_v0, %v5896_v62  ;;  %v14473_v13 = vld [vmem:[#allocation2 + $0x80] sm:$0xff] }
 0x549   : > { %10918 = vmatprep.subr.bf16.mxu1 %v12120_v34  ;;  %15448 = vst [vmem:[#allocation25_spill] sm:$0xff] %v14473_v13 }
 0x54a   : > { %v5900_v51 = vsel %vm5808_vm4, %v5888_v24, %v5899_v31 }
 0x54c   : > { %10919 = vmatpush3.bf16.msra.mxu1 %v12120_v34  ;;  %v5904_v34 = vrot.slane %v14462_v15, 7 }
 0x54d   : > { %10920 = vmatprep.subr.bf16.mxu1 %v12121_v12 }
 0x54e   : > { %v5907_v45 = vor.u32 %v14476_v39, %v5904_v34 }
 0x54f   : > { %10873 = vmatmul.mubr.bf16.gmra.mrb[8].mxu1 %v5860_v25  ;;  %v5915_v25 = vor.u32 %v14481_v29, %v5912_v56 }
 0x550   : > { %10876 = vmatprep.mubr.bf16.mxu1 %v5868_v2  ;;  %10921 = vmatpush3.bf16.msra.mxu1 %v12121_v12  ;;  %v14478_v12 = vld [vmem:[#allocation2 + $0x88] sm:$0xff]  ;;  %v5908_v2 = vsel %vm5808_vm4, %v5896_v62, %v5907_v45  ;;  %v14507_v62 = vshrl.u32 %v14495_v23, 16 }
 0x551   : > { %10922 = vmatprep.subr.bf16.mxu1 %v12122_v60  ;;  %15449 = vst [vmem:[#allocation26_spill] sm:$0xff] %v14478_v12  ;;  %v14489_v59 = vshrl.u32 %v14478_v12, 16  ;;  %v14503_v24 = vshll.u32 %v14478_v12, 16 }
 0x552   : > { %15455 = vst [vmem:[#allocation32_spill] sm:$0xff] %v14507_v62 }
 0x553   : > { %15451 = vst [vmem:[#allocation28_spill] sm:$0xff] %v14489_v59  ;;  %v5928_v21 = vrot.slane %v14489_v59, 7  ;;  %15454 = vst [vmem:[#allocation31_spill] sm:$0xff] %v14503_v24  ;;  %v14583_v59 = vld [vmem:[#allocation2 + $0xd0] sm:$0xff] }
 0x554   : > { %10923 = vmatpush3.bf16.msra.mxu1 %v12122_v60  ;;  %v14485_v60 = vshrl.u32 %v14473_v13, 16  ;;  %15475 = vst [vmem:[#allocation7_spill] sm:$0xff] %v14583_v59 }
 0x555   : > { %10924 = vmatprep.subr.bf16.mxu1 %v12123_v30  ;;  %v5931_v47 = vor.u32 %v14503_v24, %v5928_v21 }
 0x556   : > { %15450 = vst [vmem:[#allocation27_spill] sm:$0xff] %v14485_v60  ;;  %v5920_v42 = vrot.slane %v14485_v60, 7  ;;  %v14566_v60 = vld [vmem:[#allocation2 + $0xc8] sm:$0xff] }
 0x557   : > { %10877 = vmatmul.mubr.bf16.gmra.mrb[12].mxu1 %v5876_v5  ;;  %v14500_v5 = vld [vmem:[#allocation2 + $0x98] sm:$0xff]  ;;  %15471 = vst [vmem:[#allocation3_spill] sm:$0xff] %v14566_v60 }
 0x558   : > { %10880 = vmatprep.mubr.bf16.mxu1 %v5884_v50  ;;  %10925 = vmatpush3.bf16.msra.mxu1 %v12123_v30  ;;  %v5916_v30 = vsel %vm5808_vm4, %v5904_v34, %v5915_v25  ;;  %15453 = vst [vmem:[#allocation30_spill] sm:$0xff] %v14500_v5  ;;  %v14511_v31 = vshrl.u32 %v14500_v5, 16  ;;  %v5936_v34 = vrot.slane %v14507_v62, 7  ;;  %v14517_v25 = vld [vmem:[#allocation2 + $0xa0] sm:$0xff]  ;;  %v14525_v52 = vshll.u32 %v14500_v5, 16 }
 0x559   : > { %10926 = vmatprep.subr.bf16.mxu1 %v12124_v44  ;;  %15457 = vst [vmem:[#allocation34_spill] sm:$0xff] %v14517_v25  ;;  %v14542_v62 = vshll.u32 %v14517_v25, 16 }
 0x55a   : > { %15456 = vst [vmem:[#allocation33_spill] sm:$0xff] %v14511_v31  ;;  %v5944_v45 = vrot.slane %v14511_v31, 7  ;;  %15460 = vst [vmem:[#allocation37_spill] sm:$0xff] %v14525_v52  ;;  %v14544_v31 = vld [vmem:[#allocation2 + $0xb8] sm:$0xff] }
 0x55b   : > { %15464 = vst [vmem:[#allocation41_spill] sm:$0xff] %v14542_v62  ;;  %15465 = vst [vmem:[#allocation42_spill] sm:$0xff] %v14544_v31 }
 0x55c   : > { %10927 = vmatpush3.bf16.msra.mxu1 %v12124_v44  ;;  %v14498_v44 = vshll.u32 %v14473_v13, 16 }
 0x55d   : > { %10976 = vmatprep.subr.bf16.mxu1 %v14458_v8 }
 0x55e   : > { %v5923_v50 = vor.u32 %v14498_v44, %v5920_v42 }
 0x55f   : > { %10881 = vmatmul.mubr.bf16.gmra.mrb[16].mxu1 %v5892_v22 }
 0x560   : > { %10884 = vmatprep.mubr.bf16.mxu1 %v5900_v51  ;;  %v5924_v22 = vsel %vm5808_vm4, %v5912_v56, %v5923_v50  ;;  %v5932_v51 = vsel %vm5808_vm4, %v5920_v42, %v5931_v47  ;;  %v14529_v50 = vshrl.u32 %v14517_v25, 16  ;;  %v5947_v42 = vor.u32 %v14525_v52, %v5944_v45 }
 0x562   : > { %15461 = vst [vmem:[#allocation38_spill] sm:$0xff] %v14529_v50  ;;  %v5948_v20 = vsel %vm5808_vm4, %v5936_v34, %v5947_v42  ;;  %v14555_v42 = vshrl.u32 %v14544_v31, 16 }
 0x564   : > { %15468 = vst [vmem:[#allocation9_spill] sm:$0xff] %v14555_v42 }
 0x567   : > { %10885 = vmatmul.mubr.bf16.gmra.mrb[20].mxu1 %v5908_v2  ;;  %v14520_v2 = vshll.u32 %v14495_v23, 16 }
 0x568   : > { %10888 = vmatprep.mubr.bf16.mxu1 %v5916_v30  ;;  %v14522_v30 = vld [vmem:[#allocation2 + $0xa8] sm:$0xff] }
 0x569   : > { %15458 = vst [vmem:[#allocation35_spill] sm:$0xff] %v14520_v2  ;;  %15459 = vst [vmem:[#allocation36_spill] sm:$0xff] %v14522_v30  ;;  %v5939_v56 = vor.u32 %v14520_v2, %v5936_v34  ;;  %v14533_v47 = vshrl.u32 %v14522_v30, 16  ;;  %v14547_v52 = vshll.u32 %v14522_v30, 16  ;;  %v14561_v2 = vld [vmem:[#allocation2 + $0xc0] sm:$0xff] }
 0x56a   : > { %15469 = vst [vmem:[#allocation10_spill] sm:$0xff] %v14561_v2 }
 0x56b   : > { %15462 = vst [vmem:[#allocation39_spill] sm:$0xff] %v14533_v47  ;;  %v5960_v16 = vrot.slane %v14533_v47, 7  ;;  %15466 = vst [vmem:[#allocation43_spill] sm:$0xff] %v14547_v52  ;;  %v5976_v47 = vrot.slane %v14555_v42, 7 }
 0x56d   : > { %v5963_v34 = vor.u32 %v14547_v52, %v5960_v16  ;;  %v14569_v52 = vshll.u32 %v14544_v31, 16 }
 0x56f   : > { %10889 = vmatmul.mubr.bf16.gmra.mrb[24].mxu1 %v5924_v22  ;;  %v5940_v22 = vsel %vm5808_vm4, %v5928_v21, %v5939_v56  ;;  %v14551_v56 = vshrl.u32 %v14539_v54, 16  ;;  %15472 = vst [vmem:[#allocation4_spill] sm:$0xff] %v14569_v52 }
 0x570   : > { %10892 = vmatprep.mubr.bf16.mxu1 %v5932_v51  ;;  %v5952_v51 = vrot.slane %v14529_v50, 7 }
 0x571   : > { %15467 = vst [vmem:[#allocation8_spill] sm:$0xff] %v14551_v56 }
 0x572   : > { %v5955_v21 = vor.u32 %v14542_v62, %v5952_v51  ;;  %v5964_v50 = vsel %vm5808_vm4, %v5952_v51, %v5963_v34  ;;  %v14564_v62 = vshll.u32 %v14539_v54, 16  ;;  %v5979_v51 = vor.u32 %v14569_v52, %v5976_v47 }
 0x573   : > { %v14577_v34 = vshrl.u32 %v14566_v60, 16  ;;  %v14589_v52 = vshll.u32 %v14566_v60, 16 }
 0x574   : > { %15470 = vst [vmem:[#allocation11_spill] sm:$0xff] %v14564_v62 }
 0x575   : > { %15474 = vst [vmem:[#allocation6_spill] sm:$0xff] %v14577_v34  ;;  %v5992_v42 = vrot.slane %v14577_v34, 7 }
 0x577   : > { %10893 = vmatmul.mubr.bf16.gmra.mrb[28].mxu1 %v5940_v22  ;;  %v5968_v22 = vrot.slane %v14551_v56, 7 }
 0x578   : > { %10896 = vmatprep.mubr.bf16.mxu1 %v5948_v20  ;;  %v5956_v20 = vsel %vm5808_vm4, %v5944_v45, %v5955_v21  ;;  %v14573_v21 = vshrl.u32 %v14561_v2, 16 }
 0x579   : > { %v5971_v45 = vor.u32 %v14564_v62, %v5968_v22  ;;  %v5980_v56 = vsel %vm5808_vm4, %v5968_v22, %v5979_v51  ;;  %v14586_v62 = vshll.u32 %v14561_v2, 16 }
 0x57a   : > { %15473 = vst [vmem:[#allocation5_spill] sm:$0xff] %v14573_v21 }
 0x57f   : > { %10897 = vmatmul.mubr.bf16.gmra.mrb[32].mxu1 %v5956_v20  ;;  %v5984_v20 = vrot.slane %v14573_v21, 7 }
 0x580   : > { %10900 = vmatprep.mubr.bf16.mxu1 %v5964_v50  ;;  %v5972_v50 = vsel %vm5808_vm4, %v5960_v16, %v5971_v45  ;;  %v14593_v16 = vshrl.u32 %v14583_v59, 16  ;;  %v5995_v45 = vor.u32 %v14589_v52, %v5992_v42 }
 0x581   : > { %v5987_v24 = vor.u32 %v14586_v62, %v5984_v20 }
 0x582   : > { %v6000_v51 = vrot.slane %v14593_v16, 7 }
 0x583   : > { %v5988_v22 = vsel %vm5808_vm4, %v5976_v47, %v5987_v24  ;;  %v12126_v24 = vld [vmem:[%s15158_s3 + $0x148] sm:$0xff]   ;;  %v12127_v47 = vld [vmem:[%s15158_s3 + $0x150] sm:$0xff]  }
 0x587   : > { %10901 = vmatmul.mubr.bf16.gmra.mrb[36].mxu1 %v5972_v50  ;;  %v14600_v50 = vshll.u32 %v14583_v59, 16 }
 0x588   : > { %10904 = vmatprep.mubr.bf16.mxu1 %v5980_v56  ;;  %v5996_v56 = vsel %vm5808_vm4, %v5984_v20, %v5995_v45  ;;  %v6749_v20 = vrot.slane %v14343_v3, 1 }
 0x589   : > { %15476 = vst [vmem:[#allocation44_spill] sm:$0xff] %v14600_v50  ;;  %v6003_v21 = vor.u32 %v14600_v50, %v6000_v51  ;;  %v12134_v51 = vld [vmem:[%s15158_s3 + $0x188] sm:$0xff]  }
 0x58a   : > { %v6753_v45 = vor.u32 %v6749_v20, %v14330_v17 }
 0x58b   : > { %v6004_v34 = vsel %vm5808_vm4, %v5992_v42, %v6003_v21  ;;  %v12131_v42 = vld [vmem:[%s15158_s3 + $0x170] sm:$0xff]   ;;  %v12132_v21 = vld [vmem:[%s15158_s3 + $0x178] sm:$0xff]  }
 0x58f   : > { %10905 = vmatmul.mubr.bf16.gmra.mrb[40].mxu1 %v5988_v22  ;;  %v6757_v22 = vrot.slane %v14364_v58, 1 }
 0x590   : > { %10908 = vmatprep.mubr.bf16.mxu1 %v5996_v56  ;;  %v6750_v56 = vsel %vm6730_vm3, %v14245_v18, %v6749_v20  ;;  %v12136_v18 = vld [vmem:[%s15158_s3 + $0x198] sm:$0xff]   ;;  %v12137_v20 = vld [vmem:[%s15158_s3 + $0x1a0] sm:$0xff]  }
 0x597   : > { %10909 = vmatmul.mubr.bf16.gmra.mrb[44].mxu1 %v6004_v34  ;;  %v12133_v34 = vld [vmem:[%s15158_s3 + $0x180] sm:$0xff]  }
 0x598   : > { %10928 = vmatprep.mubr.bf16.mxu1 %v14224_v26  ;;  %v12128_v26 = vld [vmem:[%s15158_s3 + $0x158] sm:$0xff]  }
 0x59f   : > { %10929 = vmatmul.mubr.bf16.vlgmr.msra.gmra.mrb[0].mxu1 %v14226_v37  ;;  %v12129_v37 = vld [vmem:[%s15158_s3 + $0x160] sm:$0xff]  }
 0x5a0   : > { %10932 = vmatprep.mubr.bf16.mxu1 %v14325_v10  ;;  %10977 = vmatpush3.bf16.msra.mxu1 %v14458_v8  ;;  %v12130_v8 = vld [vmem:[%s15158_s3 + $0x168] sm:$0xff]  }
 0x5a1   : > { %10978 = vmatprep.subr.bf16.mxu1 %v12126_v24 }
 0x5a4   : > { %10979 = vmatpush3.bf16.msra.mxu1 %v12126_v24  ;;  %v6758_v24 = vsel %vm6730_vm3, %v6753_v45, %v6757_v22 }
 0x5a5   : > { %10980 = vmatprep.subr.bf16.mxu1 %v12127_v47 }
 0x5a7   : > { %10933 = vmatmul.mubr.bf16.gmra.mrb[4].mxu1 %v14338_v19 }
 0x5a8   : > { %10936 = vmatprep.mubr.bf16.mxu1 %v14340_v27  ;;  %10981 = vmatpush3.bf16.msra.mxu1 %v12127_v47  ;;  %v6765_v47 = vrot.slane %v14369_v46, 1 }
 0x5a9   : > { %10982 = vmatprep.subr.bf16.mxu1 %v12128_v26 }
 0x5ac   : > { %10983 = vmatpush3.bf16.msra.mxu1 %v12128_v26  ;;  %v6769_v26 = vor.u32 %v6765_v47, %v14352_v40 }
 0x5ad   : > { %10984 = vmatprep.subr.bf16.mxu1 %v12129_v37 }
 0x5af   : > { %10937 = vmatmul.mubr.bf16.gmra.mrb[8].mxu1 %v14361_v41 }
 0x5b0   : > { %10940 = vmatprep.mubr.bf16.mxu1 %v14366_v35  ;;  %10985 = vmatpush3.bf16.msra.mxu1 %v12129_v37  ;;  %v6761_v37 = vor.u32 %v6757_v22, %v14348_v14 }
 0x5b1   : > { %10986 = vmatprep.subr.bf16.mxu1 %v12130_v8 }
 0x5b4   : > { %10987 = vmatpush3.bf16.msra.mxu1 %v12130_v8  ;;  %v6773_v8 = vrot.slane %v14392_v49, 1 }
 0x5b5   : > { %10988 = vmatprep.subr.bf16.mxu1 %v12131_v42 }
 0x5b6   : > { %v6777_v22 = vor.u32 %v6773_v8, %v14376_v63 }
 0x5b7   : > { %10941 = vmatmul.mubr.bf16.gmra.mrb[12].mxu1 %v14389_v61 }
 0x5b8   : > { %10944 = vmatprep.mubr.bf16.mxu1 %v14394_v48  ;;  %10989 = vmatpush3.bf16.msra.mxu1 %v12131_v42  ;;  %v6766_v42 = vsel %vm6730_vm3, %v6761_v37, %v6765_v47  ;;  %v6917_v48 = vrot.slane %v14600_v50, 1 }
 0x5b9   : > { %10990 = vmatprep.subr.bf16.mxu1 %v12132_v21 }
 0x5ba   : > { %v6921_v27 = vor.u32 %v6917_v48, %v14593_v16 }
 0x5bc   : > { %10991 = vmatpush3.bf16.msra.mxu1 %v12132_v21  ;;  %v6774_v21 = vsel %vm6730_vm3, %v6769_v26, %v6773_v8  ;;  %v12139_v26 = vld [vmem:[%s15158_s3 + $0x1b0] sm:$0xff]  }
 0x5bd   : > { %11040 = vmatprep.subr.bf16.mxu1 %v12133_v34 }
 0x5bf   : > { %10945 = vmatmul.mubr.bf16.gmra.mrb[16].mxu1 %v14417_v32  ;;  %v15493_v32 = vld [vmem:[#allocation5_spill] sm:$0xff] }
 0x5c0   : > { %10948 = vmatprep.mubr.bf16.mxu1 %v14422_v1  ;;  %v6909_v1 = vrot.slane %v14589_v52, 1 }
 0x5c7   : > { %10949 = vmatmul.mubr.bf16.gmra.mrb[20].mxu1 %v14445_v6 }
 0x5c8   : > { %10952 = vmatprep.mubr.bf16.mxu1 %v14450_v7 }
 0x5cf   : > { %10953 = vmatmul.mubr.bf16.gmra.mrb[24].mxu1 %v14473_v13  ;;  %v15489_v13 = vld [vmem:[#allocation4_spill] sm:$0xff] }
 0x5d0   : > { %10956 = vmatprep.mubr.bf16.mxu1 %v14478_v12  ;;  %v6893_v7 = vrot.slane %v15489_v13, 1 }
 0x5d7   : > { %10957 = vmatmul.mubr.bf16.gmra.mrb[28].mxu1 %v14495_v23  ;;  %v15488_v23 = vld [vmem:[#allocation11_spill] sm:$0xff] }
 0x5d8   : > { %10960 = vmatprep.mubr.bf16.mxu1 %v14500_v5 }
 0x5df   : > { %10961 = vmatmul.mubr.bf16.gmra.mrb[32].mxu1 %v14517_v25  ;;  %v15485_v25 = vld [vmem:[#allocation43_spill] sm:$0xff] }
 0x5e0   : > { %10964 = vmatprep.mubr.bf16.mxu1 %v14522_v30  ;;  %v6877_v5 = vrot.slane %v15485_v25, 1 }
 0x5e7   : > { %10965 = vmatmul.mubr.bf16.gmra.mrb[36].mxu1 %v14539_v54  ;;  %v15484_v54 = vld [vmem:[#allocation41_spill] sm:$0xff] }
 0x5e8   : > { %10968 = vmatprep.mubr.bf16.mxu1 %v14544_v31 }
 0x5ef   : > { %10969 = vmatmul.mubr.bf16.gmra.mrb[40].mxu1 %v14561_v2  ;;  %v15481_v2 = vld [vmem:[#allocation37_spill] sm:$0xff] }
 0x5f0   : > { %10972 = vmatprep.mubr.bf16.mxu1 %v14566_v60  ;;  %v6861_v31 = vrot.slane %v15481_v2, 1 }
 0x5f7   : > { %10973 = vmatmul.mubr.bf16.gmra.mrb[44].mxu1 %v14583_v59  ;;  %v15480_v59 = vld [vmem:[#allocation35_spill] sm:$0xff] }
 0x5f8   : > { %10992 = vmatprep.mubr.bf16.mxu1 %v14250_v55  ;;  %v12135_v55 = vld [vmem:[%s15158_s3 + $0x190] sm:$0xff]  }
 0x5ff   : > { %10993 = vmatmul.mubr.bf16.vlgmr.msra.gmra.mrb[0].mxu1 %v6750_v56  ;;  %v12138_v56 = vld [vmem:[%s15158_s3 + $0x1a8] sm:$0xff]  }
 0x600   : > { %10996 = vmatprep.mubr.bf16.mxu1 %v6758_v24  ;;  %11041 = vmatpush3.bf16.msra.mxu1 %v12133_v34  ;;  %v6781_v34 = vrot.slane %v14397_v57, 1 }
 0x601   : > { %11042 = vmatprep.subr.bf16.mxu1 %v12134_v51 }
 0x602   : > { %v6785_v45 = vor.u32 %v6781_v34, %v14380_v4  ;;  %v6782_v24 = vsel %vm6730_vm3, %v6777_v22, %v6781_v34 }
 0x604   : > { %11043 = vmatpush3.bf16.msra.mxu1 %v12134_v51  ;;  %v6789_v51 = vrot.slane %v14420_v53, 1 }
 0x605   : > { %11044 = vmatprep.subr.bf16.mxu1 %v12135_v55 }
 0x606   : > { %v6790_v47 = vsel %vm6730_vm3, %v6785_v45, %v6789_v51  ;;  %v6793_v8 = vor.u32 %v6789_v51, %v14404_v9  ;;  %v14703_v45 = vld [vmem:[%s15158_s3 + $0x1c0] sm:$0xff]  }
 0x607   : > { %10997 = vmatmul.mubr.bf16.gmra.mrb[4].mxu1 %v6766_v42  ;;  %v12140_v42 = vld [vmem:[%s15158_s3 + $0x1b8] sm:$0xff]  }
 0x608   : > { %11000 = vmatprep.mubr.bf16.mxu1 %v6774_v21  ;;  %11045 = vmatpush3.bf16.msra.mxu1 %v12135_v55  ;;  %v6797_v55 = vrot.slane %v14425_v38, 1 }
 0x609   : > { %11046 = vmatprep.subr.bf16.mxu1 %v12136_v18 }
 0x60a   : > { %v6801_v37 = vor.u32 %v6797_v55, %v14408_v11  ;;  %v6798_v21 = vsel %vm6730_vm3, %v6793_v8, %v6797_v55  ;;  %v6829_v55 = vrot.slane %v14481_v29, 1  ;;  %v6837_v8 = vrot.slane %v14498_v44, 1 }
 0x60c   : > { %11047 = vmatpush3.bf16.msra.mxu1 %v12136_v18  ;;  %v6805_v18 = vrot.slane %v14448_v28, 1 }
 0x60d   : > { %11048 = vmatprep.subr.bf16.mxu1 %v12137_v20 }
 0x60e   : > { %v6806_v34 = vsel %vm6730_vm3, %v6801_v37, %v6805_v18  ;;  %v6809_v51 = vor.u32 %v6805_v18, %v14432_v33 }
 0x60f   : > { %11001 = vmatmul.mubr.bf16.gmra.mrb[8].mxu1 %v6782_v24 }
 0x610   : > { %11004 = vmatprep.mubr.bf16.mxu1 %v6790_v47  ;;  %11049 = vmatpush3.bf16.msra.mxu1 %v12137_v20  ;;  %v6813_v20 = vrot.slane %v14453_v0, 1 }
 0x611   : > { %11050 = vmatprep.subr.bf16.mxu1 %v12138_v56 }
 0x612   : > { %v6817_v22 = vor.u32 %v6813_v20, %v14436_v36  ;;  %v6814_v24 = vsel %vm6730_vm3, %v6809_v51, %v6813_v20  ;;  %v15478_v20 = vld [vmem:[#allocation28_spill] sm:$0xff] }
 0x614   : > { %11051 = vmatpush3.bf16.msra.mxu1 %v12138_v56  ;;  %v6821_v56 = vrot.slane %v14476_v39, 1 }
 0x615   : > { %11052 = vmatprep.subr.bf16.mxu1 %v12139_v26 }
 0x616   : > { %v6822_v47 = vsel %vm6730_vm3, %v6817_v22, %v6821_v56  ;;  %v6825_v37 = vor.u32 %v6821_v56, %v14462_v15  ;;  %v15479_v22 = vld [vmem:[#allocation27_spill] sm:$0xff] }
 0x617   : > { %11005 = vmatmul.mubr.bf16.gmra.mrb[12].mxu1 %v6798_v21  ;;  %v15477_v21 = vld [vmem:[#allocation31_spill] sm:$0xff] }
 0x618   : > { %11008 = vmatprep.mubr.bf16.mxu1 %v6806_v34  ;;  %11053 = vmatpush3.bf16.msra.mxu1 %v12139_v26  ;;  %v6833_v26 = vor.u32 %v6829_v55, %v14466_v43  ;;  %v6830_v18 = vsel %vm6730_vm3, %v6825_v37, %v6829_v55  ;;  %v6845_v34 = vrot.slane %v15477_v21, 1  ;;  %v15482_v55 = vld [vmem:[#allocation33_spill] sm:$0xff] }
 0x619   : > { %11054 = vmatprep.subr.bf16.mxu1 %v12140_v42  ;;  %v6865_v37 = vor.u32 %v6861_v31, %v15482_v55 }
 0x61a   : > { %v6849_v51 = vor.u32 %v6845_v34, %v15478_v20 }
 0x61c   : > { %11055 = vmatpush3.bf16.msra.mxu1 %v12140_v42  ;;  %v6838_v42 = vsel %vm6730_vm3, %v6833_v26, %v6837_v8  ;;  %v15483_v26 = vld [vmem:[#allocation32_spill] sm:$0xff] }
 0x61d   : > { %11104 = vmatprep.subr.bf16.mxu1 %v14703_v45 }
 0x61f   : > { %11009 = vmatmul.mubr.bf16.gmra.mrb[16].mxu1 %v6814_v24  ;;  %v6841_v24 = vor.u32 %v6837_v8, %v15479_v22 }
 0x620   : > { %11012 = vmatprep.mubr.bf16.mxu1 %v6822_v47  ;;  %v6853_v47 = vrot.slane %v15480_v59, 1 }
 0x621   : > { %v6846_v60 = vsel %vm6730_vm3, %v6841_v24, %v6845_v34 }
 0x622   : > { %v6854_v56 = vsel %vm6730_vm3, %v6849_v51, %v6853_v47  ;;  %v15487_v51 = vld [vmem:[#allocation38_spill] sm:$0xff] }
 0x627   : > { %11013 = vmatmul.mubr.bf16.gmra.mrb[20].mxu1 %v6830_v18  ;;  %v6857_v18 = vor.u32 %v6853_v47, %v15483_v26 }
 0x628   : > { %11016 = vmatprep.mubr.bf16.mxu1 %v6838_v42  ;;  %v6869_v42 = vrot.slane %v15484_v54, 1 }
 0x629   : > { %v6862_v30 = vsel %vm6730_vm3, %v6857_v18, %v6861_v31  ;;  %v15490_v31 = vld [vmem:[#allocation9_spill] sm:$0xff] }
 0x62a   : > { %v6870_v8 = vsel %vm6730_vm3, %v6865_v37, %v6869_v42  ;;  %v6873_v24 = vor.u32 %v6869_v42, %v15487_v51  ;;  %v15491_v37 = vld [vmem:[#allocation8_spill] sm:$0xff] }
 0x62c   : > { %v6878_v12 = vsel %vm6730_vm3, %v6873_v24, %v6877_v5  ;;  %v6712_v24 = vld [vmem:[#allocation2 + $0xd8] sm:$0x1] }
 0x62d   : > { %v6923_v41 = vshll.u32 %v6712_v24, 16  ;;  %v7343_v24 = vrot.slane %v14352_v40, 3 }
 0x62f   : > { %11017 = vmatmul.mubr.bf16.gmra.mrb[24].mxu1 %v6846_v60  ;;  %v15486_v60 = vld [vmem:[#allocation39_spill] sm:$0xff] }
 0x630   : > { %11020 = vmatprep.mubr.bf16.mxu1 %v6854_v56  ;;  %v6881_v34 = vor.u32 %v6877_v5, %v15486_v60  ;;  %v6885_v56 = vrot.slane %v15488_v23, 1  ;;  %v15492_v5 = vld [vmem:[#allocation6_spill] sm:$0xff] }
 0x632   : > { %v6886_v47 = vsel %vm6730_vm3, %v6881_v34, %v6885_v56  ;;  %v6889_v18 = vor.u32 %v6885_v56, %v15491_v37  ;;  %v6913_v34 = vor.u32 %v6909_v1, %v15492_v5 }
 0x634   : > { %v6894_v6 = vsel %vm6730_vm3, %v6889_v18, %v6893_v7 }
 0x637   : > { %11021 = vmatmul.mubr.bf16.gmra.mrb[28].mxu1 %v6862_v30  ;;  %v6897_v30 = vor.u32 %v6893_v7, %v15490_v31  ;;  %v7325_v7 = vrot.slane %v14330_v17, 3 }
 0x638   : > { %11024 = vmatprep.mubr.bf16.mxu1 %v6870_v8  ;;  %v6901_v8 = vrot.slane %v14586_v62, 1 }
 0x63a   : > { %v6902_v42 = vsel %vm6730_vm3, %v6897_v30, %v6901_v8  ;;  %v7328_v30 = vrot.slane %v14343_v3, 4 }
 0x63c   : > { %v7329_v19 = vor.u32 %v7328_v30, %v7325_v7  ;;  %v7361_v7 = vrot.slane %v14380_v4, 3  ;;  %v7364_v30 = vrot.slane %v14397_v57, 4 }
 0x63f   : > { %11025 = vmatmul.mubr.bf16.gmra.mrb[32].mxu1 %v6878_v12  ;;  %v7272_v12 = vld [vmem:[#allocation2 + $0x20] sm:$0xf8] }
 0x640   : > { %11028 = vmatprep.mubr.bf16.mxu1 %v6886_v47  ;;  %v6905_v47 = vor.u32 %v6901_v8, %v15493_v32  ;;  %v7315_v61 = vshrl.u32 %v7272_v12, 16  ;;  %v7318_v56 = vshll.u32 %v7272_v12, 16  ;;  %v6925_v8 = vrot.slane %v6923_v41, 1  ;;  %v12142_v41 = vld [vmem:[%s15158_s3 + $0x1c8] sm:$0xff]  }
 0x642   : > { %v6910_v35 = vsel %vm6730_vm3, %v6905_v47, %v6909_v1  ;;  %v7317_v18 = vrot.slane %v7315_v61, 3  ;;  %v6926_v12 = vsel %vm6730_vm3, %v6921_v27, %v6925_v8  ;;  %v7334_v1 = vrot.slane %v14348_v14, 3  ;;  %v12144_v8 = vld [vmem:[%s15158_s3 + $0x1d8] sm:$0xff]  }
 0x643   : > { %v7346_v47 = vrot.slane %v14369_v46, 4 }
 0x647   : > { %11029 = vmatmul.mubr.bf16.gmra.mrb[36].mxu1 %v6894_v6  ;;  %v6918_v6 = vsel %vm6730_vm3, %v6913_v34, %v6917_v48  ;;  %v7352_v48 = vrot.slane %v14376_v63, 3 }
 0x648   : > { %11032 = vmatprep.mubr.bf16.mxu1 %v6902_v42  ;;  %v7320_v42 = vrot.slane %v7318_v56, 4  ;;  %v7347_v56 = vor.u32 %v7346_v47, %v7343_v24  ;;  %v7382_v24 = vrot.slane %v14425_v38, 4  ;;  %v12145_v47 = vld [vmem:[%s15158_s3 + $0x1e0] sm:$0xff]  }
 0x64a   : > { %v7321_v10 = vor.u32 %v7320_v42, %v7317_v18  ;;  %v12143_v18 = vld [vmem:[%s15158_s3 + $0x1d0] sm:$0xff]   ;;  %v7365_v42 = vor.u32 %v7364_v30, %v7361_v7  ;;  %v7397_v7 = vrot.slane %v14436_v36, 3  ;;  %v7400_v30 = vrot.slane %v14453_v0, 4 }
 0x64c   : > { %v7330_v34 = vsel %vm4771_vm1, %v7321_v10, %v7329_v19 }
 0x64f   : > { %11033 = vmatmul.mubr.bf16.gmra.mrb[40].mxu1 %v6910_v35  ;;  %v7337_v35 = vrot.slane %v14364_v58, 4 }
 0x650   : > { %11036 = vmatprep.mubr.bf16.mxu1 %v6918_v6  ;;  %v7355_v6 = vrot.slane %v14392_v49, 4 }
 0x651   : > { %v7338_v61 = vor.u32 %v7337_v35, %v7334_v1  ;;  %v7370_v1 = vrot.slane %v14404_v9, 3  ;;  %v7373_v35 = vrot.slane %v14420_v53, 4 }
 0x653   : > { %v7339_v27 = vsel %vm4771_vm1, %v7329_v19, %v7338_v61  ;;  %v7348_v10 = vsel %vm4771_vm1, %v7338_v61, %v7347_v56  ;;  %v7356_v19 = vor.u32 %v7355_v6, %v7352_v48  ;;  %v7374_v61 = vor.u32 %v7373_v35, %v7370_v1 }
 0x654   : > { %v7388_v48 = vrot.slane %v14432_v33, 3  ;;  %v7391_v6 = vrot.slane %v14448_v28, 4  ;;  %v7406_v1 = vrot.slane %v14462_v15, 3  ;;  %v7409_v35 = vrot.slane %v14476_v39, 4 }
 0x657   : > { %11037 = vmatmul.mubr.bf16.gmra.mrb[44].mxu1 %v6926_v12  ;;  %v7357_v12 = vsel %vm4771_vm1, %v7347_v56, %v7356_v19 }
 0x658   : > { %11056 = vmatprep.mubr.bf16.mxu1 %v7330_v34  ;;  %v7379_v34 = vrot.slane %v14408_v11, 3 }
 0x65a   : > { %v7383_v56 = vor.u32 %v7382_v24, %v7379_v34  ;;  %v7415_v34 = vrot.slane %v14466_v43, 3  ;;  %v7418_v24 = vrot.slane %v14481_v29, 4 }
 0x65f   : > { %11057 = vmatmul.mubr.bf16.vlgmr.msra.gmra.mrb[0].mxu1 %v7339_v27  ;;  %v7375_v27 = vsel %vm4771_vm1, %v7365_v42, %v7374_v61 }
 0x660   : > { %11060 = vmatprep.mubr.bf16.mxu1 %v7348_v10  ;;  %11105 = vmatpush3.bf16.msra.mxu1 %v14703_v45  ;;  %v7366_v45 = vsel %vm4771_vm1, %v7356_v19, %v7365_v42  ;;  %v7384_v10 = vsel %vm4771_vm1, %v7374_v61, %v7383_v56  ;;  %v7392_v19 = vor.u32 %v7391_v6, %v7388_v48  ;;  %v7427_v48 = vrot.slane %v14498_v44, 4 }
 0x661   : > { %11106 = vmatprep.subr.bf16.mxu1 %v12142_v41  ;;  %v7401_v42 = vor.u32 %v7400_v30, %v7397_v7  ;;  %v7410_v61 = vor.u32 %v7409_v35, %v7406_v1  ;;  %v7436_v7 = vrot.slane %v15477_v21, 4  ;;  %v7451_v1 = vrot.slane %v15482_v55, 3 }
 0x662   : > { %v7454_v35 = vrot.slane %v15481_v2, 4 }
 0x664   : > { %11107 = vmatpush3.bf16.msra.mxu1 %v12142_v41  ;;  %v12146_v41 = vld [vmem:[%s15158_s3 + $0x1e8] sm:$0xff]  }
 0x665   : > { %11108 = vmatprep.subr.bf16.mxu1 %v12143_v18 }
 0x667   : > { %11061 = vmatmul.mubr.bf16.gmra.mrb[4].mxu1 %v7357_v12  ;;  %v7393_v12 = vsel %vm4771_vm1, %v7383_v56, %v7392_v19  ;;  %v7419_v56 = vor.u32 %v7418_v24, %v7415_v34  ;;  %v7455_v34 = vor.u32 %v7454_v35, %v7451_v1 }
 0x668   : > { %11064 = vmatprep.mubr.bf16.mxu1 %v7366_v45  ;;  %11109 = vmatpush3.bf16.msra.mxu1 %v12143_v18  ;;  %v12147_v18 = vld [vmem:[%s15158_s3 + $0x1f0] sm:$0xff]   ;;  %v7402_v45 = vsel %vm4771_vm1, %v7392_v19, %v7401_v42 }
 0x669   : > { %11110 = vmatprep.subr.bf16.mxu1 %v12144_v8  ;;  %v7420_v6 = vsel %vm4771_vm1, %v7410_v61, %v7419_v56 }
 0x66c   : > { %11111 = vmatpush3.bf16.msra.mxu1 %v12144_v8  ;;  %v12148_v8 = vld [vmem:[%s15158_s3 + $0x1f8] sm:$0xff]  }
 0x66d   : > { %11112 = vmatprep.subr.bf16.mxu1 %v12145_v47 }
 0x66f   : > { %11065 = vmatmul.mubr.bf16.gmra.mrb[8].mxu1 %v7375_v27  ;;  %v7424_v27 = vrot.slane %v15479_v22, 3 }
 0x670   : > { %11068 = vmatprep.mubr.bf16.mxu1 %v7384_v10  ;;  %11113 = vmatpush3.bf16.msra.mxu1 %v12145_v47  ;;  %v14805_v47 = vld [vmem:[%s15158_s3 + $0x200] sm:$0xff]   ;;  %v7433_v10 = vrot.slane %v15478_v20, 3 }
 0x671   : > { %11114 = vmatprep.subr.bf16.mxu1 %v12146_v41  ;;  %v7428_v30 = vor.u32 %v7427_v48, %v7424_v27  ;;  %v7469_v27 = vrot.slane %v15486_v60, 3  ;;  %v7472_v48 = vrot.slane %v15485_v25, 4 }
 0x673   : > { %v7429_v19 = vsel %vm4771_vm1, %v7419_v56, %v7428_v30  ;;  %v7463_v56 = vrot.slane %v15484_v54, 4 }
 0x674   : > { %11115 = vmatpush3.bf16.msra.mxu1 %v12146_v41  ;;  %v7411_v41 = vsel %vm4771_vm1, %v7401_v42, %v7410_v61  ;;  %v7445_v42 = vrot.slane %v15480_v59, 4  ;;  %v7460_v61 = vrot.slane %v15487_v51, 3 }
 0x675   : > { %11116 = vmatprep.subr.bf16.mxu1 %v12147_v18 }
 0x677   : > { %11069 = vmatmul.mubr.bf16.gmra.mrb[12].mxu1 %v7393_v12 }
 0x678   : > { %11072 = vmatprep.mubr.bf16.mxu1 %v7402_v45  ;;  %11117 = vmatpush3.bf16.msra.mxu1 %v12147_v18  ;;  %v7437_v18 = vor.u32 %v7436_v7, %v7433_v10  ;;  %v7473_v10 = vor.u32 %v7472_v48, %v7469_v27  ;;  %v14838_v48 = vld [vmem:[#allocation2 + $0xe0] sm:$0xf] }
 0x679   : > { %11118 = vmatprep.subr.bf16.mxu1 %v12148_v8 }
 0x67a   : > { %v7438_v12 = vsel %vm4771_vm1, %v7428_v30, %v7437_v18  ;;  %v7478_v30 = vrot.slane %v15491_v37, 3 }
 0x67c   : > { %11119 = vmatpush3.bf16.msra.mxu1 %v12148_v8  ;;  %v7442_v8 = vrot.slane %v15483_v26, 3 }
 0x67d   : > { %11168 = vmatprep.subr.bf16.mxu1 %v14805_v47 }
 0x67e   : > { %v7446_v45 = vor.u32 %v7445_v42, %v7442_v8  ;;  %v7487_v8 = vrot.slane %v15490_v31, 3  ;;  %v7490_v42 = vrot.slane %v15489_v13, 4 }
 0x67f   : > { %11073 = vmatmul.mubr.bf16.gmra.mrb[16].mxu1 %v7411_v41 }
 0x680   : > { %11076 = vmatprep.mubr.bf16.mxu1 %v7420_v6  ;;  %v7447_v24 = vsel %vm4771_vm1, %v7437_v18, %v7446_v45  ;;  %v7456_v41 = vsel %vm4771_vm1, %v7446_v45, %v7455_v34  ;;  %v7464_v6 = vor.u32 %v7463_v56, %v7460_v61  ;;  %v7481_v18 = vrot.slane %v15488_v23, 4 }
 0x681   : > { %v7491_v1 = vor.u32 %v7490_v42, %v7487_v8  ;;  %v7496_v45 = vrot.slane %v15493_v32, 3  ;;  %v7505_v61 = vrot.slane %v15492_v5, 3  ;;  %v7508_v56 = vrot.slane %v14589_v52, 4 }
 0x682   : > { %v7465_v7 = vsel %vm4771_vm1, %v7455_v34, %v7464_v6  ;;  %v7499_v34 = vrot.slane %v14586_v62, 4 }
 0x683   : > { %v7509_v27 = vor.u32 %v7508_v56, %v7505_v61 }
 0x687   : > { %11077 = vmatmul.mubr.bf16.gmra.mrb[20].mxu1 %v7429_v19  ;;  %v7474_v19 = vsel %vm4771_vm1, %v7464_v6, %v7473_v10 }
 0x688   : > { %11080 = vmatprep.mubr.bf16.mxu1 %v7438_v12  ;;  %v7482_v12 = vor.u32 %v7481_v18, %v7478_v30  ;;  %v15494_v18 = vld [vmem:[#allocation12_spill] sm:$0xff] }
 0x689   : > { %v15496_v42 = vshll.u32 %v15494_v18, 16 }
 0x68a   : > { %v7483_v35 = vsel %vm4771_vm1, %v7473_v10, %v7482_v12  ;;  %v7514_v10 = vrot.slane %v14593_v16, 3 }
 0x68f   : > { %11081 = vmatmul.mubr.bf16.gmra.mrb[24].mxu1 %v7447_v24  ;;  %v7492_v24 = vsel %vm4771_vm1, %v7482_v12, %v7491_v1  ;;  %v7526_v12 = vrot.slane %v15496_v42, 4 }
 0x690   : > { %11084 = vmatprep.mubr.bf16.mxu1 %v7456_v41  ;;  %v7500_v41 = vor.u32 %v7499_v34, %v7496_v45  ;;  %v7533_v45 = vshll.u32 %v14838_v48, 16 }
 0x692   : > { %v7501_v6 = vsel %vm4771_vm1, %v7491_v1, %v7500_v41  ;;  %v7510_v30 = vsel %vm4771_vm1, %v7500_v41, %v7509_v27  ;;  %v7535_v61 = vrot.slane %v7533_v45, 4 }
 0x697   : > { %11085 = vmatmul.mubr.bf16.gmra.mrb[28].mxu1 %v7465_v7  ;;  %v7517_v7 = vrot.slane %v14600_v50, 4 }
 0x698   : > { %11088 = vmatprep.mubr.bf16.mxu1 %v7474_v19  ;;  %v15495_v19 = vshrl.u32 %v15494_v18, 16  ;;  %v15497_v18 = vld [vmem:[#allocation14_spill] sm:$0xff] }
 0x699   : > { %v7518_v34 = vor.u32 %v7517_v7, %v7514_v10  ;;  %v7927_v42 = vrot.slane %v15497_v18, 4  ;;  %v15498_v7 = vld [vmem:[#allocation15_spill] sm:$0xff]  ;;  %v12153_v18 = vld [vmem:[%s15158_s3 + $0x220] sm:$0xff]  }
 0x69a   : > { %v7523_v8 = vrot.slane %v15495_v19, 3  ;;  %v14852_v19 = vld [vmem:[#allocation2 + $0x20] sm:$0xf0] }
 0x69b   : > { %v7519_v56 = vsel %vm4771_vm1, %v7509_v27, %v7518_v34  ;;  %v7926_v50 = vrot.slane %v14852_v19, 4  ;;  %v15499_v27 = vld [vmem:[#allocation16_spill] sm:$0xff] }
 0x69c   : > { %v7527_v1 = vor.u32 %v7526_v12, %v7523_v8  ;;  %v7929_v8 = vrot.slane %v15498_v7, 4  ;;  %v7931_v12 = vrot.slane %v15499_v27, 4 }
 0x69d   : > { %v7928_v10 = vsel %vm4424_vm0, %v7926_v50, %v7927_v42  ;;  %v12151_v50 = vld [vmem:[%s15158_s3 + $0x210] sm:$0xff]  }
 0x69e   : > { %v7528_v41 = vsel %vm4771_vm1, %v7518_v34, %v7527_v1  ;;  %v7930_v45 = vsel %vm4424_vm0, %v7927_v42, %v7929_v8  ;;  %v7932_v34 = vsel %vm4424_vm0, %v7929_v8, %v7931_v12  ;;  %v15502_v42 = vld [vmem:[#allocation19_spill] sm:$0xff]  ;;  %v12154_v8 = vld [vmem:[%s15158_s3 + $0x228] sm:$0xff]  }
 0x69f   : > { %11089 = vmatmul.mubr.bf16.gmra.mrb[32].mxu1 %v7483_v35  ;;  %v7530_v35 = vshrl.u32 %v14838_v48, 16 }
 0x6a0   : > { %11092 = vmatprep.mubr.bf16.mxu1 %v7492_v24 }
 0x6a1   : > { %v7532_v24 = vrot.slane %v7530_v35, 3  ;;  %v12150_v35 = vld [vmem:[%s15158_s3 + $0x208] sm:$0xff]  }
 0x6a7   : > { %11093 = vmatmul.mubr.bf16.gmra.mrb[36].mxu1 %v7501_v6  ;;  %v7536_v6 = vor.u32 %v7535_v61, %v7532_v24  ;;  %v15501_v61 = vld [vmem:[#allocation18_spill] sm:$0xff] }
 0x6a8   : > { %11096 = vmatprep.mubr.bf16.mxu1 %v7510_v30 }
 0x6a9   : > { %v7537_v30 = vsel %vm4771_vm1, %v7527_v1, %v7536_v6  ;;  %v15500_v1 = vld [vmem:[#allocation17_spill] sm:$0xff] }
 0x6aa   : > { %v7933_v24 = vrot.slane %v15500_v1, 4 }
 0x6ac   : > { %v7934_v6 = vsel %vm4424_vm0, %v7931_v12, %v7933_v24 }
 0x6af   : > { %11097 = vmatmul.mubr.bf16.gmra.mrb[40].mxu1 %v7519_v56  ;;  %v7935_v56 = vrot.slane %v15501_v61, 4 }
 0x6b0   : > { %11100 = vmatprep.mubr.bf16.mxu1 %v7528_v41  ;;  %v12152_v41 = vld [vmem:[%s15158_s3 + $0x218] sm:$0xff]  }
 0x6b7   : > { %11101 = vmatmul.mubr.bf16.gmra.mrb[44].mxu1 %v7537_v30  ;;  %v7937_v30 = vrot.slane %v15502_v42, 4 }
 0x6b8   : > { %11120 = vmatprep.mubr.bf16.mxu1 %v7928_v10  ;;  %v15503_v10 = vld [vmem:[#allocation20_spill] sm:$0xff] }
 0x6b9   : > { %v7939_v7 = vrot.slane %v15503_v10, 4  ;;  %v7938_v27 = vsel %vm4424_vm0, %v7935_v56, %v7937_v30  ;;  %v15508_v10 = vld [vmem:[#allocation25_spill] sm:$0xff] }
 0x6bb   : > { %v7940_v12 = vsel %vm4424_vm0, %v7937_v30, %v7939_v7 }
 0x6bf   : > { %11121 = vmatmul.mubr.bf16.vlgmr.msra.gmra.mrb[0].mxu1 %v7930_v45  ;;  %v15504_v45 = vld [vmem:[#allocation21_spill] sm:$0xff] }
 0x6c0   : > { %11124 = vmatprep.mubr.bf16.mxu1 %v7932_v34  ;;  %11169 = vmatpush3.bf16.msra.mxu1 %v14805_v47  ;;  %v7936_v47 = vsel %vm4424_vm0, %v7933_v24, %v7935_v56  ;;  %v7941_v34 = vrot.slane %v15504_v45, 4  ;;  %v12156_v24 = vld [vmem:[%s15158_s3 + $0x238] sm:$0xff]   ;;  %v15510_v45 = vld [vmem:[#allocation29_spill] sm:$0xff] }
 0x6c1   : > { %11170 = vmatprep.subr.bf16.mxu1 %v12150_v35 }
 0x6c2   : > { %v7942_v61 = vsel %vm4424_vm0, %v7939_v7, %v7941_v34  ;;  %v15509_v7 = vld [vmem:[#allocation26_spill] sm:$0xff] }
 0x6c4   : > { %11171 = vmatpush3.bf16.msra.mxu1 %v12150_v35  ;;  %v12155_v35 = vld [vmem:[%s15158_s3 + $0x230] sm:$0xff]  }
 0x6c5   : > { %11172 = vmatprep.subr.bf16.mxu1 %v12151_v50 }
 0x6c7   : > { %11125 = vmatmul.mubr.bf16.gmra.mrb[4].mxu1 %v7934_v6 }
 0x6c8   : > { %11128 = vmatprep.mubr.bf16.mxu1 %v7936_v47  ;;  %11173 = vmatpush3.bf16.msra.mxu1 %v12151_v50  ;;  %v15505_v50 = vld [vmem:[#allocation22_spill] sm:$0xff]  ;;  %v15507_v47 = vld [vmem:[#allocation24_spill] sm:$0xff] }
 0x6c9   : > { %11174 = vmatprep.subr.bf16.mxu1 %v12152_v41  ;;  %v7943_v1 = vrot.slane %v15505_v50, 4  ;;  %v15511_v50 = vld [vmem:[#allocation30_spill] sm:$0xff] }
 0x6cb   : > { %v7944_v56 = vsel %vm4424_vm0, %v7941_v34, %v7943_v1  ;;  %v7953_v34 = vrot.slane %v15510_v45, 4 }
 0x6cc   : > { %11175 = vmatpush3.bf16.msra.mxu1 %v12152_v41  ;;  %v15506_v41 = vld [vmem:[#allocation23_spill] sm:$0xff] }
 0x6cd   : > { %11176 = vmatprep.subr.bf16.mxu1 %v12153_v18  ;;  %v7945_v6 = vrot.slane %v15506_v41, 4 }
 0x6cf   : > { %11129 = vmatmul.mubr.bf16.gmra.mrb[8].mxu1 %v7938_v27  ;;  %v7946_v42 = vsel %vm4424_vm0, %v7943_v1, %v7945_v6  ;;  %v7951_v27 = vrot.slane %v15509_v7, 4 }
 0x6d0   : > { %11132 = vmatprep.mubr.bf16.mxu1 %v7940_v12  ;;  %11177 = vmatpush3.bf16.msra.mxu1 %v12153_v18  ;;  %v7947_v18 = vrot.slane %v15507_v47, 4 }
 0x6d1   : > { %11178 = vmatprep.subr.bf16.mxu1 %v12154_v8  ;;  %v7954_v1 = vsel %vm4424_vm0, %v7951_v27, %v7953_v34 }
 0x6d2   : > { %v7948_v30 = vsel %vm4424_vm0, %v7945_v6, %v7947_v18  ;;  %v15513_v6 = vld [vmem:[#allocation36_spill] sm:$0xff] }
 0x6d3   : > { %v7959_v47 = vrot.slane %v15513_v6, 4 }
 0x6d4   : > { %11179 = vmatpush3.bf16.msra.mxu1 %v12154_v8  ;;  %v7949_v8 = vrot.slane %v15508_v10, 4 }
 0x6d5   : > { %11180 = vmatprep.subr.bf16.mxu1 %v12155_v35 }
 0x6d6   : > { %v7950_v12 = vsel %vm4424_vm0, %v7947_v18, %v7949_v8 }
 0x6d7   : > { %11133 = vmatmul.mubr.bf16.gmra.mrb[12].mxu1 %v7942_v61 }
 0x6d8   : > { %11136 = vmatprep.mubr.bf16.mxu1 %v7944_v56  ;;  %11181 = vmatpush3.bf16.msra.mxu1 %v12155_v35  ;;  %v7952_v35 = vsel %vm4424_vm0, %v7949_v8, %v7951_v27  ;;  %v15512_v56 = vld [vmem:[#allocation34_spill] sm:$0xff] }
 0x6d9   : > { %11182 = vmatprep.subr.bf16.mxu1 %v12156_v24  ;;  %v7957_v41 = vrot.slane %v15512_v56, 4  ;;  %v15515_v8 = vld [vmem:[#allocation42_spill] sm:$0xff] }
 0x6da   : > { %v7963_v7 = vrot.slane %v15515_v8, 4  ;;  %v8347_v8 = vrot.slane %v14343_v3, 5  ;;  %v8355_v3 = vrot.slane %v14369_v46, 5 }
 0x6dc   : > { %11183 = vmatpush3.bf16.msra.mxu1 %v12156_v24  ;;  %v7955_v24 = vrot.slane %v15511_v50, 4 }
 0x6de   : > { %v7956_v61 = vsel %vm4424_vm0, %v7953_v34, %v7955_v24  ;;  %v7958_v18 = vsel %vm4424_vm0, %v7955_v24, %v7957_v41  ;;  %v15517_v34 = vld [vmem:[#allocation3_spill] sm:$0xff] }
 0x6df   : > { %11137 = vmatmul.mubr.bf16.gmra.mrb[16].mxu1 %v7946_v42  ;;  %v7960_v42 = vsel %vm4424_vm0, %v7957_v41, %v7959_v47  ;;  %v7967_v50 = vrot.slane %v15517_v34, 4  ;;  %v12159_v41 = vld [vmem:[#allocation2] sm:$0xff] }
 0x6e0   : > { %11140 = vmatprep.mubr.bf16.mxu1 %v7948_v30  ;;  %v15514_v30 = vld [vmem:[#allocation40_spill] sm:$0xff]  ;;  %v7971_v6 = vrot.slane %v12159_v41, 4  ;;  %v8359_v41 = vrot.slane %v14392_v49, 5  ;;  %v8370_v49 = vrot.slane %v14408_v11, 4 }
 0x6e1   : > { %v7961_v10 = vrot.slane %v15514_v30, 4 }
 0x6e3   : > { %v7962_v27 = vsel %vm4424_vm0, %v7959_v47, %v7961_v10  ;;  %v8339_v47 = vshrl.u32 %v14852_v19, 16 }
 0x6e7   : > { %11141 = vmatmul.mubr.bf16.gmra.mrb[20].mxu1 %v7950_v12  ;;  %v7964_v12 = vsel %vm4424_vm0, %v7961_v10, %v7963_v7  ;;  %v8346_v10 = vrot.slane %v14330_v17, 4  ;;  %v8354_v17 = vrot.slane %v14352_v40, 4 }
 0x6e8   : > { %11144 = vmatprep.mubr.bf16.mxu1 %v7952_v35  ;;  %v15516_v35 = vld [vmem:[#allocation10_spill] sm:$0xff] }
 0x6e9   : > { %v7965_v45 = vrot.slane %v15516_v35, 4  ;;  %v8348_v35 = vor.u32 %v8347_v8, %v8346_v10  ;;  %v8374_v8 = vrot.slane %v14432_v33, 4 }
 0x6eb   : > { %v7966_v24 = vsel %vm4424_vm0, %v7963_v7, %v7965_v45  ;;  %v7973_v7 = vrot.slane %v14838_v48, 4  ;;  %v8356_v48 = vor.u32 %v8355_v3, %v8354_v17  ;;  %v8395_v17 = vrot.slane %v15477_v21, 5 }
 0x6ef   : > { %11145 = vmatmul.mubr.bf16.gmra.mrb[24].mxu1 %v7954_v1  ;;  %v7968_v1 = vsel %vm4424_vm0, %v7965_v45, %v7967_v50  ;;  %v7974_v45 = vsel %vm4424_vm0, %v7971_v6, %v7973_v7  ;;  %v8375_v7 = vrot.slane %v14448_v28, 5  ;;  %v8386_v28 = vrot.slane %v14466_v43, 4 }
 0x6f0   : > { %11148 = vmatprep.mubr.bf16.mxu1 %v7956_v61  ;;  %v15518_v61 = vld [vmem:[#allocation7_spill] sm:$0xff] }
 0x6f1   : > { %v7969_v56 = vrot.slane %v15518_v61, 4  ;;  %v8376_v11 = vor.u32 %v8375_v7, %v8374_v8 }
 0x6f3   : > { %v7972_v30 = vsel %vm4424_vm0, %v7969_v56, %v7971_v6  ;;  %v8363_v6 = vrot.slane %v14397_v57, 5 }
 0x6f7   : > { %11149 = vmatmul.mubr.bf16.gmra.mrb[28].mxu1 %v7958_v18  ;;  %v8342_v18 = vshll.u32 %v14852_v19, 16  ;;  %v8350_v19 = vrot.slane %v14348_v14, 4 }
 0x6f8   : > { %11152 = vmatprep.mubr.bf16.mxu1 %v7960_v42  ;;  %v7970_v42 = vsel %vm4424_vm0, %v7967_v50, %v7969_v56  ;;  %v8351_v50 = vrot.slane %v14364_v58, 5  ;;  %v8358_v56 = vrot.slane %v14376_v63, 4  ;;  %v8362_v58 = vrot.slane %v14380_v4, 4 }
 0x6fa   : > { %v8360_v40 = vor.u32 %v8359_v41, %v8358_v56  ;;  %v8406_v41 = vrot.slane %v15487_v51, 4 }
 0x6fc   : > { %v8361_v46 = vsel %vm5311_vm2, %v8356_v48, %v8360_v40 }
 0x6ff   : > { %11153 = vmatmul.mubr.bf16.gmra.mrb[32].mxu1 %v7962_v27  ;;  %v8341_v27 = vrot.slane %v8339_v47, 4  ;;  %v8364_v47 = vor.u32 %v8363_v6, %v8362_v58  ;;  %v8411_v58 = vrot.slane %v15485_v25, 5 }
 0x700   : > { %11156 = vmatprep.mubr.bf16.mxu1 %v7964_v12  ;;  %v8344_v12 = vrot.slane %v8342_v18, 5  ;;  %v8366_v18 = vrot.slane %v14404_v9, 4 }
 0x701   : > { %v8365_v63 = vsel %vm5311_vm2, %v8360_v40, %v8364_v47  ;;  %v8414_v40 = vrot.slane %v15491_v37, 4 }
 0x702   : > { %v8345_v34 = vor.u32 %v8344_v12, %v8341_v27  ;;  %v8379_v27 = vrot.slane %v14453_v0, 5 }
 0x707   : > { %11157 = vmatmul.mubr.bf16.gmra.mrb[36].mxu1 %v7966_v24  ;;  %v8349_v24 = vsel %vm5311_vm2, %v8345_v34, %v8348_v35  ;;  %v8387_v34 = vrot.slane %v14481_v29, 5 }
 0x708   : > { %11160 = vmatprep.mubr.bf16.mxu1 %v7968_v1  ;;  %v8352_v1 = vor.u32 %v8351_v50, %v8350_v19  ;;  %v8390_v50 = vrot.slane %v15479_v22, 4 }
 0x709   : > { %v8388_v19 = vor.u32 %v8387_v34, %v8386_v28  ;;  %v8792_v34 = vld [vmem:[%s12227_s8 + $0x30] sm:$0xff] }
 0x70a   : > { %v8353_v61 = vsel %vm5311_vm2, %v8348_v35, %v8352_v1  ;;  %v8357_v14 = vsel %vm5311_vm2, %v8352_v1, %v8356_v48  ;;  %v8382_v35 = vrot.slane %v14462_v15, 4  ;;  %v8398_v1 = vrot.slane %v15483_v26, 4 }
 0x70b   : > { %v8399_v48 = vrot.slane %v15480_v59, 5  ;;  %v8410_v59 = vrot.slane %v15486_v60, 4 }
 0x70d   : > { %v8412_v6 = vor.u32 %v8411_v58, %v8410_v59  ;;  %v8799_v59 = vld [vmem:[%s12227_s8 + $0x68] sm:$0xff] }
 0x70f   : > { %11161 = vmatmul.mubr.bf16.gmra.mrb[40].mxu1 %v7970_v42  ;;  %v8367_v42 = vrot.slane %v14420_v53, 5  ;;  %v8378_v53 = vrot.slane %v14436_v36, 4 }
 0x710   : > { %11164 = vmatprep.mubr.bf16.mxu1 %v7972_v30  ;;  %v8371_v30 = vrot.slane %v14425_v38, 5 }
 0x711   : > { %v8368_v4 = vor.u32 %v8367_v42, %v8366_v18  ;;  %v8380_v12 = vor.u32 %v8379_v27, %v8378_v53  ;;  %v8422_v42 = vrot.slane %v15493_v32, 4  ;;  %v15520_v27 = vld [vmem:[#allocation13_spill] sm:$0xff] }
 0x712   : > { %v8372_v10 = vor.u32 %v8371_v30, %v8370_v49  ;;  %v8427_v49 = vrot.slane %v14589_v52, 5 }
 0x713   : > { %v8369_v57 = vsel %vm5311_vm2, %v8364_v47, %v8368_v4  ;;  %v8381_v33 = vsel %vm5311_vm2, %v8376_v11, %v8380_v12  ;;  %v8415_v47 = vrot.slane %v15488_v23, 5  ;;  %v8426_v23 = vrot.slane %v15492_v5, 4 }
 0x714   : > { %v8373_v9 = vsel %vm5311_vm2, %v8368_v4, %v8372_v10  ;;  %v8377_v38 = vsel %vm5311_vm2, %v8372_v10, %v8376_v11  ;;  %v8430_v10 = vrot.slane %v14593_v16, 4 }
 0x715   : > { %v8416_v60 = vor.u32 %v8415_v47, %v8414_v40  ;;  %v8428_v30 = vor.u32 %v8427_v49, %v8426_v23  ;;  %v8800_v49 = vld [vmem:[%s12227_s8 + $0x70] sm:$0xff] }
 0x717   : > { %11165 = vmatmul.mubr.bf16.gmra.mrb[44].mxu1 %v7974_v45  ;;  %v8383_v45 = vrot.slane %v14476_v39, 5  ;;  %v8394_v39 = vrot.slane %v15478_v20, 4  ;;  %v8400_v20 = vor.u32 %v8399_v48, %v8398_v1  ;;  %v8417_v25 = vsel %vm5311_vm2, %v8412_v6, %v8416_v60 }
 0x718   : > { %11184 = vmatprep.mubr.bf16.mxu1 %v8349_v24  ;;  %v8391_v24 = vrot.slane %v14498_v44, 5  ;;  %v8402_v44 = vrot.slane %v15482_v55, 4 }
 0x719   : > { %v8384_v36 = vor.u32 %v8383_v45, %v8382_v35  ;;  %v8396_v3 = vor.u32 %v8395_v17, %v8394_v39  ;;  %v8794_v45 = vld [vmem:[%s12227_s8 + $0x40] sm:$0xff]  ;;  %v8793_v39 = vld [vmem:[%s12227_s8 + $0x38] sm:$0xff] }
 0x71a   : > { %v8392_v43 = vor.u32 %v8391_v24, %v8390_v50 }
 0x71b   : > { %v8385_v0 = vsel %vm5311_vm2, %v8380_v12, %v8384_v36  ;;  %v8389_v15 = vsel %vm5311_vm2, %v8384_v36, %v8388_v19  ;;  %v8401_v21 = vsel %vm5311_vm2, %v8396_v3, %v8400_v20 }
 0x71c   : > { %v8393_v29 = vsel %vm5311_vm2, %v8388_v19, %v8392_v43  ;;  %v8397_v22 = vsel %vm5311_vm2, %v8392_v43, %v8396_v3 }
 0x71f   : > { %11185 = vmatmul.mubr.bf16.vlgmr.msra.gmra.mrb[0].mxu1 %v8353_v61  ;;  %v8403_v61 = vrot.slane %v15481_v2, 5 }
 0x720   : > { %11188 = vmatprep.mubr.bf16.mxu1 %v8357_v14  ;;  %v8407_v14 = vrot.slane %v15484_v54, 5  ;;  %v8418_v54 = vrot.slane %v15490_v31, 4 }
 0x721   : > { %v8404_v56 = vor.u32 %v8403_v61, %v8402_v44 }
 0x722   : > { %v8408_v55 = vor.u32 %v8407_v14, %v8406_v41  ;;  %v8796_v41 = vld [vmem:[%s12227_s8 + $0x50] sm:$0xff] }
 0x723   : > { %v8405_v26 = vsel %vm5311_vm2, %v8400_v20, %v8404_v56  ;;  %v8798_v20 = vld [vmem:[%s12227_s8 + $0x60] sm:$0xff] }
 0x724   : > { %v8409_v2 = vsel %vm5311_vm2, %v8404_v56, %v8408_v55  ;;  %v8413_v51 = vsel %vm5311_vm2, %v8408_v55, %v8412_v6 }
 0x727   : > { %11189 = vmatmul.mubr.bf16.gmra.mrb[4].mxu1 %v8361_v46  ;;  %v8419_v46 = vrot.slane %v15489_v13, 5  ;;  %v8320_v13 = vld [vmem:[#allocation2 + $0xe0] sm:$0x1f] }
 0x728   : > { %11192 = vmatprep.mubr.bf16.mxu1 %v8365_v63  ;;  %v8423_v63 = vrot.slane %v14586_v62, 5  ;;  %v8439_v62 = vshrl.u32 %v8320_v13, 16  ;;  %v8442_v5 = vshll.u32 %v8320_v13, 16  ;;  %v8803_v13 = vld [vmem:[%s12227_s8 + $0x88] sm:$0xff] }
 0x729   : > { %v8420_v18 = vor.u32 %v8419_v46, %v8418_v54 }
 0x72a   : > { %v8424_v31 = vor.u32 %v8423_v63, %v8422_v42  ;;  %v8441_v52 = vrot.slane %v8439_v62, 4  ;;  %v8802_v63 = vld [vmem:[%s12227_s8 + $0x80] sm:$0xff] }
 0x72b   : > { %v8421_v37 = vsel %vm5311_vm2, %v8416_v60, %v8420_v18 }
 0x72c   : > { %v8425_v4 = vsel %vm5311_vm2, %v8420_v18, %v8424_v31  ;;  %v8429_v32 = vsel %vm5311_vm2, %v8424_v31, %v8428_v30 }
 0x72f   : > { %11193 = vmatmul.mubr.bf16.gmra.mrb[8].mxu1 %v8369_v57  ;;  %v15519_v57 = vld [vmem:[#allocation44_spill] sm:$0xff] }
 0x730   : > { %11196 = vmatprep.mubr.bf16.mxu1 %v8373_v9  ;;  %v8431_v8 = vrot.slane %v15519_v57, 5  ;;  %v8444_v9 = vrot.slane %v8442_v5, 5 }
 0x732   : > { %v8432_v7 = vor.u32 %v8431_v8, %v8430_v10  ;;  %v8445_v11 = vor.u32 %v8444_v9, %v8441_v52  ;;  %v8801_v8 = vld [vmem:[%s12227_s8 + $0x78] sm:$0xff] }
 0x734   : > { %v8433_v53 = vsel %vm5311_vm2, %v8428_v30, %v8432_v7  ;;  %v8437_v16 = vsel %vm5311_vm2, %v8432_v7, %v15520_v27  ;;  %v8446_v12 = vsel %vm5311_vm2, %v15520_v27, %v8445_v11  ;;  %v8806_v11 = vld [vmem:[%s12227_s8 + $0xa0] sm:$0xff] }
 0x737   : > { %11197 = vmatmul.mubr.bf16.gmra.mrb[12].mxu1 %v8377_v38  ;;  %v15000_v38 = vld [vmem:[%s15159_s4] ss:$0 sm:$0xff] }
 0x738   : > { %11200 = vmatprep.mubr.bf16.mxu1 %v8381_v33 }
 0x73f   : > { %11201 = vmatmul.mubr.bf16.gmra.mrb[16].mxu1 %v8385_v0  ;;  %v8795_v0 = vld [vmem:[%s12227_s8 + $0x48] sm:$0xff] }
 0x740   : > { %11204 = vmatprep.mubr.bf16.mxu1 %v8389_v15 }
 0x747   : > { %11205 = vmatmul.mubr.bf16.gmra.mrb[20].mxu1 %v8393_v29 }
 0x748   : > { %11208 = vmatprep.mubr.bf16.mxu1 %v8397_v22 }
 0x74f   : > { %11209 = vmatmul.mubr.bf16.gmra.mrb[24].mxu1 %v8401_v21 }
 0x750   : > { %11212 = vmatprep.mubr.bf16.mxu1 %v8405_v26 }
 0x757   : > { %11213 = vmatmul.mubr.bf16.gmra.mrb[28].mxu1 %v8409_v2  ;;  %v8797_v2 = vld [vmem:[%s12227_s8 + $0x58] sm:$0xff] }
 0x758   : > { %11216 = vmatprep.mubr.bf16.mxu1 %v8413_v51 }
 0x75f   : > { %11217 = vmatmul.mubr.bf16.gmra.mrb[32].mxu1 %v8417_v25 }
 0x760   : > { %11220 = vmatprep.mubr.bf16.mxu1 %v8421_v37 }
 0x767   : > { %11221 = vmatmul.mubr.bf16.gmra.mrb[36].mxu1 %v8425_v4 }
 0x768   : > { %11224 = vmatprep.mubr.bf16.mxu1 %v8429_v32 }
 0x76f   : > { %11225 = vmatmul.mubr.bf16.gmra.mrb[40].mxu1 %v8433_v53 }
 0x770   : > { %11228 = vmatprep.mubr.bf16.mxu1 %v8437_v16 }
 0x777   : > { %11229 = vmatmul.mubr.bf16.gmra.mrb[44].mxu1 %v8446_v12 }
 0x7f2   : > { %v11186_v35 = vpop.f32.mrb[0].mxu1 }
 0x7f3   : > { %v8848_v33 = vadd.f32 %v11186_v35, %v15000_v38  ;;  %v8553_v28 = vpop.f32.mrb[1].mxu1 }
 0x7f4   : > { %v8846_v36 = vadd.f32 %v15000_v38, %v8553_v28  ;;  %v11187_v19 = vpop.f32.mrb[2].mxu1 }
 0x7f5   : > { %v8896_v50 = vadd.f32 %v8848_v33, %v8794_v45  ;;  %v8849_v24 = vadd.f32 %v11187_v19, %v15000_v38  ;;  %v8556_v15 = vpop.f32.mrb[3].mxu1  ;;  %v8804_v45 = vld [vmem:[%s12227_s8 + $0x90] sm:$0xff] }
 0x7f6   : > { %v8894_v17 = vadd.f32 %v8846_v36, %v8792_v34  ;;  %v8847_v43 = vadd.f32 %v15000_v38, %v8556_v15  ;;  %v8807_v34 = vld [vmem:[%s12227_s8 + $0xa8] sm:$0xff] }
 0x7f7   : > { %v8944_v3 = vmax.f32 %v8896_v50, 0.0  ;;  %v8897_v29 = vadd.f32 %v8849_v24, %v8795_v0  ;;  %v8805_v50 = vld [vmem:[%s12227_s8 + $0x98] sm:$0xff] }
 0x7f8   : > { %v8942_v1 = vmax.f32 %v8894_v17, 0.0  ;;  %v8895_v48 = vadd.f32 %v8847_v43, %v8793_v39 }
 0x7f9   : > { %8992 = vst [vmem:[%s15013_s22 + $0x10] sm:$0xff] %v8944_v3  ;;  %v8945_v22 = vmax.f32 %v8897_v29, 0.0 }
 0x7fa   : > { %8990 = vst [vmem:[%s15013_s22] sm:$0xff] %v8942_v1  ;;  %v8943_v44 = vmax.f32 %v8895_v48, 0.0  ;;  %v11190_v61 = vpop.f32.mrb[4].mxu1 }
 0x7fb   : > { %8993 = vst [vmem:[%s15013_s22 + $0x18] sm:$0xff] %v8945_v22  ;;  %v8852_v56 = vadd.f32 %v11190_v61, %v15000_v38  ;;  %v8569_v21 = vpop.f32.mrb[5].mxu1  ;;  %v8810_v22 = vld [vmem:[%s12227_s8 + $0xc0] sm:$0xff] }
 0x7fc   : > { %8991 = vst [vmem:[%s15013_s22 + $0x8] sm:$0xff] %v8943_v44  ;;  %v8850_v14 = vadd.f32 %v15000_v38, %v8569_v21  ;;  %v11191_v26 = vpop.f32.mrb[6].mxu1 }
 0x7fd   : > { %v8900_v58 = vadd.f32 %v8852_v56, %v8798_v20  ;;  %v8853_v55 = vadd.f32 %v11191_v26, %v15000_v38  ;;  %v8572_v6 = vpop.f32.mrb[7].mxu1  ;;  %v8808_v20 = vld [vmem:[%s12227_s8 + $0xb0] sm:$0xff] }
 0x7fe   : > { %v8898_v40 = vadd.f32 %v8850_v14, %v8796_v41  ;;  %v8851_v47 = vadd.f32 %v15000_v38, %v8572_v6  ;;  %v8811_v41 = vld [vmem:[%s12227_s8 + $0xc8] sm:$0xff] }
 0x7ff   : > { %v8948_v51 = vmax.f32 %v8900_v58, 0.0  ;;  %v8901_v54 = vadd.f32 %v8853_v55, %v8799_v59  ;;  %v8809_v58 = vld [vmem:[%s12227_s8 + $0xb8] sm:$0xff] }
 0x800   : > { %v8946_v46 = vmax.f32 %v8898_v40, 0.0  ;;  %v8899_v60 = vadd.f32 %v8851_v47, %v8797_v2 }
 0x801   : > { %8996 = vst [vmem:[%s15013_s22 + $0x30] sm:$0xff] %v8948_v51  ;;  %v8949_v18 = vmax.f32 %v8901_v54, 0.0 }
 0x802   : > { %8994 = vst [vmem:[%s15013_s22 + $0x20] sm:$0xff] %v8946_v46  ;;  %v8947_v25 = vmax.f32 %v8899_v60, 0.0  ;;  %v11194_v42 = vpop.f32.mrb[8].mxu1 }
 0x803   : > { %8997 = vst [vmem:[%s15013_s22 + $0x38] sm:$0xff] %v8949_v18  ;;  %v8856_v37 = vadd.f32 %v11194_v42, %v15000_v38  ;;  %v8585_v23 = vpop.f32.mrb[9].mxu1  ;;  %v8814_v18 = vld [vmem:[%s12227_s8 + $0xe0] sm:$0xff] }
 0x804   : > { %8995 = vst [vmem:[%s15013_s22 + $0x28] sm:$0xff] %v8947_v25  ;;  %v8854_v31 = vadd.f32 %v15000_v38, %v8585_v23  ;;  %v11195_v30 = vpop.f32.mrb[10].mxu1 }
 0x805   : > { %v8904_v4 = vadd.f32 %v8856_v37, %v8802_v63  ;;  %v8857_v10 = vadd.f32 %v11195_v30, %v15000_v38  ;;  %v8588_v57 = vpop.f32.mrb[11].mxu1  ;;  %v8812_v63 = vld [vmem:[%s12227_s8 + $0xd0] sm:$0xff] }
 0x806   : > { %v8902_v32 = vadd.f32 %v8854_v31, %v8800_v49  ;;  %v8855_v62 = vadd.f32 %v15000_v38, %v8588_v57  ;;  %v8815_v49 = vld [vmem:[%s12227_s8 + $0xe8] sm:$0xff] }
 0x807   : > { %v8952_v5 = vmax.f32 %v8904_v4, 0.0  ;;  %v8905_v7 = vadd.f32 %v8857_v10, %v8803_v13  ;;  %v8813_v4 = vld [vmem:[%s12227_s8 + $0xd8] sm:$0xff] }
 0x808   : > { %v8950_v52 = vmax.f32 %v8902_v32, 0.0  ;;  %v8903_v9 = vadd.f32 %v8855_v62, %v8801_v8 }
 0x809   : > { %9000 = vst [vmem:[%s15013_s22 + $0x50] sm:$0xff] %v8952_v5  ;;  %v8953_v53 = vmax.f32 %v8905_v7, 0.0 }
 0x80a   : > { %8998 = vst [vmem:[%s15013_s22 + $0x40] sm:$0xff] %v8950_v52  ;;  %v8951_v27 = vmax.f32 %v8903_v9, 0.0  ;;  %v11198_v16 = vpop.f32.mrb[12].mxu1 }
 0x80b   : > { %9001 = vst [vmem:[%s15013_s22 + $0x58] sm:$0xff] %v8953_v53  ;;  %v8860_v12 = vadd.f32 %v11198_v16, %v15000_v38  ;;  %v8601_v35 = vpop.f32.mrb[13].mxu1  ;;  %v8818_v53 = vld [vmem:[%s12227_s8 + $0x100] sm:$0xff] }
 0x80c   : > { %8999 = vst [vmem:[%s15013_s22 + $0x48] sm:$0xff] %v8951_v27  ;;  %v8858_v33 = vadd.f32 %v15000_v38, %v8601_v35  ;;  %v11199_v28 = vpop.f32.mrb[14].mxu1 }
 0x80d   : > { %v8908_v36 = vadd.f32 %v8860_v12, %v8806_v11  ;;  %v8861_v19 = vadd.f32 %v11199_v28, %v15000_v38  ;;  %v8604_v0 = vpop.f32.mrb[15].mxu1  ;;  %v8816_v11 = vld [vmem:[%s12227_s8 + $0xf0] sm:$0xff] }
 0x80e   : > { %v8906_v24 = vadd.f32 %v8858_v33, %v8804_v45  ;;  %v8859_v15 = vadd.f32 %v15000_v38, %v8604_v0  ;;  %v8819_v45 = vld [vmem:[%s12227_s8 + $0x108] sm:$0xff] }
 0x80f   : > { %v8956_v39 = vmax.f32 %v8908_v36, 0.0  ;;  %v8909_v17 = vadd.f32 %v8861_v19, %v8807_v34  ;;  %v8817_v36 = vld [vmem:[%s12227_s8 + $0xf8] sm:$0xff] }
 0x810   : > { %v8954_v43 = vmax.f32 %v8906_v24, 0.0  ;;  %v8907_v3 = vadd.f32 %v8859_v15, %v8805_v50 }
 0x811   : > { %9004 = vst [vmem:[%s15013_s22 + $0x70] sm:$0xff] %v8956_v39  ;;  %v8957_v29 = vmax.f32 %v8909_v17, 0.0 }
 0x812   : > { %9002 = vst [vmem:[%s15013_s22 + $0x60] sm:$0xff] %v8954_v43  ;;  %v8955_v1 = vmax.f32 %v8907_v3, 0.0  ;;  %v11202_v48 = vpop.f32.mrb[16].mxu1 }
 0x813   : > { %9005 = vst [vmem:[%s15013_s22 + $0x78] sm:$0xff] %v8957_v29  ;;  %v8864_v44 = vadd.f32 %v11202_v48, %v15000_v38  ;;  %v8617_v61 = vpop.f32.mrb[17].mxu1  ;;  %v8822_v29 = vld [vmem:[%s12227_s8 + $0x120] sm:$0xff] }
 0x814   : > { %9003 = vst [vmem:[%s15013_s22 + $0x68] sm:$0xff] %v8955_v1  ;;  %v8862_v56 = vadd.f32 %v15000_v38, %v8617_v61  ;;  %v11203_v21 = vpop.f32.mrb[18].mxu1 }
 0x815   : > { %v8912_v14 = vadd.f32 %v8864_v44, %v8810_v22  ;;  %v8865_v26 = vadd.f32 %v11203_v21, %v15000_v38  ;;  %v8620_v59 = vpop.f32.mrb[19].mxu1  ;;  %v8820_v22 = vld [vmem:[%s12227_s8 + $0x110] sm:$0xff] }
 0x816   : > { %v8910_v55 = vadd.f32 %v8862_v56, %v8808_v20  ;;  %v8863_v6 = vadd.f32 %v15000_v38, %v8620_v59  ;;  %v8823_v20 = vld [vmem:[%s12227_s8 + $0x128] sm:$0xff] }
 0x817   : > { %v8960_v2 = vmax.f32 %v8912_v14, 0.0  ;;  %v8913_v40 = vadd.f32 %v8865_v26, %v8811_v41  ;;  %v8821_v14 = vld [vmem:[%s12227_s8 + $0x118] sm:$0xff] }
 0x818   : > { %v8958_v47 = vmax.f32 %v8910_v55, 0.0  ;;  %v8911_v51 = vadd.f32 %v8863_v6, %v8809_v58 }
 0x819   : > { %9008 = vst [vmem:[%s15013_s22 + $0x90] sm:$0xff] %v8960_v2  ;;  %v8961_v54 = vmax.f32 %v8913_v40, 0.0 }
 0x81a   : > { %9006 = vst [vmem:[%s15013_s22 + $0x80] sm:$0xff] %v8958_v47  ;;  %v8959_v46 = vmax.f32 %v8911_v51, 0.0  ;;  %v11206_v60 = vpop.f32.mrb[20].mxu1 }
 0x81b   : > { %9009 = vst [vmem:[%s15013_s22 + $0x98] sm:$0xff] %v8961_v54  ;;  %v8868_v25 = vadd.f32 %v11206_v60, %v15000_v38  ;;  %v8633_v42 = vpop.f32.mrb[21].mxu1  ;;  %v8826_v54 = vld [vmem:[%s12227_s8 + $0x140] sm:$0xff] }
 0x81c   : > { %9007 = vst [vmem:[%s15013_s22 + $0x88] sm:$0xff] %v8959_v46  ;;  %v8866_v37 = vadd.f32 %v15000_v38, %v8633_v42  ;;  %v11207_v23 = vpop.f32.mrb[22].mxu1 }
 0x81d   : > { %v8916_v31 = vadd.f32 %v8868_v25, %v8814_v18  ;;  %v8869_v30 = vadd.f32 %v11207_v23, %v15000_v38  ;;  %v8636_v13 = vpop.f32.mrb[23].mxu1  ;;  %v8824_v18 = vld [vmem:[%s12227_s8 + $0x130] sm:$0xff] }
 0x81e   : > { %v8914_v10 = vadd.f32 %v8866_v37, %v8812_v63  ;;  %v8867_v57 = vadd.f32 %v15000_v38, %v8636_v13  ;;  %v8827_v63 = vld [vmem:[%s12227_s8 + $0x148] sm:$0xff] }
 0x81f   : > { %v8964_v8 = vmax.f32 %v8916_v31, 0.0  ;;  %v8917_v32 = vadd.f32 %v8869_v30, %v8815_v49  ;;  %v8825_v31 = vld [vmem:[%s12227_s8 + $0x138] sm:$0xff] }
 0x820   : > { %v8962_v62 = vmax.f32 %v8914_v10, 0.0  ;;  %v8915_v5 = vadd.f32 %v8867_v57, %v8813_v4 }
 0x821   : > { %9012 = vst [vmem:[%s15013_s22 + $0xb0] sm:$0xff] %v8964_v8  ;;  %v8965_v7 = vmax.f32 %v8917_v32, 0.0 }
 0x822   : > { %9010 = vst [vmem:[%s15013_s22 + $0xa0] sm:$0xff] %v8962_v62  ;;  %v8963_v52 = vmax.f32 %v8915_v5, 0.0  ;;  %v11210_v9 = vpop.f32.mrb[24].mxu1 }
 0x823   : > { %9013 = vst [vmem:[%s15013_s22 + $0xb8] sm:$0xff] %v8965_v7  ;;  %v8872_v27 = vadd.f32 %v11210_v9, %v15000_v38  ;;  %v8649_v16 = vpop.f32.mrb[25].mxu1  ;;  %v8830_v7 = vld [vmem:[%s12227_s8 + $0x160] sm:$0xff] }
 0x824   : > { %9011 = vst [vmem:[%s15013_s22 + $0xa8] sm:$0xff] %v8963_v52  ;;  %v8870_v12 = vadd.f32 %v15000_v38, %v8649_v16  ;;  %v11211_v35 = vpop.f32.mrb[26].mxu1 }
 0x825   : > { %v8920_v33 = vadd.f32 %v8872_v27, %v8818_v53  ;;  %v8873_v28 = vadd.f32 %v11211_v35, %v15000_v38  ;;  %v8652_v34 = vpop.f32.mrb[27].mxu1  ;;  %v8828_v53 = vld [vmem:[%s12227_s8 + $0x150] sm:$0xff] }
 0x826   : > { %v8918_v19 = vadd.f32 %v8870_v12, %v8816_v11  ;;  %v8871_v0 = vadd.f32 %v15000_v38, %v8652_v34  ;;  %v8831_v11 = vld [vmem:[%s12227_s8 + $0x168] sm:$0xff] }
 0x827   : > { %v8968_v50 = vmax.f32 %v8920_v33, 0.0  ;;  %v8921_v24 = vadd.f32 %v8873_v28, %v8819_v45  ;;  %v8829_v33 = vld [vmem:[%s12227_s8 + $0x158] sm:$0xff] }
 0x828   : > { %v8966_v15 = vmax.f32 %v8918_v19, 0.0  ;;  %v8919_v39 = vadd.f32 %v8871_v0, %v8817_v36 }
 0x829   : > { %9016 = vst [vmem:[%s15013_s22 + $0xd0] sm:$0xff] %v8968_v50  ;;  %v8969_v17 = vmax.f32 %v8921_v24, 0.0 }
 0x82a   : > { %9014 = vst [vmem:[%s15013_s22 + $0xc0] sm:$0xff] %v8966_v15  ;;  %v8967_v43 = vmax.f32 %v8919_v39, 0.0  ;;  %v11214_v3 = vpop.f32.mrb[28].mxu1 }
 0x82b   : > { %9017 = vst [vmem:[%s15013_s22 + $0xd8] sm:$0xff] %v8969_v17  ;;  %v8876_v1 = vadd.f32 %v11214_v3, %v15000_v38  ;;  %v8665_v48 = vpop.f32.mrb[29].mxu1  ;;  %v8834_v17 = vld [vmem:[%s12227_s8 + $0x180] sm:$0xff] }
 0x82c   : > { %9015 = vst [vmem:[%s15013_s22 + $0xc8] sm:$0xff] %v8967_v43  ;;  %v8874_v44 = vadd.f32 %v15000_v38, %v8665_v48  ;;  %v11215_v61 = vpop.f32.mrb[30].mxu1 }
 0x82d   : > { %v8924_v56 = vadd.f32 %v8876_v1, %v8822_v29  ;;  %v8877_v21 = vadd.f32 %v11215_v61, %v15000_v38  ;;  %v8668_v41 = vpop.f32.mrb[31].mxu1  ;;  %v8832_v29 = vld [vmem:[%s12227_s8 + $0x170] sm:$0xff] }
 0x82e   : > { %v8922_v26 = vadd.f32 %v8874_v44, %v8820_v22  ;;  %v8875_v59 = vadd.f32 %v15000_v38, %v8668_v41  ;;  %v8835_v22 = vld [vmem:[%s12227_s8 + $0x188] sm:$0xff] }
 0x82f   : > { %v8972_v58 = vmax.f32 %v8924_v56, 0.0  ;;  %v8925_v55 = vadd.f32 %v8877_v21, %v8823_v20  ;;  %v8833_v56 = vld [vmem:[%s12227_s8 + $0x178] sm:$0xff] }
 0x830   : > { %v8970_v6 = vmax.f32 %v8922_v26, 0.0  ;;  %v8923_v2 = vadd.f32 %v8875_v59, %v8821_v14 }
 0x831   : > { %9020 = vst [vmem:[%s15013_s22 + $0xf0] sm:$0xff] %v8972_v58  ;;  %v8973_v40 = vmax.f32 %v8925_v55, 0.0 }
 0x832   : > { %9018 = vst [vmem:[%s15013_s22 + $0xe0] sm:$0xff] %v8970_v6  ;;  %v8971_v47 = vmax.f32 %v8923_v2, 0.0  ;;  %v11218_v51 = vpop.f32.mrb[32].mxu1 }
 0x833   : > { %9021 = vst [vmem:[%s15013_s22 + $0xf8] sm:$0xff] %v8973_v40  ;;  %v8880_v46 = vadd.f32 %v11218_v51, %v15000_v38  ;;  %v8681_v60 = vpop.f32.mrb[33].mxu1  ;;  %v8838_v40 = vld [vmem:[%s12227_s8 + $0x1a0] sm:$0xff] }
 0x834   : > { %9019 = vst [vmem:[%s15013_s22 + $0xe8] sm:$0xff] %v8971_v47  ;;  %v8878_v25 = vadd.f32 %v15000_v38, %v8681_v60  ;;  %v11219_v42 = vpop.f32.mrb[34].mxu1 }
 0x835   : > { %v8928_v37 = vadd.f32 %v8880_v46, %v8826_v54  ;;  %v8881_v23 = vadd.f32 %v11219_v42, %v15000_v38  ;;  %v8684_v49 = vpop.f32.mrb[35].mxu1  ;;  %v8836_v54 = vld [vmem:[%s12227_s8 + $0x190] sm:$0xff] }
 0x836   : > { %v8926_v30 = vadd.f32 %v8878_v25, %v8824_v18  ;;  %v8879_v13 = vadd.f32 %v15000_v38, %v8684_v49  ;;  %v8839_v18 = vld [vmem:[%s12227_s8 + $0x1a8] sm:$0xff] }
 0x837   : > { %v8976_v4 = vmax.f32 %v8928_v37, 0.0  ;;  %v8929_v10 = vadd.f32 %v8881_v23, %v8827_v63  ;;  %v8837_v37 = vld [vmem:[%s12227_s8 + $0x198] sm:$0xff] }
 0x838   : > { %v8974_v57 = vmax.f32 %v8926_v30, 0.0  ;;  %v8927_v8 = vadd.f32 %v8879_v13, %v8825_v31 }
 0x839   : > { %9024 = vst [vmem:[%s15013_s22 + $0x110] sm:$0xff] %v8976_v4  ;;  %v8977_v32 = vmax.f32 %v8929_v10, 0.0 }
 0x83a   : > { %9022 = vst [vmem:[%s15013_s22 + $0x100] sm:$0xff] %v8974_v57  ;;  %v8975_v62 = vmax.f32 %v8927_v8, 0.0  ;;  %v11222_v5 = vpop.f32.mrb[36].mxu1 }
 0x83b   : > { %9025 = vst [vmem:[%s15013_s22 + $0x118] sm:$0xff] %v8977_v32  ;;  %v8884_v52 = vadd.f32 %v11222_v5, %v15000_v38  ;;  %v8697_v9 = vpop.f32.mrb[37].mxu1 }
 0x83c   : > { %9023 = vst [vmem:[%s15013_s22 + $0x108] sm:$0xff] %v8975_v62  ;;  %v8882_v27 = vadd.f32 %v15000_v38, %v8697_v9  ;;  %v11223_v16 = vpop.f32.mrb[38].mxu1 }
 0x83d   : > { %v8932_v12 = vadd.f32 %v8884_v52, %v8830_v7  ;;  %v8885_v35 = vadd.f32 %v11223_v16, %v15000_v38  ;;  %v8700_v45 = vpop.f32.mrb[39].mxu1 }
 0x83e   : > { %v8930_v28 = vadd.f32 %v8882_v27, %v8828_v53  ;;  %v8883_v34 = vadd.f32 %v15000_v38, %v8700_v45 }
 0x83f   : > { %v8980_v36 = vmax.f32 %v8932_v12, 0.0  ;;  %v8933_v19 = vadd.f32 %v8885_v35, %v8831_v11 }
 0x840   : > { %v8978_v0 = vmax.f32 %v8930_v28, 0.0  ;;  %v8931_v50 = vadd.f32 %v8883_v34, %v8829_v33 }
 0x841   : > { %9028 = vst [vmem:[%s15013_s22 + $0x130] sm:$0xff] %v8980_v36  ;;  %v8981_v24 = vmax.f32 %v8933_v19, 0.0 }
 0x842   : > { %9026 = vst [vmem:[%s15013_s22 + $0x120] sm:$0xff] %v8978_v0  ;;  %v8979_v15 = vmax.f32 %v8931_v50, 0.0  ;;  %v11226_v39 = vpop.f32.mrb[40].mxu1 }
 0x843   : > { %9029 = vst [vmem:[%s15013_s22 + $0x138] sm:$0xff] %v8981_v24  ;;  %v8888_v43 = vadd.f32 %v11226_v39, %v15000_v38  ;;  %v8713_v3 = vpop.f32.mrb[41].mxu1 }
 0x844   : > { %9027 = vst [vmem:[%s15013_s22 + $0x128] sm:$0xff] %v8979_v15  ;;  %v8886_v1 = vadd.f32 %v15000_v38, %v8713_v3  ;;  %v11227_v48 = vpop.f32.mrb[42].mxu1 }
 0x845   : > { %v8936_v44 = vadd.f32 %v8888_v43, %v8834_v17  ;;  %v8889_v61 = vadd.f32 %v11227_v48, %v15000_v38  ;;  %v8716_v20 = vpop.f32.mrb[43].mxu1 }
 0x846   : > { %v8934_v21 = vadd.f32 %v8886_v1, %v8832_v29  ;;  %v8887_v41 = vadd.f32 %v15000_v38, %v8716_v20 }
 0x847   : > { %v8984_v14 = vmax.f32 %v8936_v44, 0.0  ;;  %v8937_v26 = vadd.f32 %v8889_v61, %v8835_v22 }
 0x848   : > { %v8982_v59 = vmax.f32 %v8934_v21, 0.0  ;;  %v8935_v58 = vadd.f32 %v8887_v41, %v8833_v56 }
 0x849   : > { %9032 = vst [vmem:[%s15013_s22 + $0x150] sm:$0xff] %v8984_v14  ;;  %v8985_v55 = vmax.f32 %v8937_v26, 0.0 }
 0x84a   : > { %9030 = vst [vmem:[%s15013_s22 + $0x140] sm:$0xff] %v8982_v59  ;;  %v8983_v6 = vmax.f32 %v8935_v58, 0.0  ;;  %v11230_v2 = vpop.f32.mrb[44].mxu1 }
 0x84b   : > { %9033 = vst [vmem:[%s15013_s22 + $0x158] sm:$0xff] %v8985_v55  ;;  %v8892_v47 = vadd.f32 %v11230_v2, %v15000_v38  ;;  %v8729_v51 = vpop.f32.mrb[45].mxu1 }
 0x84c   : > { %9031 = vst [vmem:[%s15013_s22 + $0x148] sm:$0xff] %v8983_v6  ;;  %v8890_v46 = vadd.f32 %v15000_v38, %v8729_v51  ;;  %v11231_v60 = vpop.f32.mrb[46].mxu1 }
 0x84d   : > { %v8940_v25 = vadd.f32 %v8892_v47, %v8838_v40  ;;  %v8893_v42 = vadd.f32 %v11231_v60, %v15000_v38  ;;  %v8732_v63 = vpop.f32.mrb[47].mxu1 }
 0x84e   : > { %v8938_v23 = vadd.f32 %v8890_v46, %v8836_v54  ;;  %v8891_v49 = vadd.f32 %v15000_v38, %v8732_v63 }
 0x84f   : > { %v8988_v31 = vmax.f32 %v8940_v25, 0.0  ;;  %v8941_v30 = vadd.f32 %v8893_v42, %v8839_v18 }
 0x850   : > { %v8986_v13 = vmax.f32 %v8938_v23, 0.0  ;;  %v8939_v4 = vadd.f32 %v8891_v49, %v8837_v37 }
 0x851   : > { %9036 = vst [vmem:[%s15013_s22 + $0x170] sm:$0xff] %v8988_v31  ;;  %v8989_v10 = vmax.f32 %v8941_v30, 0.0 }
 0x852   : > { %9034 = vst [vmem:[%s15013_s22 + $0x160] sm:$0xff] %v8986_v13  ;;  %v8987_v57 = vmax.f32 %v8939_v4, 0.0 }
 0x853   : > { %9037 = vst [vmem:[%s15013_s22 + $0x178] sm:$0xff] %v8989_v10 }
 0x854   : > { %9035 = vst [vmem:[%s15013_s22 + $0x168] sm:$0xff] %v8987_v57 }
 0x855 PF: > { %s16_s21 = sadd.s32 1, %s12166_s21  }
 0x856   : > { %p13_p4 = scmp.ge.s32.totalorder %s16_s21, 4  }
 0x858   :  { %15 = sbr.rel (!%p13_p4) target bundleno = 1 (0x1), region = 90 }

</bundles_post_ra>
